<compile_context>
chip_gen: v7x
topology: tpu7x:2x2x1
jax: 0.10.0
libtpu: 0.0.40
codegen_flags: <defaults>
</compile_context>

<pallas_src>
import jax
import jax.numpy as jnp
from jax.experimental import pallas as pl
from jax.experimental.pallas import tpu as pltpu


_VMEM_SPEC = pl.BlockSpec(memory_space=pltpu.MemorySpace.VMEM)


# -----------------------------------------------------------------------------
# Kernel 1: Conv2d(kernel=(2,1), stride=1, pad=0) as a single K=2*Cin matmul over
#           the whole batch + Softmax(dim=channels) + fused (Att*x + x) scaling.
#           Output is emitted in bf16 to feed the bf16 dense head directly.
# -----------------------------------------------------------------------------
def conv_softmax_att_kernel(x_ref, w_ref, b_ref, att1_ref, o_ref):
    # x_ref:    (M, 2*Cin)  f32, rows = b*R + r, both conv taps concatenated on K
    # w_ref:    (2*Cin, 64) f32, stacked [w_tap0; w_tap1]
    # b_ref:    (1, 64)     f32
    # att1_ref: (R, 1)      f32, precomputed (Att + 1) per spatial position
    # o_ref:    (M, 64)     bf16
    z = jnp.dot(x_ref[...], w_ref[...], preferred_element_type=jnp.float32) + b_ref[...]
    # nn.Softmax() with implicit dim on a 4D NCHW tensor resolves to dim=1
    # (channels) in PyTorch; channels sit on the lane axis in this layout.
    z = z - jnp.max(z, axis=-1, keepdims=True)
    e = jnp.exp(z)
    denom = jnp.sum(e, axis=-1, keepdims=True)
    # Broadcast the per-position scale to all batches in-kernel (sublane concat;
    # M = B * R with both static at trace time).
    reps = x_ref.shape[0] // att1_ref.shape[0]
    att1 = jnp.concatenate([att1_ref[...]] * reps, axis=0)          # (M, 1)
    # Att*softmax + softmax == softmax * (Att + 1): fold the residual scale into
    # the normalization -> one multiply per element (exact division kept).
    o_ref[...] = (e * (att1 / denom)).astype(o_ref.dtype)


# -----------------------------------------------------------------------------
# Kernel 2: dense head  Linear(F,200) -> ReLU6 -> Dropout(eval: identity) -> Linear(200,L)
#           xf and w1 arrive in bf16 (halves the dominant weight DMA); both dots
#           accumulate in f32.  Small weights stay f32 for accuracy.
# -----------------------------------------------------------------------------
def dense_kernel(xf_ref, w1_ref, b1_ref, w2_ref, b2_ref, o_ref):
    h = jnp.dot(xf_ref[...], w1_ref[...], preferred_element_type=jnp.float32) + b1_ref[...]
    h = jnp.clip(h, 0.0, 6.0)                       # ReLU6; Dropout is identity in eval.
    o_ref[...] = jnp.dot(h, w2_ref[...], preferred_element_type=jnp.float32) + b2_ref[...]


# -----------------------------------------------------------------------------
# One-time (outside jit) repacking of weights into kernel-friendly layouts.
# -----------------------------------------------------------------------------
def prepare_params(params):
    w_conv = params["w_conv"]                        # (64, Cin, 2, 1) torch layout
    cout = w_conv.shape[0]
    # Stack the two (2,1)-kernel taps along K -> a single (2*Cin, 64) operand.
    w_cat = jnp.concatenate(
        [jnp.transpose(w_conv[:, :, 0, 0]), jnp.transpose(w_conv[:, :, 1, 0])], axis=0)

    w_d1 = params["w_d1"]                            # (U, F), F in NCHW-flatten order
    u, f = w_d1.shape
    r = f // cout
    # Permute columns from channel-major (c*R + r) to position-major (r*C + c) so
    # the conv output's natural (rows, channels) layout flattens straight into the
    # dense head, then pre-transpose for xf @ w1p.  Stored in bf16: this is the
    # dominant per-call HBM->VMEM transfer (5.7 MB f32 -> 2.86 MB bf16).
    w1p = jnp.transpose(w_d1.reshape(u, cout, r), (0, 2, 1)).reshape(u, f).T   # (F, U)
    w1p_bf16 = w1p.astype(jnp.bfloat16)

    # Attention preprocessing hoisted out of the jitted forward (fixed in eval):
    # (Att + 1) per spatial position, shaped (R, 1) for the in-kernel broadcast.
    attention = params["attention"]                  # (attnum, H-1, W)
    att1 = (jnp.sum(attention, axis=0) / attention.shape[0] + 1.0).reshape(-1, 1)

    return {
        "w_cat": w_cat.astype(jnp.float32),                        # (2*Cin, 64)
        "b_conv": params["b_conv"].reshape(1, cout).astype(jnp.float32),  # (1, 64)
        "att1": att1.astype(jnp.float32),                          # (R, 1)
        "w1p_bf16": w1p_bf16,                                      # (F, U) bf16
        "b1": params["b_d1"].reshape(1, -1).astype(jnp.float32),   # (1, U)
        "w2t": jnp.transpose(params["w_d2"]).astype(jnp.float32),  # (U, L)
        "b2": params["b_d2"].reshape(1, -1).astype(jnp.float32),   # (1, L)
        "attention": attention,                                    # returned as-is
    }


# -----------------------------------------------------------------------------
# Forward pass (jitted).
# -----------------------------------------------------------------------------
def model_forward(data_nchw, feas, startnode, prepared):
    # feas / startnode are unused by the reference forward pass.
    del feas, startnode
    B, Cin, H, W = data_nchw.shape
    Hm1 = H - 1
    R = Hm1 * W
    Cout = prepared["w_cat"].shape[1]
    L = prepared["w2t"].shape[1]

    # Tiny XLA prep (a few KB, one fusion): NCHW -> rows with the two conv taps
    # concatenated on K.
    x_nhwc = jnp.transpose(data_nchw, (0, 2, 3, 1))                       # (B, H, W, Cin)
    x_rows = jnp.concatenate([x_nhwc[:, :Hm1], x_nhwc[:, 1:]], axis=-1)   # (B, Hm1, W, 2Cin)
    x_rows = x_rows.reshape(B * R, 2 * Cin)

    # Conv + softmax + attention residual: whole batch in one grid-less step.
    y = pl.pallas_call(
        conv_softmax_att_kernel,
        out_shape=jax.ShapeDtypeStruct((B * R, Cout), jnp.bfloat16),
        in_specs=[_VMEM_SPEC] * 4,
        out_specs=_VMEM_SPEC,
    )(x_rows, prepared["w_cat"], prepared["b_conv"], prepared["att1"])

    # Row-major contiguous -> this reshape is a free bitcast in XLA (no transpose,
    # no copy); the dense weight was pre-permuted to exactly this flatten order.
    xf = y.reshape(B, R * Cout)

    out = pl.pallas_call(
        dense_kernel,
        out_shape=jax.ShapeDtypeStruct((B, L), jnp.float32),
        in_specs=[_VMEM_SPEC] * 5,
        out_specs=_VMEM_SPEC,
    )(xf, prepared["w1p_bf16"], prepared["b1"], prepared["w2t"], prepared["b2"])

    return out, prepared["attention"]


# -----------------------------------------------------------------------------
# Pure-JAX f32 reference (mirrors the PyTorch forward exactly) for validation.
# -----------------------------------------------------------------------------
def reference_forward(data_nchw, params):
    w_conv, b_conv = params["w_conv"], params["b_conv"]
    attention = params["attention"]
    w_d1, b_d1, w_d2, b_d2 = params["w_d1"], params["b_d1"], params["w_d2"], params["b_d2"]

    att = jnp.sum(attention, axis=0) / attention.shape[0]
    top = data_nchw[:, :, :-1, :]
    bot = data_nchw[:, :, 1:, :]
    z = (jnp.einsum("bchw,oc->bohw", top, w_conv[:, :, 0, 0])
         + jnp.einsum("bchw,oc->bohw", bot, w_conv[:, :, 1, 0])
         + b_conv[None, :, None, None])
    s = jax.nn.softmax(z, axis=1)
    y = att[None, None, :, :] * s + s
    xf = y.reshape(y.shape[0], -1)
    h = jnp.clip(xf @ w_d1.T + b_d1, 0.0, 6.0)
    return h @ w_d2.T + b_d2


if __name__ == "__main__":
    # Small config consistent with the module:
    #   conf.feanum=4, conf.mapsize_a=8, conf.mapsize_b=16, conf.labelnum=5
    B, FEANUM, MAP_A, MAP_B, LABELNUM = 2, 4, 8, 16, 5
    CONVNUM, UNITNUM, ATTNUM = 64, 200, 10
    F = (MAP_A - 1) * MAP_B * CONVNUM

    key = jax.random.PRNGKey(0)
    k = jax.random.split(key, 8)

    params = {
        "w_conv": (0.05 * jax.random.normal(k[0], (CONVNUM, FEANUM, 2, 1))).astype(jnp.float32),
        "b_conv": (0.05 * jax.random.normal(k[1], (CONVNUM,))).astype(jnp.float32),
        "attention": jnp.ones((ATTNUM, MAP_A - 1, MAP_B), jnp.float32),  # torch.ones init
        "w_d1": (0.02 * jax.random.normal(k[2], (UNITNUM, F))).astype(jnp.float32),
        "b_d1": (0.02 * jax.random.normal(k[3], (UNITNUM,))).astype(jnp.float32),
        "w_d2": (0.02 * jax.random.normal(k[4], (LABELNUM, UNITNUM))).astype(jnp.float32),
        "b_d2": (0.02 * jax.random.normal(k[5], (LABELNUM,))).astype(jnp.float32),
    }

    data = jax.random.normal(k[6], (B, FEANUM, MAP_A, MAP_B), jnp.float32)  # NCHW
    feas = jax.random.normal(k[7], (B, 3), jnp.float32)   # unused by forward
    startnode = jnp.zeros((B,), jnp.int32)                 # unused by forward

    prepared = prepare_params(params)          # one-time weight repacking, outside jit
    fwd = jax.jit(model_forward)
    out, attn = fwd(data, feas, startnode, prepared)
    out = jax.block_until_ready(out)

    ref = reference_forward(data, params)
    assert out.shape == (B, LABELNUM) and attn.shape == (ATTNUM, MAP_A - 1, MAP_B)
    # Tolerance loosened vs the f32 reference because the dense weight and its
    # activation are stored/fed in bf16 (expected error ~1e-3 absolute here).
    assert jnp.allclose(out, ref, atol=1e-2, rtol=1e-2), "mismatch vs reference"

    print("KERNEL_OK")
</pallas_src>

<mosaic_0001>
module attributes {stable_mosaic.version = 11 : i64} {
  func.func @conv_softmax_att_kernel(%arg0: memref<224x8xf32, #tpu.memory_space<vmem>>, %arg1: memref<8x64xf32, #tpu.memory_space<vmem>>, %arg2: memref<1x64xf32, #tpu.memory_space<vmem>>, %arg3: memref<112x1xf32, #tpu.memory_space<vmem>>, %arg4: memref<224x64xbf16, #tpu.memory_space<vmem>>) attributes {dimension_semantics = [], scalar_prefetch = 0 : i64, scratch_operands = 0 : i64, tpu.core_type = #tpu.core_type<tc>} {
    %c0 = arith.constant 0 : index
    %c0_0 = arith.constant 0 : index
    %0 = vector.load %arg0[%c0, %c0_0] : memref<224x8xf32, #tpu.memory_space<vmem>>, vector<224x8xf32>
    %c0_1 = arith.constant 0 : index
    %c0_2 = arith.constant 0 : index
    %1 = vector.load %arg1[%c0_1, %c0_2] : memref<8x64xf32, #tpu.memory_space<vmem>>, vector<8x64xf32>
    %cst = arith.constant dense<0.000000e+00> : vector<224x64xf32>
    %2 = tpu.matmul %0, %1, %cst {dimension_numbers = #tpu.dot_dimension_numbers<[1], [0], [0], [1], [0, 0, 1, 1], [], []>} : vector<224x8xf32>, vector<8x64xf32>, vector<224x64xf32> -> vector<224x64xf32>
    %c0_3 = arith.constant 0 : index
    %c0_4 = arith.constant 0 : index
    %3 = vector.load %arg2[%c0_3, %c0_4] : memref<1x64xf32, #tpu.memory_space<vmem>>, vector<1x64xf32>
    %4 = vector.broadcast %3 : vector<1x64xf32> to vector<224x64xf32>
    %5 = arith.addf %2, %4 : vector<224x64xf32>
    %cst_5 = arith.constant dense<0xFF800000> : vector<224xf32>
    %6 = vector.multi_reduction <maximumf>, %5, %cst_5 [1] : vector<224x64xf32> to vector<224xf32>
    %7 = vector.shape_cast %6 : vector<224xf32> to vector<224x1xf32>
    %8 = vector.broadcast %7 : vector<224x1xf32> to vector<224x64xf32>
    %9 = arith.subf %5, %8 : vector<224x64xf32>
    %10 = math.exp %9 : vector<224x64xf32>
    %cst_6 = arith.constant dense<0.000000e+00> : vector<224xf32>
    %11 = vector.multi_reduction <add>, %10, %cst_6 [1] : vector<224x64xf32> to vector<224xf32>
    %12 = vector.shape_cast %11 : vector<224xf32> to vector<224x1xf32>
    %c0_7 = arith.constant 0 : index
    %c0_8 = arith.constant 0 : index
    %13 = vector.load %arg3[%c0_7, %c0_8] : memref<112x1xf32, #tpu.memory_space<vmem>>, vector<112x1xf32>
    %14 = tpu.concatenate %13, %13 in 0 : vector<112x1xf32>, vector<112x1xf32> -> vector<224x1xf32>
    %15 = arith.divf %14, %12 : vector<224x1xf32>
    %16 = vector.broadcast %15 : vector<224x1xf32> to vector<224x64xf32>
    %17 = arith.mulf %10, %16 : vector<224x64xf32>
    %18 = arith.truncf %17 : vector<224x64xf32> to vector<224x64xbf16>
    %c0_9 = arith.constant 0 : index
    %c0_10 = arith.constant 0 : index
    %19 = vector.load %arg4[%c0_9, %c0_10] : memref<224x64xbf16, #tpu.memory_space<vmem>>, vector<224x64xbf16>
    tpu.vector_store %arg4[%c0_9, %c0_10], %18 {strides = array<i32>} : memref<224x64xbf16, #tpu.memory_space<vmem>>, vector<224x64xbf16>,
    return
  }
}

module attributes {stable_mosaic.version = 11 : i64} {
  func.func @dense_kernel(%arg0: memref<2x7168xbf16, #tpu.memory_space<vmem>>, %arg1: memref<7168x200xbf16, #tpu.memory_space<vmem>>, %arg2: memref<1x200xf32, #tpu.memory_space<vmem>>, %arg3: memref<200x5xf32, #tpu.memory_space<vmem>>, %arg4: memref<1x5xf32, #tpu.memory_space<vmem>>, %arg5: memref<2x5xf32, #tpu.memory_space<vmem>>) attributes {dimension_semantics = [], scalar_prefetch = 0 : i64, scratch_operands = 0 : i64, tpu.core_type = #tpu.core_type<tc>} {
    %c0 = arith.constant 0 : index
    %c0_0 = arith.constant 0 : index
    %0 = vector.load %arg0[%c0, %c0_0] : memref<2x7168xbf16, #tpu.memory_space<vmem>>, vector<2x7168xbf16>
    %c0_1 = arith.constant 0 : index
    %c0_2 = arith.constant 0 : index
    %1 = vector.load %arg1[%c0_1, %c0_2] : memref<7168x200xbf16, #tpu.memory_space<vmem>>, vector<7168x200xbf16>
    %cst = arith.constant dense<0.000000e+00> : vector<2x200xf32>
    %2 = tpu.matmul %0, %1, %cst {dimension_numbers = #tpu.dot_dimension_numbers<[1], [0], [0], [1], [0, 0, 1, 1], [], []>} : vector<2x7168xbf16>, vector<7168x200xbf16>, vector<2x200xf32> -> vector<2x200xf32>
    %c0_3 = arith.constant 0 : index
    %c0_4 = arith.constant 0 : index
    %3 = vector.load %arg2[%c0_3, %c0_4] : memref<1x200xf32, #tpu.memory_space<vmem>>, vector<1x200xf32>
    %4 = vector.broadcast %3 : vector<1x200xf32> to vector<2x200xf32>
    %5 = arith.addf %2, %4 : vector<2x200xf32>
    %cst_5 = arith.constant 0.000000e+00 : f32
    %cst_6 = arith.constant 6.000000e+00 : f32
    %6 = vector.broadcast %cst_5 : f32 to vector<2x200xf32>
    %7 = arith.maximumf %6, %5 : vector<2x200xf32>
    %8 = vector.broadcast %cst_6 : f32 to vector<2x200xf32>
    %9 = arith.minimumf %8, %7 : vector<2x200xf32>
    %c0_7 = arith.constant 0 : index
    %c0_8 = arith.constant 0 : index
    %10 = vector.load %arg3[%c0_7, %c0_8] : memref<200x5xf32, #tpu.memory_space<vmem>>, vector<200x5xf32>
    %cst_9 = arith.constant dense<0.000000e+00> : vector<2x5xf32>
    %11 = tpu.matmul %9, %10, %cst_9 {dimension_numbers = #tpu.dot_dimension_numbers<[1], [0], [0], [1], [0, 0, 1, 1], [], []>} : vector<2x200xf32>, vector<200x5xf32>, vector<2x5xf32> -> vector<2x5xf32>
    %c0_10 = arith.constant 0 : index
    %c0_11 = arith.constant 0 : index
    %12 = vector.load %arg4[%c0_10, %c0_11] : memref<1x5xf32, #tpu.memory_space<vmem>>, vector<1x5xf32>
    %13 = vector.broadcast %12 : vector<1x5xf32> to vector<2x5xf32>
    %14 = arith.addf %11, %13 : vector<2x5xf32>
    %c0_12 = arith.constant 0 : index
    %c0_13 = arith.constant 0 : index
    %15 = vector.load %arg5[%c0_12, %c0_13] : memref<2x5xf32, #tpu.memory_space<vmem>>, vector<2x5xf32>
    tpu.vector_store %arg5[%c0_12, %c0_13], %14 {strides = array<i32>} : memref<2x5xf32, #tpu.memory_space<vmem>>, vector<2x5xf32>,
    return
  }
}

</mosaic_0001>

<bundles_post_ra>
// kernel: model_forward.2
= control target key start
LH: loop header
LB: loop body
LE: loop exit
PB: predicated region body
PF: predicated region fallthrough
CT: control target
= control target key end

     0   :  { %9 = vsyncpa [#allocation3], 0  ;;  %s1958_s0 = inlined_call_operand.vmem [shape: f32[224,8], index: 0, kind: input, shape index: {}]   ;;  %s1959_s1 = inlined_call_operand.hbm [shape: f32[8,64], index: 1, kind: input, shape index: {}]   ;;  %s1960_s2 = inlined_call_operand.hbm [shape: f32[1,64], index: 2, kind: input, shape index: {}]   ;;  %s1961_s3 = inlined_call_operand.vmem [shape: f32[112,1], index: 3, kind: input, shape index: {}]   ;;  %s1962_s4 = inlined_call_operand.vmem [shape: bf16[224,64], index: 4, kind: output, shape index: {}]  }
   0x1   :  { %10 = vsyncpa [#allocation5], 0  ;;  %s1330_s15 = smov [#allocation2]   ;;  %s1331_s17 = smov [#allocation4]  }
   0x2   :  { %s19_s16 = sshll.u32 %s1330_s15, 4  ;;  %s29_s18 = sshll.u32 %s1331_s17, 4  ;;  %s20_s16 = int_to_ptr.vmem [resolvable:$true] %s19_s16  ;;  %s30_s18 = int_to_ptr.vmem [resolvable:$true] %s29_s18 }
   0x3   :  { %s1282_s21 = scalar_lea.hbm %s1959_s1, 128 }
   0x4   :  { %p1283_p0 = scmp.ne.s32.totalorder %s1959_s1, %s1282_s21  ;;  %p1286_p1 = scmp.lt.u32.totalorder %s1282_s21, %s1959_s1 }
   0x6   :  { %p1288_p2 = pnand %p1286_p1, %p1283_p0 }
   0x8   :  { %1291 = shalt.err (!%p1288_p2)
}
   0x9   :  { %s1292_s26 = scalar_lea.vmem %s20_s16, 128  ;;  %p1297_p4 = scmp.lt.s32.totalorder %s20_s16, %s20_s16 }
   0xa   :  { %p1293_p3 = scmp.ne.s32.totalorder %s20_s16, %s1292_s26  ;;  %p1298_p5 = scmp.lt.s32.totalorder %s1292_s26, %s1292_s26 }
   0xc   :  { %p1299_p6 = por %p1298_p5, %p1297_p4 }
   0xe   :  { %p1300_p7 = pnand %p1299_p6, %p1293_p3 }
  0x10   :  { %1303 = shalt.err (!%p1300_p7)
}
  0x11   :  { %22 = dma.hbm_to_vmem [thread:$0]  %s1959_s1, 128, %s20_s16, [#allocation3]  }
  0x12   :  { %s1304_s5 = scalar_lea.hbm %s1960_s2, 16 }
  0x13   :  { %p1305_p8 = scmp.ne.s32.totalorder %s1960_s2, %s1304_s5  ;;  %p1308_p9 = scmp.lt.u32.totalorder %s1304_s5, %s1960_s2 }
  0x15   :  { %p1310_p10 = pnand %p1308_p9, %p1305_p8 }
  0x17   :  { %1313 = shalt.err (!%p1310_p10)
}
  0x18   :  { %s1314_s10 = scalar_lea.vmem %s30_s18, 16  ;;  %s1318_s11 = scalar_lea.vmem %s30_s18, 32 }
  0x19   :  { %p1315_p11 = scmp.ne.s32.totalorder %s30_s18, %s1314_s10  ;;  %p1319_p12 = scmp.lt.s32.totalorder %s30_s18, %s30_s18 }
  0x1a   :  { %p1320_p13 = scmp.lt.s32.totalorder %s1318_s11, %s1314_s10 }
  0x1c   :  { %p1321_p0 = por %p1320_p13, %p1319_p12 }
  0x1e   :  { %p1322_p1 = pnand %p1321_p0, %p1315_p11 }
  0x20   :  { %1325 = shalt.err (!%p1322_p1)
}
  0x21   :  { %32 = dma.hbm_to_vmem [thread:$0]  %s1960_s2, 16, %s30_s18, [#allocation5]  }
  0x22   :  { %1326 = dma.done.wait [#allocation3], 128  }
  0x23   :  { %1327 = vsyncadd [#allocation3], 4294967168 }
  0x24   :  { %1328 = dma.done.wait [#allocation5], 16  }
  0x25   :  { %1329 = vsyncadd [#allocation5], 4294967280  ;;  %v69_v0 = vld [vmem:[#allocation2] sm:$0xff]  ;;  %vm77_vm0 = vcmask 64512   ;;  %v55_v2 = vld [vmem:[%s1958_s0 + $0x70] sm:$0xff]  ;;  %vm367_vm1 = vcmask 523264  }
  0x26   :  { %v41_v1 = vld [vmem:[%s1958_s0] sm:$0xff]  ;;  %1119 = vmatprep.subr.mxu0 %v69_v0  ;;  %1163 = vmatprep.subr.mxu1 %v69_v0  ;;  %v42_v3 = vld [vmem:[%s1958_s0 + $0x8] sm:$0xff]  ;;  %v56_v4 = vld [vmem:[%s1958_s0 + $0x78] sm:$0xff]  ;;  %vm970_vm2 = vcmask 519168  }
  0x27   :  { %1120 = vmatpush3.msra.mxu0 %v69_v0  ;;  %1164 = vmatpush3.msra.mxu1 %v69_v0  ;;  %v43_v5 = vld [vmem:[%s1958_s0 + $0x10] sm:$0xff]  ;;  %v57_v6 = vld [vmem:[%s1958_s0 + $0x80] sm:$0xff]  ;;  %v44_v7 = vld [vmem:[%s1958_s0 + $0x18] sm:$0xff] }
  0x28   :  { %1121 = vmatprep.mubr.msk.f32.mxu0 %vm77_vm0, %v41_v1  ;;  %1142 = vmatprep.mubr.msk.f32.mxu1 %vm77_vm0, %v55_v2  ;;  %v58_v8 = vld [vmem:[%s1958_s0 + $0x88] sm:$0xff]  ;;  %v45_v9 = vld [vmem:[%s1958_s0 + $0x20] sm:$0xff]  ;;  %v59_v10 = vld [vmem:[%s1958_s0 + $0x90] sm:$0xff] }
  0x29   :  { %1122 = vmatmul.mubr.msk.f32.vlgmr.msra.gmra.mrb[0].mxu0 %vm77_vm0, %v42_v3  ;;  %1143 = vmatmul.mubr.msk.f32.vlgmr.msra.gmra.mrb[0].mxu1 %vm77_vm0, %v56_v4  ;;  %v46_v11 = vld [vmem:[%s1958_s0 + $0x28] sm:$0xff]  ;;  %v60_v12 = vld [vmem:[%s1958_s0 + $0x98] sm:$0xff]  ;;  %v47_v13 = vld [vmem:[%s1958_s0 + $0x30] sm:$0xff] }
  0x2a   :  { %1124 = vmatprep.mubr.msk.f32.mxu0 %vm77_vm0, %v43_v5  ;;  %1145 = vmatprep.mubr.msk.f32.mxu1 %vm77_vm0, %v57_v6  ;;  %v61_v14 = vld [vmem:[%s1958_s0 + $0xa0] sm:$0xff]  ;;  %v48_v15 = vld [vmem:[%s1958_s0 + $0x38] sm:$0xff]  ;;  %v62_v16 = vld [vmem:[%s1958_s0 + $0xa8] sm:$0xff] }
  0x2b   :  { %v49_v17 = vld [vmem:[%s1958_s0 + $0x40] sm:$0xff]  ;;  %v63_v18 = vld [vmem:[%s1958_s0 + $0xb0] sm:$0xff]  ;;  %v50_v19 = vld [vmem:[%s1958_s0 + $0x48] sm:$0xff] }
  0x2c   :  { %v64_v20 = vld [vmem:[%s1958_s0 + $0xb8] sm:$0xff]  ;;  %v51_v21 = vld [vmem:[%s1958_s0 + $0x50] sm:$0xff]  ;;  %v65_v22 = vld [vmem:[%s1958_s0 + $0xc0] sm:$0xff] }
  0x2d   :  { %1125 = vmatmul.mubr.msk.f32.gmra.mrb[2].mxu0 %vm77_vm0, %v44_v7  ;;  %1146 = vmatmul.mubr.msk.f32.gmra.mrb[2].mxu1 %vm77_vm0, %v58_v8  ;;  %v52_v23 = vld [vmem:[%s1958_s0 + $0x58] sm:$0xff]  ;;  %v66_v24 = vld [vmem:[%s1958_s0 + $0xc8] sm:$0xff]  ;;  %v53_v25 = vld [vmem:[%s1958_s0 + $0x60] sm:$0xff] }
  0x2e   :  { %1127 = vmatprep.mubr.msk.f32.mxu0 %vm77_vm0, %v45_v9  ;;  %1148 = vmatprep.mubr.msk.f32.mxu1 %vm77_vm0, %v59_v10  ;;  %v67_v26 = vld [vmem:[%s1958_s0 + $0xd0] sm:$0xff]  ;;  %v54_v27 = vld [vmem:[%s1958_s0 + $0x68] sm:$0xff]  ;;  %v68_v28 = vld [vmem:[%s1958_s0 + $0xd8] sm:$0xff] }
  0x2f   :  { %v1494_v29 = vld [vmem:[#allocation4] ss:$0 sm:$0xff] }
  0x31   :  { %1128 = vmatmul.mubr.msk.f32.gmra.mrb[4].mxu0 %vm77_vm0, %v46_v11  ;;  %1149 = vmatmul.mubr.msk.f32.gmra.mrb[4].mxu1 %vm77_vm0, %v60_v12 }
  0x32   :  { %1130 = vmatprep.mubr.msk.f32.mxu0 %vm77_vm0, %v47_v13  ;;  %1151 = vmatprep.mubr.msk.f32.mxu1 %vm77_vm0, %v61_v14 }
  0x35   :  { %1131 = vmatmul.mubr.msk.f32.gmra.mrb[6].mxu0 %vm77_vm0, %v48_v15  ;;  %1152 = vmatmul.mubr.msk.f32.gmra.mrb[6].mxu1 %vm77_vm0, %v62_v16 }
  0x36   :  { %1133 = vmatprep.mubr.msk.f32.mxu0 %vm77_vm0, %v49_v17  ;;  %1154 = vmatprep.mubr.msk.f32.mxu1 %vm77_vm0, %v63_v18 }
  0x39   :  { %1134 = vmatmul.mubr.msk.f32.gmra.mrb[8].mxu0 %vm77_vm0, %v50_v19  ;;  %1155 = vmatmul.mubr.msk.f32.gmra.mrb[8].mxu1 %vm77_vm0, %v64_v20 }
  0x3a   :  { %1136 = vmatprep.mubr.msk.f32.mxu0 %vm77_vm0, %v51_v21  ;;  %1157 = vmatprep.mubr.msk.f32.mxu1 %vm77_vm0, %v65_v22 }
  0x3d   :  { %1137 = vmatmul.mubr.msk.f32.gmra.mrb[10].mxu0 %vm77_vm0, %v52_v23  ;;  %1158 = vmatmul.mubr.msk.f32.gmra.mrb[10].mxu1 %vm77_vm0, %v66_v24 }
  0x3e   :  { %1139 = vmatprep.mubr.msk.f32.mxu0 %vm77_vm0, %v53_v25  ;;  %1160 = vmatprep.mubr.msk.f32.mxu1 %vm77_vm0, %v67_v26 }
  0x41   :  { %1140 = vmatmul.mubr.msk.f32.gmra.mrb[12].mxu0 %vm77_vm0, %v54_v27  ;;  %1161 = vmatmul.mubr.msk.f32.gmra.mrb[12].mxu1 %vm77_vm0, %v68_v28 }
  0xfc   :  { %v1123_v30 = vpop.f32.mrb[0].mxu0  ;;  %v1144_v31 = vpop.f32.mrb[0].mxu1 }
  0xfd   :  { %v1497_v32 = vadd.f32 %v1123_v30, %v1494_v29  ;;  %v1500_v33 = vadd.f32 %v1144_v31, %v1494_v29  ;;  %v228_v34 = vpop.f32.mrb[1].mxu0  ;;  %v298_v35 = vpop.f32.mrb[1].mxu1 }
  0xfe   :  { %v1503_v36 = vadd.f32 %v1494_v29, %v228_v34  ;;  %v1516_v45 = vadd.f32 %v1494_v29, %v298_v35 }
  0xff   :  { %v413_v37 = vsel %vm367_vm1, %v1500_v33, -inf  ;;  %v371_v38 = vsel %vm367_vm1, %v1497_v32, -inf }
 0x100   :  { %414 = vmax.xlane.f32.xlu1 %v413_v37  ;;  %372 = vmax.xlane.f32.xlu0 %v371_v38  ;;  %v1126_v39 = vpop.f32.mrb[2].mxu0  ;;  %v1147_v40 = vpop.f32.mrb[2].mxu1  ;;  %v368_v47 = vsel %vm367_vm1, %v1503_v36, -inf  ;;  %v410_v55 = vsel %vm367_vm1, %v1516_v45, -inf }
 0x101   :  { %v1510_v41 = vadd.f32 %v1126_v39, %v1494_v29  ;;  %v1513_v42 = vadd.f32 %v1147_v40, %v1494_v29  ;;  %v238_v43 = vpop.f32.mrb[3].mxu0  ;;  %v308_v44 = vpop.f32.mrb[3].mxu1 }
 0x102   :  { %v1523_v50 = vadd.f32 %v1494_v29, %v308_v44  ;;  %v1528_v54 = vadd.f32 %v1494_v29, %v238_v43 }
 0x103   :  { %v377_v46 = vsel %vm367_vm1, %v1510_v41, -inf  ;;  %v419_v51 = vsel %vm367_vm1, %v1513_v42, -inf }
 0x104   :  { %378 = vmax.xlane.f32.xlu1 %v377_v46  ;;  %369 = vmax.xlane.f32.xlu0 %v368_v47  ;;  %v1129_v48 = vpop.f32.mrb[4].mxu0  ;;  %v1150_v49 = vpop.f32.mrb[4].mxu1  ;;  %v416_v60 = vsel %vm367_vm1, %v1523_v50, -inf  ;;  %v374_v63 = vsel %vm367_vm1, %v1528_v54, -inf }
 0x105   :  { %v248_v52 = vpop.f32.mrb[5].mxu0  ;;  %v318_v53 = vpop.f32.mrb[5].mxu1  ;;  %v1533_v58 = vadd.f32 %v1129_v48, %v1494_v29  ;;  %v1543_v2 = vadd.f32 %v1150_v49, %v1494_v29 }
 0x106   :  { %v1536_v59 = vadd.f32 %v1494_v29, %v248_v52  ;;  %v1546_v3 = vadd.f32 %v1494_v29, %v318_v53 }
 0x107   :  { %v383_v4 = vsel %vm367_vm1, %v1533_v58, -inf  ;;  %v425_v12 = vsel %vm367_vm1, %v1543_v2, -inf }
 0x108   :  { %420 = vmax.xlane.f32.xlu1 %v419_v51  ;;  %411 = vmax.xlane.f32.xlu0 %v410_v55  ;;  %v1132_v56 = vpop.f32.mrb[6].mxu0  ;;  %v1153_v57 = vpop.f32.mrb[6].mxu1  ;;  %v380_v5 = vsel %vm367_vm1, %v1536_v59, -inf  ;;  %v422_v13 = vsel %vm367_vm1, %v1546_v3, -inf }
 0x109   :  { %v258_v61 = vpop.f32.mrb[7].mxu0  ;;  %v328_v62 = vpop.f32.mrb[7].mxu1  ;;  %v1553_v10 = vadd.f32 %v1132_v56, %v1494_v29  ;;  %v1563_v18 = vadd.f32 %v1153_v57, %v1494_v29 }
 0x10a   :  { %v1556_v11 = vadd.f32 %v1494_v29, %v258_v61  ;;  %v1566_v19 = vadd.f32 %v1494_v29, %v328_v62 }
 0x10b   :  { %v389_v20 = vsel %vm367_vm1, %v1553_v10, -inf  ;;  %v431_v26 = vsel %vm367_vm1, %v1563_v18, -inf }
 0x10c   :  { %375 = vmax.xlane.f32.xlu1 %v374_v63  ;;  %417 = vmax.xlane.f32.xlu0 %v416_v60  ;;  %v1135_v0 = vpop.f32.mrb[8].mxu0  ;;  %v1156_v1 = vpop.f32.mrb[8].mxu1  ;;  %v386_v21 = vsel %vm367_vm1, %v1556_v11, -inf  ;;  %v428_v27 = vsel %vm367_vm1, %v1566_v19, -inf }
 0x10d   :  { %v268_v6 = vpop.f32.mrb[9].mxu0  ;;  %v338_v7 = vpop.f32.mrb[9].mxu1  ;;  %v1573_v24 = vadd.f32 %v1135_v0, %v1494_v29  ;;  %v1583_v28 = vadd.f32 %v1156_v1, %v1494_v29 }
 0x10e   :  { %v1576_v25 = vadd.f32 %v1494_v29, %v268_v6  ;;  %v1586_v30 = vadd.f32 %v1494_v29, %v338_v7 }
 0x10f   :  { %v395_v31 = vsel %vm367_vm1, %v1573_v24, -inf  ;;  %v437_v38 = vsel %vm367_vm1, %v1583_v28, -inf }
 0x110   :  { %384 = vmax.xlane.f32.xlu1 %v383_v4  ;;  %381 = vmax.xlane.f32.xlu0 %v380_v5  ;;  %v1138_v8 = vpop.f32.mrb[10].mxu0  ;;  %v1159_v9 = vpop.f32.mrb[10].mxu1  ;;  %v392_v34 = vsel %vm367_vm1, %v1576_v25, -inf  ;;  %v434_v39 = vsel %vm367_vm1, %v1586_v30, -inf }
 0x111   :  { %v278_v14 = vpop.f32.mrb[11].mxu0  ;;  %v348_v15 = vpop.f32.mrb[11].mxu1  ;;  %v1593_v35 = vadd.f32 %v1138_v8, %v1494_v29  ;;  %v1603_v40 = vadd.f32 %v1159_v9, %v1494_v29 }
 0x112   :  { %v1596_v37 = vadd.f32 %v1494_v29, %v278_v14  ;;  %v1606_v43 = vadd.f32 %v1494_v29, %v348_v15 }
 0x113   :  { %v401_v44 = vsel %vm367_vm1, %v1593_v35, -inf  ;;  %v443_v49 = vsel %vm367_vm1, %v1603_v40, -inf }
 0x114   :  { %426 = vmax.xlane.f32.xlu1 %v425_v12  ;;  %423 = vmax.xlane.f32.xlu0 %v422_v13  ;;  %v1141_v16 = vpop.f32.mrb[12].mxu0  ;;  %v1162_v17 = vpop.f32.mrb[12].mxu1  ;;  %v398_v46 = vsel %vm367_vm1, %v1596_v37, -inf  ;;  %v440_v51 = vsel %vm367_vm1, %v1606_v43, -inf }
 0x115   :  { %v288_v22 = vpop.f32.mrb[13].mxu0  ;;  %v358_v23 = vpop.f32.mrb[13].mxu1  ;;  %v1613_v47 = vadd.f32 %v1141_v16, %v1494_v29  ;;  %v1623_v52 = vadd.f32 %v1162_v17, %v1494_v29 }
 0x116   :  { %v1616_v48 = vadd.f32 %v1494_v29, %v288_v22  ;;  %v1626_v53 = vadd.f32 %v1494_v29, %v358_v23 }
 0x117   :  { %v407_v55 = vsel %vm367_vm1, %v1613_v47, -inf  ;;  %v449_v57 = vsel %vm367_vm1, %v1623_v52, -inf }
 0x118   :  { %390 = vmax.xlane.f32.xlu1 %v389_v20  ;;  %387 = vmax.xlane.f32.xlu0 %v386_v21  ;;  %v404_v56 = vsel %vm367_vm1, %v1616_v48, -inf  ;;  %v446_v60 = vsel %vm367_vm1, %v1626_v53, -inf }
 0x11c   :  { %432 = vmax.xlane.f32.xlu1 %v431_v26  ;;  %429 = vmax.xlane.f32.xlu0 %v428_v27 }
 0x120   :  { %396 = vmax.xlane.f32.xlu1 %v395_v31  ;;  %393 = vmax.xlane.f32.xlu0 %v392_v34 }
 0x124   :  { %438 = vmax.xlane.f32.xlu1 %v437_v38  ;;  %435 = vmax.xlane.f32.xlu0 %v434_v39 }
 0x128   :  { %402 = vmax.xlane.f32.xlu1 %v401_v44  ;;  %399 = vmax.xlane.f32.xlu0 %v398_v46 }
 0x12c   :  { %444 = vmax.xlane.f32.xlu1 %v443_v49  ;;  %441 = vmax.xlane.f32.xlu0 %v440_v51 }
 0x130   :  { %408 = vmax.xlane.f32.xlu1 %v407_v55  ;;  %405 = vmax.xlane.f32.xlu0 %v404_v56 }
 0x134   :  { %450 = vmax.xlane.f32.xlu1 %v449_v57  ;;  %447 = vmax.xlane.f32.xlu0 %v446_v60 }
 0x18d   :  { %v415_v61 = vpop.xlane.xlu1 %414  ;;  %v373_v62 = vpop.xlane.xlu0 %372 }
 0x18e   :  { %v467_v29 = vsub.f32 %v1500_v33, %v415_v61  ;;  %v453_v63 = vsub.f32 %v1497_v32, %v373_v62 }
 0x190   :  { %v510_v0 = vmul.f32 1.442695, %v467_v29  ;;  %v482_v1 = vmul.f32 1.442695, %v453_v63 }
 0x191   :  { %v379_v4 = vpop.xlane.xlu1 %378  ;;  %v370_v5 = vpop.xlane.xlu0 %369 }
 0x192   :  { %v455_v6 = vsub.f32 %v1510_v41, %v379_v4  ;;  %v452_v7 = vsub.f32 %v1503_v36, %v370_v5  ;;  %1170 = vpow2.f32 %v482_v1 }
 0x193   :  { %1172 = vpow2.f32 %v510_v0 }
 0x194   :  { %v486_v8 = vmul.f32 1.442695, %v455_v6  ;;  %v480_v9 = vmul.f32 1.442695, %v452_v7 }
 0x195   :  { %v421_v12 = vpop.xlane.xlu1 %420  ;;  %v412_v13 = vpop.xlane.xlu0 %411 }
 0x196   :  { %v469_v14 = vsub.f32 %v1513_v42, %v421_v12  ;;  %v466_v33 = vsub.f32 %v1516_v45, %v412_v13  ;;  %1174 = vpow2.f32 %v480_v9 }
 0x197   :  { %1176 = vpow2.f32 %v486_v8 }
 0x198   :  { %v508_v32 = vmul.f32 1.442695, %v466_v33  ;;  %v514_v15 = vmul.f32 1.442695, %v469_v14 }
 0x199   :  { %v376_v16 = vpop.xlane.xlu1 %375  ;;  %v418_v17 = vpop.xlane.xlu0 %417 }
 0x19a   :  { %v454_v41 = vsub.f32 %v1528_v54, %v376_v16  ;;  %v468_v36 = vsub.f32 %v1523_v50, %v418_v17  ;;  %1178 = vpow2.f32 %v508_v32 }
 0x19b   :  { %1180 = vpow2.f32 %v514_v15 }
 0x19c   :  { %v484_v20 = vmul.f32 1.442695, %v454_v41  ;;  %v1644_v21 = vpop.eup %1170  ;;  %v512_v22 = vmul.f32 1.442695, %v468_v36 }
 0x19d   :  { %v385_v23 = vpop.xlane.xlu1 %384  ;;  %v382_v42 = vpop.xlane.xlu0 %381  ;;  %v539_v54 = vsel %vm367_vm1, %v1644_v21, 0.0 }
 0x19e   :  { %v1646_v26 = vpop.eup %1172  ;;  %1182 = vpow2.f32 %v484_v20  ;;  %v457_v45 = vsub.f32 %v1533_v58, %v385_v23  ;;  %v456_v27 = vsub.f32 %v1536_v59, %v382_v42  ;;  %540 = vadd.xlane.f32.xlu1 %v539_v54 }
 0x19f   :  { %1184 = vpow2.f32 %v512_v22  ;;  %v581_v44 = vsel %vm367_vm1, %v1646_v26, 0.0 }
 0x1a0   :  { %v490_v50 = vmul.f32 1.442695, %v457_v45  ;;  %v1652_v31 = vpop.eup %1174  ;;  %v488_v34 = vmul.f32 1.442695, %v456_v27 }
 0x1a1   :  { %v427_v38 = vpop.xlane.xlu1 %426  ;;  %v424_v39 = vpop.xlane.xlu0 %423  ;;  %v536_v49 = vsel %vm367_vm1, %v1652_v31, 0.0 }
 0x1a2   :  { %v1656_v46 = vpop.eup %1176  ;;  %1186 = vpow2.f32 %v490_v50  ;;  %v471_v58 = vsub.f32 %v1543_v2, %v427_v38  ;;  %v470_v59 = vsub.f32 %v1546_v3, %v424_v39  ;;  %582 = vadd.xlane.f32.xlu1 %v581_v44  ;;  %537 = vadd.xlane.f32.xlu0 %v536_v49 }
 0x1a3   :  { %1188 = vpow2.f32 %v488_v34  ;;  %v545_v61 = vsel %vm367_vm1, %v1656_v46, 0.0 }
 0x1a4   :  { %v518_v51 = vmul.f32 1.442695, %v471_v58  ;;  %v1662_v55 = vpop.eup %1178  ;;  %v516_v56 = vmul.f32 1.442695, %v470_v59 }
 0x1a5   :  { %v391_v57 = vpop.xlane.xlu1 %390  ;;  %v388_v60 = vpop.xlane.xlu0 %387  ;;  %v578_v62 = vsel %vm367_vm1, %v1662_v55, 0.0 }
 0x1a6   :  { %1190 = vpow2.f32 %v518_v51  ;;  %v459_v2 = vsub.f32 %v1553_v10, %v391_v57  ;;  %v458_v3 = vsub.f32 %v1556_v11, %v388_v60  ;;  %v1670_v29 = vpop.eup %1180  ;;  %546 = vadd.xlane.f32.xlu1 %v545_v61  ;;  %579 = vadd.xlane.f32.xlu0 %v578_v62 }
 0x1a7   :  { %1192 = vpow2.f32 %v516_v56  ;;  %v587_v7 = vsel %vm367_vm1, %v1670_v29, 0.0 }
 0x1a8   :  { %v1672_v63 = vpop.eup %1182  ;;  %v494_v0 = vmul.f32 1.442695, %v459_v2  ;;  %v492_v1 = vmul.f32 1.442695, %v458_v3  ;;  %v1332_v2 = vmov 0  }
 0x1a9   :  { %v433_v4 = vpop.xlane.xlu1 %432  ;;  %v430_v5 = vpop.xlane.xlu0 %429  ;;  %v542_v6 = vsel %vm367_vm1, %v1672_v63, 0.0  ;;  %1168 = vset.pattern.permute.xlu1 %v1332_v2  ;;  %1169 = vset.pattern.permute.xlu0 %v1332_v2 }
 0x1aa   :  { %1194 = vpow2.f32 %v494_v0  ;;  %v473_v10 = vsub.f32 %v1563_v18, %v433_v4  ;;  %v472_v11 = vsub.f32 %v1566_v19, %v430_v5  ;;  %v1680_v8 = vpop.eup %1184  ;;  %588 = vadd.xlane.f32.xlu1 %v587_v7  ;;  %543 = vadd.xlane.f32.xlu0 %v542_v6 }
 0x1ab   :  { %1196 = vpow2.f32 %v492_v1  ;;  %v584_v15 = vsel %vm367_vm1, %v1680_v8, 0.0 }
 0x1ac   :  { %v1682_v9 = vpop.eup %1186  ;;  %v522_v12 = vmul.f32 1.442695, %v473_v10  ;;  %v520_v13 = vmul.f32 1.442695, %v472_v11 }
 0x1ad   :  { %v397_v14 = vpop.xlane.xlu1 %396  ;;  %v394_v33 = vpop.xlane.xlu0 %393  ;;  %v551_v32 = vsel %vm367_vm1, %v1682_v9, 0.0 }
 0x1ae   :  { %1198 = vpow2.f32 %v522_v12  ;;  %v461_v18 = vsub.f32 %v1573_v24, %v397_v14  ;;  %v460_v19 = vsub.f32 %v1576_v25, %v394_v33  ;;  %v1690_v16 = vpop.eup %1188  ;;  %552 = vadd.xlane.f32.xlu1 %v551_v32  ;;  %585 = vadd.xlane.f32.xlu0 %v584_v15 }
 0x1af   :  { %1200 = vpow2.f32 %v520_v13  ;;  %v548_v42 = vsel %vm367_vm1, %v1690_v16, 0.0 }
 0x1b0   :  { %v1692_v17 = vpop.eup %1190  ;;  %v498_v41 = vmul.f32 1.442695, %v461_v18  ;;  %v496_v36 = vmul.f32 1.442695, %v460_v19 }
 0x1b1   :  { %v439_v20 = vpop.xlane.xlu1 %438  ;;  %v436_v22 = vpop.xlane.xlu0 %435  ;;  %v593_v23 = vsel %vm367_vm1, %v1692_v17, 0.0 }
 0x1b2   :  { %1202 = vpow2.f32 %v498_v41  ;;  %v475_v24 = vsub.f32 %v1583_v28, %v439_v20  ;;  %v474_v25 = vsub.f32 %v1586_v30, %v436_v22  ;;  %v1700_v45 = vpop.eup %1192  ;;  %594 = vadd.xlane.f32.xlu1 %v593_v23  ;;  %549 = vadd.xlane.f32.xlu0 %v548_v42 }
 0x1b3   :  { %1204 = vpow2.f32 %v496_v36  ;;  %v590_v44 = vsel %vm367_vm1, %v1700_v45, 0.0 }
 0x1b4   :  { %v1702_v27 = vpop.eup %1194  ;;  %v526_v54 = vmul.f32 1.442695, %v475_v24  ;;  %v524_v50 = vmul.f32 1.442695, %v474_v25 }
 0x1b5   :  { %v403_v34 = vpop.xlane.xlu1 %402  ;;  %v400_v38 = vpop.xlane.xlu0 %399  ;;  %v557_v39 = vsel %vm367_vm1, %v1702_v27, 0.0 }
 0x1b6   :  { %1206 = vpow2.f32 %v526_v54  ;;  %v463_v28 = vsub.f32 %v1593_v35, %v403_v34  ;;  %v462_v30 = vsub.f32 %v1596_v37, %v400_v38  ;;  %v1710_v58 = vpop.eup %1196  ;;  %558 = vadd.xlane.f32.xlu1 %v557_v39  ;;  %591 = vadd.xlane.f32.xlu0 %v590_v44 }
 0x1b7   :  { %1208 = vpow2.f32 %v524_v50  ;;  %v554_v61 = vsel %vm367_vm1, %v1710_v58, 0.0 }
 0x1b8   :  { %v1712_v59 = vpop.eup %1198  ;;  %v502_v49 = vmul.f32 1.442695, %v463_v28  ;;  %v500_v51 = vmul.f32 1.442695, %v462_v30 }
 0x1b9   :  { %v445_v56 = vpop.xlane.xlu1 %444  ;;  %v442_v57 = vpop.xlane.xlu0 %441  ;;  %v599_v60 = vsel %vm367_vm1, %v1712_v59, 0.0 }
 0x1ba   :  { %1210 = vpow2.f32 %v502_v49  ;;  %v477_v35 = vsub.f32 %v1603_v40, %v445_v56  ;;  %v476_v37 = vsub.f32 %v1606_v43, %v442_v57  ;;  %v1720_v3 = vpop.eup %1200  ;;  %600 = vadd.xlane.f32.xlu1 %v599_v60  ;;  %555 = vadd.xlane.f32.xlu0 %v554_v61 }
 0x1bb   :  { %1212 = vpow2.f32 %v500_v51  ;;  %v596_v10 = vsel %vm367_vm1, %v1720_v3, 0.0 }
 0x1bc   :  { %v1722_v62 = vpop.eup %1202  ;;  %v530_v0 = vmul.f32 1.442695, %v477_v35  ;;  %v528_v1 = vmul.f32 1.442695, %v476_v37  ;;  %v621_v35 = vld [vmem:[%s1961_s3 + $0x8] sm:$0xff] }
 0x1bd   :  { %v409_v4 = vpop.xlane.xlu1 %408  ;;  %v406_v5 = vpop.xlane.xlu0 %405  ;;  %v563_v40 = vsel %vm367_vm1, %v1722_v62, 0.0 }
 0x1be   :  { %1214 = vpow2.f32 %v530_v0  ;;  %v465_v43 = vsub.f32 %v1613_v47, %v409_v4  ;;  %v464_v6 = vsub.f32 %v1616_v48, %v406_v5  ;;  %v1730_v11 = vpop.eup %1204  ;;  %564 = vadd.xlane.f32.xlu1 %v563_v40  ;;  %597 = vadd.xlane.f32.xlu0 %v596_v10 }
 0x1bf   :  { %1216 = vpow2.f32 %v528_v1  ;;  %v560_v18 = vsel %vm367_vm1, %v1730_v11, 0.0 }
 0x1c0   :  { %v1732_v7 = vpop.eup %1206  ;;  %v506_v12 = vmul.f32 1.442695, %v465_v43  ;;  %v504_v13 = vmul.f32 1.442695, %v464_v6  ;;  %v620_v6 = vld [vmem:[%s1961_s3] sm:$0xff] }
 0x1c1   :  { %v451_v14 = vpop.xlane.xlu1 %450  ;;  %v448_v33 = vpop.xlane.xlu0 %447  ;;  %v605_v32 = vsel %vm367_vm1, %v1732_v7, 0.0 }
 0x1c2   :  { %1218 = vpow2.f32 %v506_v12  ;;  %v479_v47 = vsub.f32 %v1623_v52, %v451_v14  ;;  %v478_v48 = vsub.f32 %v1626_v53, %v448_v33  ;;  %v1740_v19 = vpop.eup %1208  ;;  %606 = vadd.xlane.f32.xlu1 %v605_v32  ;;  %561 = vadd.xlane.f32.xlu0 %v560_v18 }
 0x1c3   :  { %1220 = vpow2.f32 %v504_v13  ;;  %v602_v52 = vsel %vm367_vm1, %v1740_v19, 0.0 }
 0x1c4   :  { %v1742_v15 = vpop.eup %1210  ;;  %v534_v41 = vmul.f32 1.442695, %v479_v47  ;;  %v532_v36 = vmul.f32 1.442695, %v478_v48  ;;  %v623_v47 = vld [vmem:[%s1961_s3 + $0x18] sm:$0xff] }
 0x1c5   :  { %v569_v20 = vsel %vm367_vm1, %v1742_v15, 0.0  ;;  %v1748_v53 = vpop.eup %1212 }
 0x1c6   :  { %1222 = vpow2.f32 %v534_v41  ;;  %570 = vadd.xlane.f32.xlu1 %v569_v20  ;;  %603 = vadd.xlane.f32.xlu0 %v602_v52  ;;  %v566_v24 = vsel %vm367_vm1, %v1748_v53, 0.0 }
 0x1c7   :  { %1224 = vpow2.f32 %v532_v36 }
 0x1c8   :  { %v1750_v22 = vpop.eup %1214 }
 0x1c9   :  { %v611_v23 = vsel %vm367_vm1, %v1750_v22, 0.0  ;;  %v1756_v25 = vpop.eup %1216 }
 0x1ca   :  { %612 = vadd.xlane.f32.xlu1 %v611_v23  ;;  %567 = vadd.xlane.f32.xlu0 %v566_v24  ;;  %v608_v50 = vsel %vm367_vm1, %v1756_v25, 0.0  ;;  %v622_v23 = vld [vmem:[%s1961_s3 + $0x10] sm:$0xff] }
 0x1cc   :  { %v1758_v42 = vpop.eup %1218 }
 0x1cd   :  { %v575_v54 = vsel %vm367_vm1, %v1758_v42, 0.0  ;;  %v1764_v34 = vpop.eup %1220 }
 0x1ce   :  { %576 = vadd.xlane.f32.xlu1 %v575_v54  ;;  %609 = vadd.xlane.f32.xlu0 %v608_v50  ;;  %v572_v28 = vsel %vm367_vm1, %v1764_v34, 0.0 }
 0x1d0   :  { %v1766_v38 = vpop.eup %1222 }
 0x1d1   :  { %v617_v39 = vsel %vm367_vm1, %v1766_v38, 0.0  ;;  %v1772_v30 = vpop.eup %1224 }
 0x1d2   :  { %618 = vadd.xlane.f32.xlu1 %v617_v39  ;;  %573 = vadd.xlane.f32.xlu0 %v572_v28  ;;  %v614_v44 = vsel %vm367_vm1, %v1772_v30, 0.0 }
 0x1d6   :  { %615 = vadd.xlane.f32.xlu0 %v614_v44  ;;  %v625_v44 = vld [vmem:[%s1961_s3 + $0x28] sm:$0xff] }
 0x22b   :  { %v541_v49 = vpop.xlane.xlu1 %540 }
 0x22c   :  { %1226 = vrcp.f32 %v541_v49 }
 0x22f   :  { %v583_v51 = vpop.xlane.xlu1 %582  ;;  %v538_v56 = vpop.xlane.xlu0 %537 }
 0x230   :  { %1228 = vrcp.f32 %v583_v51 }
 0x231   :  { %1230 = vrcp.f32 %v538_v56 }
 0x233   :  { %v547_v57 = vpop.xlane.xlu1 %546  ;;  %v580_v60 = vpop.xlane.xlu0 %579 }
 0x234   :  { %1232 = vrcp.f32 %v580_v60 }
 0x235   :  { %1234 = vrcp.f32 %v547_v57 }
 0x236   :  { %v1227_v37 = vpop.eup %1226 }
 0x237   :  { %v589_v61 = vpop.xlane.xlu1 %588  ;;  %v544_v2 = vpop.xlane.xlu0 %543  ;;  %v637_v0 = vmul.f32 %v1227_v37, %v621_v35 }
 0x238   :  { %1236 = vrcp.f32 %v589_v61 }
 0x239   :  { %697 = vperm.xlu1 %1168, %v637_v0   ;;  %1238 = vrcp.f32 %v544_v2  ;;  %v624_v0 = vld [vmem:[%s1961_s3 + $0x20] sm:$0xff] }
 0x23a   :  { %v1229_v1 = vpop.eup %1228 }
 0x23b   :  { %v553_v4 = vpop.xlane.xlu1 %552  ;;  %v586_v5 = vpop.xlane.xlu0 %585  ;;  %v665_v40 = vmul.f32 %v1229_v1, %v621_v35 }
 0x23c   :  { %v1231_v43 = vpop.eup %1230  ;;  %1240 = vrcp.f32 %v586_v5 }
 0x23d   :  { %767 = vperm.xlu0 %1169, %v665_v40   ;;  %v635_v14 = vmul.f32 %v1231_v43, %v620_v6 }
 0x23e   :  { %v1233_v10 = vpop.eup %1232 }
 0x23f   :  { %v595_v12 = vpop.xlane.xlu1 %594  ;;  %v550_v13 = vpop.xlane.xlu0 %549  ;;  %v663_v33 = vmul.f32 %v1233_v10, %v620_v6  ;;  %v629_v10 = vld [vmem:[%s1961_s3 + $0x48] sm:$0xff] }
 0x240   :  { %1242 = vrcp.f32 %v595_v12  ;;  %v1235_v32 = vpop.eup %1234 }
 0x241   :  { %692 = vperm.xlu0 %1169, %v635_v14   ;;  %762 = vperm.xlu1 %1168, %v663_v33   ;;  %1244 = vrcp.f32 %v553_v4  ;;  %v641_v20 = vmul.f32 %v1235_v32, %v623_v47  ;;  %v627_v4 = vld [vmem:[%s1961_s3 + $0x38] sm:$0xff] }
 0x242   :  { %v1237_v48 = vpop.eup %1236  ;;  %1246 = vrcp.f32 %v550_v13 }
 0x243   :  { %v559_v18 = vpop.xlane.xlu1 %558  ;;  %v592_v41 = vpop.xlane.xlu0 %591  ;;  %v669_v36 = vmul.f32 %v1237_v48, %v623_v47 }
 0x244   :  { %v1239_v52 = vpop.eup %1238 }
 0x245   :  { %777 = vperm.xlu0 %1169, %v669_v36   ;;  %707 = vperm.xlu1 %1168, %v641_v20   ;;  %v639_v50 = vmul.f32 %v1239_v52, %v622_v23  ;;  %v631_v52 = vld [vmem:[%s1961_s3 + $0x58] sm:$0xff] }
 0x246   :  { %v1241_v39 = vpop.eup %1240 }
 0x247   :  { %v601_v24 = vpop.xlane.xlu1 %600  ;;  %v556_v54 = vpop.xlane.xlu0 %555  ;;  %v667_v57 = vmul.f32 %v1241_v39, %v622_v23 }
 0x248   :  { %1248 = vrcp.f32 %v601_v24  ;;  %v626_v24 = vld [vmem:[%s1961_s3 + $0x30] sm:$0xff] }
 0x249   :  { %702 = vperm.xlu1 %1168, %v639_v50   ;;  %1250 = vrcp.f32 %v592_v41 }
 0x24a   :  { %v1243_v28 = vpop.eup %1242 }
 0x24b   :  { %v565_v49 = vpop.xlane.xlu1 %564  ;;  %v598_v51 = vpop.xlane.xlu0 %597  ;;  %v673_v56 = vmul.f32 %v1243_v28, %v625_v44 }
 0x24c   :  { %1252 = vrcp.f32 %v565_v49  ;;  %v1245_v60 = vpop.eup %1244 }
 0x24d   :  { %787 = vperm.xlu0 %1169, %v673_v56   ;;  %772 = vperm.xlu1 %1168, %v667_v57   ;;  %1254 = vrcp.f32 %v559_v18  ;;  %v645_v61 = vmul.f32 %v1245_v60, %v625_v44  ;;  %v1247_v2 = vpop.eup %1246  ;;  %v633_v60 = vld [vmem:[%s1961_s3 + $0x68] sm:$0xff] }
 0x24e   :  { %v643_v6 = vmul.f32 %v1247_v2, %v624_v0 }
 0x24f   :  { %v607_v35 = vpop.xlane.xlu1 %606  ;;  %v562_v37 = vpop.xlane.xlu0 %561 }
 0x250   :  { %1256 = vrcp.f32 %v607_v35 }
 0x251   :  { %717 = vperm.xlu1 %1168, %v645_v61   ;;  %1258 = vrcp.f32 %v556_v54 }
 0x252   :  { %v1249_v1 = vpop.eup %1248 }
 0x253   :  { %v571_v5 = vpop.xlane.xlu1 %570  ;;  %v677_v40 = vmul.f32 %v1249_v1, %v627_v4  ;;  %v604_v43 = vpop.xlane.xlu0 %603 }
 0x254   :  { %1260 = vrcp.f32 %v571_v5  ;;  %v1251_v12 = vpop.eup %1250 }
 0x255   :  { %797 = vperm.xlu0 %1169, %v677_v40   ;;  %712 = vperm.xlu1 %1168, %v643_v6   ;;  %1262 = vrcp.f32 %v598_v51  ;;  %v671_v32 = vmul.f32 %v1251_v12, %v624_v0  ;;  %v630_v12 = vld [vmem:[%s1961_s3 + $0x50] sm:$0xff] }
 0x256   :  { %v1253_v13 = vpop.eup %1252 }
 0x257   :  { %v613_v14 = vpop.xlane.xlu1 %612  ;;  %v653_v33 = vmul.f32 %v1253_v13, %v629_v10  ;;  %v1255_v47 = vpop.eup %1254 }
 0x258   :  { %1264 = vrcp.f32 %v613_v14  ;;  %v568_v18 = vpop.xlane.xlu0 %567  ;;  %v649_v20 = vmul.f32 %v1255_v47, %v627_v4  ;;  %v632_v47 = vld [vmem:[%s1961_s3 + $0x60] sm:$0xff] }
 0x259   :  { %737 = vperm.xlu0 %1169, %v653_v33   ;;  %782 = vperm.xlu1 %1168, %v671_v32   ;;  %1266 = vrcp.f32 %v562_v37  ;;  %v628_v37 = vld [vmem:[%s1961_s3 + $0x40] sm:$0xff] }
 0x25a   :  { %v1257_v48 = vpop.eup %1256 }
 0x25b   :  { %v577_v41 = vpop.xlane.xlu1 %576  ;;  %v681_v36 = vmul.f32 %v1257_v48, %v629_v10  ;;  %v1259_v23 = vpop.eup %1258 }
 0x25c   :  { %1268 = vrcp.f32 %v577_v41  ;;  %v610_v28 = vpop.xlane.xlu0 %609  ;;  %v647_v44 = vmul.f32 %v1259_v23, %v626_v24 }
 0x25d   :  { %807 = vperm.xlu0 %1169, %v681_v36   ;;  %727 = vperm.xlu1 %1168, %v649_v20   ;;  %1270 = vrcp.f32 %v604_v43 }
 0x25e   :  { %v1261_v54 = vpop.eup %1260 }
 0x25f   :  { %v619_v50 = vpop.xlane.xlu1 %618  ;;  %v657_v39 = vmul.f32 %v1261_v54, %v631_v52  ;;  %v1263_v49 = vpop.eup %1262 }
 0x260   :  { %1272 = vrcp.f32 %v619_v50  ;;  %v675_v57 = vmul.f32 %v1263_v49, %v626_v24  ;;  %v574_v2 = vpop.xlane.xlu0 %573 }
 0x261   :  { %747 = vperm.xlu0 %1169, %v657_v39   ;;  %722 = vperm.xlu1 %1168, %v647_v44   ;;  %1274 = vrcp.f32 %v568_v18 }
 0x262   :  { %v1265_v51 = vpop.eup %1264  ;;  %1276 = vrcp.f32 %v610_v28 }
 0x263   :  { %v685_v56 = vmul.f32 %v1265_v51, %v631_v52  ;;  %v1267_v35 = vpop.eup %1266  ;;  %1278 = vrcp.f32 %v574_v2 }
 0x264   :  { %v651_v1 = vmul.f32 %v1267_v35, %v628_v37  ;;  %v616_v43 = vpop.xlane.xlu0 %615 }
 0x265   :  { %817 = vperm.xlu0 %1169, %v685_v56   ;;  %792 = vperm.xlu1 %1168, %v675_v57   ;;  %1280 = vrcp.f32 %v616_v43 }
 0x266   :  { %v1269_v61 = vpop.eup %1268 }
 0x267   :  { %v661_v0 = vmul.f32 %v1269_v61, %v633_v60  ;;  %v1271_v4 = vpop.eup %1270 }
 0x268   :  { %v679_v6 = vmul.f32 %v1271_v4, %v628_v37 }
 0x269   :  { %757 = vperm.xlu0 %1169, %v661_v0   ;;  %732 = vperm.xlu1 %1168, %v651_v1  }
 0x26a   :  { %v1273_v5 = vpop.eup %1272 }
 0x26b   :  { %v689_v40 = vmul.f32 %v1273_v5, %v633_v60  ;;  %v1275_v10 = vpop.eup %1274 }
 0x26c   :  { %v655_v13 = vmul.f32 %v1275_v10, %v630_v12  ;;  %v1277_v14 = vpop.eup %1276 }
 0x26d   :  { %827 = vperm.xlu0 %1169, %v689_v40   ;;  %802 = vperm.xlu1 %1168, %v679_v6   ;;  %v683_v33 = vmul.f32 %v1277_v14, %v630_v12  ;;  %v1279_v32 = vpop.eup %1278 }
 0x26e   :  { %v659_v48 = vmul.f32 %v1279_v32, %v632_v47 }
 0x26f   :  { %v1281_v18 = vpop.eup %1280 }
 0x270   :  { %v687_v41 = vmul.f32 %v1281_v18, %v632_v47 }
 0x271   :  { %742 = vperm.xlu1 %1168, %v655_v13  }
 0x275   :  { %812 = vperm.xlu1 %1168, %v683_v33  }
 0x279   :  { %752 = vperm.xlu1 %1168, %v659_v48  }
 0x27d   :  { %822 = vperm.xlu1 %1168, %v687_v41  }
 0x2b8   :  { %v698_v36 = vpop.permute.xlu1 %697 }
 0x2b9   :  { %v831_v20 = vmul.f32 %v1644_v21, %v698_v36 }
 0x2bb   :  { %v1063_v52 = vpack.c.bf16 %v831_v20, %v831_v20 }
 0x2bc   :  { %v768_v23 = vpop.permute.xlu0 %767 }
 0x2bd   :  { %972 = vst.msk [vmem:[%s1962_s4 + $0x4] sm:$0xf] %vm970_vm2, %v1063_v52  ;;  %v845_v24 = vmul.f32 %v1646_v26, %v768_v23 }
 0x2bf   :  { %v1077_v54 = vpack.c.bf16 %v845_v24, %v845_v24 }
 0x2c0   :  { %v693_v50 = vpop.permute.xlu0 %692  ;;  %v763_v39 = vpop.permute.xlu1 %762 }
 0x2c1   :  { %986 = vst.msk [vmem:[%s1962_s4 + $0x3c] sm:$0xf] %vm970_vm2, %v1077_v54  ;;  %v830_v21 = vmul.f32 %v1652_v31, %v693_v50  ;;  %v844_v28 = vmul.f32 %v1662_v55, %v763_v39 }
 0x2c3   :  { %v1062_v44 = vpack.c.bf16 %v830_v21, %v830_v21  ;;  %v1076_v49 = vpack.c.bf16 %v844_v28, %v844_v28 }
 0x2c4   :  { %v778_v51 = vpop.permute.xlu0 %777  ;;  %v708_v26 = vpop.permute.xlu1 %707 }
 0x2c5   :  { %971 = vst.msk [vmem:[%s1962_s4] sm:$0xf] %vm970_vm2, %v1062_v44  ;;  %v847_v56 = vmul.f32 %v1670_v29, %v778_v51  ;;  %985 = vst.msk [vmem:[%s1962_s4 + $0x38] sm:$0xf] %vm970_vm2, %v1076_v49  ;;  %v833_v31 = vmul.f32 %v1656_v46, %v708_v26 }
 0x2c7   :  { %v1079_v57 = vpack.c.bf16 %v847_v56, %v847_v56  ;;  %v1065_v55 = vpack.c.bf16 %v833_v31, %v833_v31 }
 0x2c8   :  { %v703_v60 = vpop.permute.xlu1 %702 }
 0x2c9   :  { %988 = vst.msk [vmem:[%s1962_s4 + $0x44] sm:$0xf] %vm970_vm2, %v1079_v57  ;;  %974 = vst.msk [vmem:[%s1962_s4 + $0xc] sm:$0xf] %vm970_vm2, %v1065_v55  ;;  %v832_v29 = vmul.f32 %v1672_v63, %v703_v60 }
 0x2cb   :  { %v1064_v35 = vpack.c.bf16 %v832_v29, %v832_v29 }
 0x2cc   :  { %v788_v37 = vpop.permute.xlu0 %787  ;;  %v773_v61 = vpop.permute.xlu1 %772 }
 0x2cd   :  { %v849_v46 = vmul.f32 %v1692_v17, %v788_v37  ;;  %973 = vst.msk [vmem:[%s1962_s4 + $0x8] sm:$0xf] %vm970_vm2, %v1064_v35  ;;  %v846_v2 = vmul.f32 %v1680_v8, %v773_v61 }
 0x2cf   :  { %v1081_v0 = vpack.c.bf16 %v849_v46, %v849_v46  ;;  %v1078_v1 = vpack.c.bf16 %v846_v2, %v846_v2 }
 0x2d0   :  { %v718_v63 = vpop.permute.xlu1 %717 }
 0x2d1   :  { %990 = vst.msk [vmem:[%s1962_s4 + $0x4c] sm:$0xf] %vm970_vm2, %v1081_v0  ;;  %987 = vst.msk [vmem:[%s1962_s4 + $0x40] sm:$0xf] %vm970_vm2, %v1078_v1  ;;  %v835_v17 = vmul.f32 %v1682_v9, %v718_v63 }
 0x2d3   :  { %v1067_v4 = vpack.c.bf16 %v835_v17, %v835_v17 }
 0x2d4   :  { %v798_v5 = vpop.permute.xlu0 %797  ;;  %v713_v40 = vpop.permute.xlu1 %712 }
 0x2d5   :  { %v851_v8 = vmul.f32 %v1712_v59, %v798_v5  ;;  %976 = vst.msk [vmem:[%s1962_s4 + $0x14] sm:$0xf] %vm970_vm2, %v1067_v4  ;;  %v834_v43 = vmul.f32 %v1690_v16, %v713_v40 }
 0x2d7   :  { %v1083_v6 = vpack.c.bf16 %v851_v8, %v851_v8  ;;  %v1066_v10 = vpack.c.bf16 %v834_v43, %v834_v43 }
 0x2d8   :  { %v738_v12 = vpop.permute.xlu0 %737  ;;  %v783_v9 = vpop.permute.xlu1 %782 }
 0x2d9   :  { %992 = vst.msk [vmem:[%s1962_s4 + $0x54] sm:$0xf] %vm970_vm2, %v1083_v6  ;;  %v839_v13 = vmul.f32 %v1722_v62, %v738_v12  ;;  %975 = vst.msk [vmem:[%s1962_s4 + $0x10] sm:$0xf] %vm970_vm2, %v1066_v10  ;;  %v848_v59 = vmul.f32 %v1700_v45, %v783_v9 }
 0x2db   :  { %v1071_v14 = vpack.c.bf16 %v839_v13, %v839_v13  ;;  %v1080_v16 = vpack.c.bf16 %v848_v59, %v848_v59 }
 0x2dc   :  { %v808_v33 = vpop.permute.xlu0 %807  ;;  %v728_v32 = vpop.permute.xlu1 %727 }
 0x2dd   :  { %980 = vst.msk [vmem:[%s1962_s4 + $0x24] sm:$0xf] %vm970_vm2, %v1071_v14  ;;  %v853_v47 = vmul.f32 %v1732_v7, %v808_v33  ;;  %989 = vst.msk [vmem:[%s1962_s4 + $0x48] sm:$0xf] %vm970_vm2, %v1080_v16  ;;  %v837_v62 = vmul.f32 %v1702_v27, %v728_v32 }
 0x2df   :  { %v1085_v48 = vpack.c.bf16 %v853_v47, %v853_v47  ;;  %v1069_v45 = vpack.c.bf16 %v837_v62, %v837_v62 }
 0x2e0   :  { %v748_v18 = vpop.permute.xlu0 %747  ;;  %v723_v41 = vpop.permute.xlu1 %722 }
 0x2e1   :  { %994 = vst.msk [vmem:[%s1962_s4 + $0x5c] sm:$0xf] %vm970_vm2, %v1085_v48  ;;  %v841_v36 = vmul.f32 %v1742_v15, %v748_v18  ;;  %978 = vst.msk [vmem:[%s1962_s4 + $0x1c] sm:$0xf] %vm970_vm2, %v1069_v45  ;;  %v836_v7 = vmul.f32 %v1710_v58, %v723_v41 }
 0x2e3   :  { %v1073_v20 = vpack.c.bf16 %v841_v36, %v841_v36  ;;  %v1068_v27 = vpack.c.bf16 %v836_v7, %v836_v7 }
 0x2e4   :  { %v818_v52 = vpop.permute.xlu0 %817  ;;  %v793_v23 = vpop.permute.xlu1 %792 }
 0x2e5   :  { %982 = vst.msk [vmem:[%s1962_s4 + $0x2c] sm:$0xf] %vm970_vm2, %v1073_v20  ;;  %v855_v24 = vmul.f32 %v1750_v22, %v818_v52  ;;  %977 = vst.msk [vmem:[%s1962_s4 + $0x18] sm:$0xf] %vm970_vm2, %v1068_v27  ;;  %v850_v15 = vmul.f32 %v1720_v3, %v793_v23 }
 0x2e7   :  { %v1087_v54 = vpack.c.bf16 %v855_v24, %v855_v24  ;;  %v1082_v58 = vpack.c.bf16 %v850_v15, %v850_v15 }
 0x2e8   :  { %v758_v50 = vpop.permute.xlu0 %757  ;;  %v733_v39 = vpop.permute.xlu1 %732 }
 0x2e9   :  { %996 = vst.msk [vmem:[%s1962_s4 + $0x64] sm:$0xf] %vm970_vm2, %v1087_v54  ;;  %v843_v21 = vmul.f32 %v1758_v42, %v758_v50  ;;  %991 = vst.msk [vmem:[%s1962_s4 + $0x50] sm:$0xf] %vm970_vm2, %v1082_v58  ;;  %v838_v22 = vmul.f32 %v1730_v11, %v733_v39 }
 0x2eb   :  { %v1075_v28 = vpack.c.bf16 %v843_v21, %v843_v21  ;;  %v1070_v3 = vpack.c.bf16 %v838_v22, %v838_v22 }
 0x2ec   :  { %v828_v44 = vpop.permute.xlu0 %827  ;;  %v803_v49 = vpop.permute.xlu1 %802 }
 0x2ed   :  { %984 = vst.msk [vmem:[%s1962_s4 + $0x34] sm:$0xf] %vm970_vm2, %v1075_v28  ;;  %v857_v51 = vmul.f32 %v1766_v38, %v828_v44  ;;  %979 = vst.msk [vmem:[%s1962_s4 + $0x20] sm:$0xf] %vm970_vm2, %v1070_v3  ;;  %v852_v42 = vmul.f32 %v1740_v19, %v803_v49 }
 0x2ef   :  { %v1089_v26 = vpack.c.bf16 %v857_v51, %v857_v51  ;;  %v1084_v11 = vpack.c.bf16 %v852_v42, %v852_v42 }
 0x2f0   :  { %v743_v56 = vpop.permute.xlu1 %742 }
 0x2f1   :  { %998 = vst.msk [vmem:[%s1962_s4 + $0x6c] sm:$0xf] %vm970_vm2, %v1089_v26  ;;  %993 = vst.msk [vmem:[%s1962_s4 + $0x58] sm:$0xf] %vm970_vm2, %v1084_v11  ;;  %v840_v38 = vmul.f32 %v1748_v53, %v743_v56 }
 0x2f3   :  { %v1072_v31 = vpack.c.bf16 %v840_v38, %v840_v38 }
 0x2f4   :  { %v813_v57 = vpop.permute.xlu1 %812 }
 0x2f5   :  { %981 = vst.msk [vmem:[%s1962_s4 + $0x28] sm:$0xf] %vm970_vm2, %v1072_v31  ;;  %v854_v19 = vmul.f32 %v1756_v25, %v813_v57 }
 0x2f7   :  { %v1086_v55 = vpack.c.bf16 %v854_v19, %v854_v19 }
 0x2f8   :  { %v753_v60 = vpop.permute.xlu1 %752 }
 0x2f9   :  { %995 = vst.msk [vmem:[%s1962_s4 + $0x60] sm:$0xf] %vm970_vm2, %v1086_v55  ;;  %v842_v29 = vmul.f32 %v1764_v34, %v753_v60 }
 0x2fb   :  { %v1074_v35 = vpack.c.bf16 %v842_v29, %v842_v29 }
 0x2fc   :  { %v823_v53 = vpop.permute.xlu1 %822 }
 0x2fd   :  { %983 = vst.msk [vmem:[%s1962_s4 + $0x30] sm:$0xf] %vm970_vm2, %v1074_v35  ;;  %v856_v37 = vmul.f32 %v1772_v30, %v823_v53 }
 0x2ff   :  { %v1088_v61 = vpack.c.bf16 %v856_v37, %v856_v37 }
 0x301   :  { %997 = vst.msk [vmem:[%s1962_s4 + $0x68] sm:$0xf] %vm970_vm2, %v1088_v61 }
 0x302   :  { %1003 = vsyncpa [#allocation3], 1 }
 0x303   :  { %1004 = vsyncpa [#allocation5], 1 }

// kernel: model_forward.3
= control target key start
LH: loop header
LB: loop body
LE: loop exit
PB: predicated region body
PF: predicated region fallthrough
CT: control target
= control target key end

     0   :  { %v926_v36 = vlaneseq  ;;  %v9523_v37 = vmov 1966171168   ;;  %s12624_s0 = inlined_call_operand.vmem [shape: bf16[2,7168], index: 0, kind: input, shape index: {}]   ;;  %s12625_s1 = inlined_call_operand.vmem [shape: bf16[7168,200], index: 1, kind: input, shape index: {}]   ;;  %s12626_s2 = inlined_call_operand.vmem [shape: f32[1,200], index: 2, kind: input, shape index: {}]   ;;  %s12627_s3 = inlined_call_operand.vmem [shape: f32[200,5], index: 3, kind: input, shape index: {}]   ;;  %s12628_s4 = inlined_call_operand.vmem [shape: f32[1,5], index: 4, kind: input, shape index: {}]   ;;  %s12629_s5 = inlined_call_operand.hbm [shape: f32[2,5], index: 5, kind: output, shape index: {}]  }
   0x1   :  { %v8142_v0 = vld [vmem:[%s12625_s1 + $0x4] ss:$8 sps:$4 sm:$0xff]   ;;  %v8146_v2 = vld [vmem:[%s12625_s1] ss:$8 sps:$4 sm:$0xff]   ;;  %v8148_v4 = vld [vmem:[%s12625_s1 + $0x14] ss:$8 sps:$4 sm:$0xff]   ;;  %v945_v38 = vunpack.c.l.s4 %v9523_v37 }
   0x2   :  { %v8144_v1 = vld [vmem:[%s12625_s1 + $0xe04] ss:$8 sps:$4 sm:$0xff]   ;;  %5822 = vmatprep.subr.bf16.mxu1 %v8142_v0  ;;  %v8147_v3 = vld [vmem:[%s12625_s1 + $0xe00] ss:$8 sps:$4 sm:$0xff]   ;;  %v8150_v5 = vld [vmem:[%s12625_s1 + $0xe14] ss:$8 sps:$4 sm:$0xff]  }
   0x3   :  { %6396 = vmatprep.subr.bf16.mxu0 %v8144_v1  ;;  %5823 = vmatpush1.bf16.msra.mxu1 %v8146_v2  ;;  %v8152_v6 = vld [vmem:[%s12625_s1 + $0x10] ss:$8 sps:$4 sm:$0xff]   ;;  %v8154_v8 = vld [vmem:[%s12625_s1 + $0x24] ss:$8 sps:$4 sm:$0xff]   ;;  %v8158_v10 = vld [vmem:[%s12625_s1 + $0x20] ss:$8 sps:$4 sm:$0xff]   ;;  %v946_v43 = vunpack.c.0.s8 %v945_v38 }
   0x4   :  { %6397 = vmatpush1.bf16.msra.mxu0 %v8147_v3  ;;  %5824 = vmatprep.subr.bf16.mxu1 %v8148_v4  ;;  %v8153_v7 = vld [vmem:[%s12625_s1 + $0xe10] ss:$8 sps:$4 sm:$0xff]   ;;  %v8156_v9 = vld [vmem:[%s12625_s1 + $0xe24] ss:$8 sps:$4 sm:$0xff]   ;;  %v8159_v11 = vld [vmem:[%s12625_s1 + $0xe20] ss:$8 sps:$4 sm:$0xff]  }
   0x5   :  { %6398 = vmatprep.subr.bf16.mxu0 %v8150_v5  ;;  %v8160_v12 = vld [vmem:[%s12625_s1 + $0x34] ss:$8 sps:$4 sm:$0xff]   ;;  %v8164_v14 = vld [vmem:[%s12625_s1 + $0x30] ss:$8 sps:$4 sm:$0xff]   ;;  %v8166_v16 = vld [vmem:[%s12625_s1 + $0x44] ss:$8 sps:$4 sm:$0xff]  }
   0x6   :  { %v8162_v13 = vld [vmem:[%s12625_s1 + $0xe34] ss:$8 sps:$4 sm:$0xff]   ;;  %v8165_v15 = vld [vmem:[%s12625_s1 + $0xe30] ss:$8 sps:$4 sm:$0xff]   ;;  %v8168_v17 = vld [vmem:[%s12625_s1 + $0xe44] ss:$8 sps:$4 sm:$0xff]  }
   0x7   :  { %5825 = vmatpush1.bf16.msra.mxu1 %v8152_v6  ;;  %v8170_v18 = vld [vmem:[%s12625_s1 + $0x40] ss:$8 sps:$4 sm:$0xff]   ;;  %v8172_v20 = vld [vmem:[%s12625_s1 + $0x54] ss:$8 sps:$4 sm:$0xff]   ;;  %v8176_v22 = vld [vmem:[%s12625_s1 + $0x50] ss:$8 sps:$4 sm:$0xff]  }
   0x8   :  { %6399 = vmatpush1.bf16.msra.mxu0 %v8153_v7  ;;  %5826 = vmatprep.subr.bf16.mxu1 %v8154_v8  ;;  %v8171_v19 = vld [vmem:[%s12625_s1 + $0xe40] ss:$8 sps:$4 sm:$0xff]   ;;  %v8174_v21 = vld [vmem:[%s12625_s1 + $0xe54] ss:$8 sps:$4 sm:$0xff]   ;;  %v8177_v23 = vld [vmem:[%s12625_s1 + $0xe50] ss:$8 sps:$4 sm:$0xff]  }
   0x9   :  { %6400 = vmatprep.subr.bf16.mxu0 %v8156_v9  ;;  %v8178_v24 = vld [vmem:[%s12625_s1 + $0x64] ss:$8 sps:$4 sm:$0xff]   ;;  %v8182_v26 = vld [vmem:[%s12625_s1 + $0x60] ss:$8 sps:$4 sm:$0xff]   ;;  %v8184_v28 = vld [vmem:[%s12625_s1 + $0x74] ss:$8 sps:$4 sm:$0xff]  }
   0xa   :  { %v8180_v25 = vld [vmem:[%s12625_s1 + $0xe64] ss:$8 sps:$4 sm:$0xff]   ;;  %v8183_v27 = vld [vmem:[%s12625_s1 + $0xe60] ss:$8 sps:$4 sm:$0xff]   ;;  %v8186_v29 = vld [vmem:[%s12625_s1 + $0xe74] ss:$8 sps:$4 sm:$0xff]  }
   0xb   :  { %5827 = vmatpush1.bf16.msra.mxu1 %v8158_v10  ;;  %v8188_v30 = vld [vmem:[%s12625_s1 + $0x70] ss:$8 sps:$4 sm:$0xff]   ;;  %v8190_v32 = vld [vmem:[%s12625_s1 + $0x84] ss:$8 sps:$4 sm:$0xff]   ;;  %v8194_v34 = vld [vmem:[%s12625_s1 + $0x80] ss:$8 sps:$4 sm:$0xff]  }
   0xc   :  { %6401 = vmatpush1.bf16.msra.mxu0 %v8159_v11  ;;  %5828 = vmatprep.subr.bf16.mxu1 %v8160_v12  ;;  %v8189_v31 = vld [vmem:[%s12625_s1 + $0xe70] ss:$8 sps:$4 sm:$0xff]   ;;  %v8192_v33 = vld [vmem:[%s12625_s1 + $0xe84] ss:$8 sps:$4 sm:$0xff]   ;;  %v8195_v35 = vld [vmem:[%s12625_s1 + $0xe80] ss:$8 sps:$4 sm:$0xff]  }
   0xd   :  { %6402 = vmatprep.subr.bf16.mxu0 %v8162_v13  ;;  %v8196_v39 = vld [vmem:[%s12625_s1 + $0x94] ss:$8 sps:$4 sm:$0xff]   ;;  %v8200_v41 = vld [vmem:[%s12625_s1 + $0x90] ss:$8 sps:$4 sm:$0xff]   ;;  %v9674_v42 = vshrl.u32 %v926_v36, 7  ;;  %v9703_v52 = vld [vmem:[%s12624_s0] sm:$0xff] }
   0xe   :  { %v8198_v40 = vld [vmem:[%s12625_s1 + $0xe94] ss:$8 sps:$4 sm:$0xff]   ;;  %v8201_v44 = vld [vmem:[%s12625_s1 + $0xe90] ss:$8 sps:$4 sm:$0xff]   ;;  %v8202_v45 = vld [vmem:[%s12625_s1 + $0xa4] ss:$8 sps:$4 sm:$0xff]  }
   0xf   :  { %5829 = vmatpush1.bf16.msra.mxu1 %v8164_v14  ;;  %v8204_v46 = vld [vmem:[%s12625_s1 + $0xea4] ss:$8 sps:$4 sm:$0xff]   ;;  %v8206_v47 = vld [vmem:[%s12625_s1 + $0xa0] ss:$8 sps:$4 sm:$0xff]   ;;  %v9692_v49 = vsub.s32 %v946_v43, %v9674_v42  ;;  %v8208_v50 = vld [vmem:[%s12625_s1 + $0xb4] ss:$8 sps:$4 sm:$0xff]  }
  0x10   :  { %6403 = vmatpush1.bf16.msra.mxu0 %v8165_v15  ;;  %5830 = vmatprep.subr.bf16.mxu1 %v8166_v16  ;;  %v8207_v48 = vld [vmem:[%s12625_s1 + $0xea0] ss:$8 sps:$4 sm:$0xff]   ;;  %v8210_v51 = vld [vmem:[%s12625_s1 + $0xeb4] ss:$8 sps:$4 sm:$0xff]   ;;  %v8212_v53 = vld [vmem:[%s12625_s1 + $0xb0] ss:$8 sps:$4 sm:$0xff]  }
  0x11   :  { %6404 = vmatprep.subr.bf16.mxu0 %v8168_v17  ;;  %v950_v54 = vrot.slane %v9703_v52, %v9692_v49  ;;  %v8213_v55 = vld [vmem:[%s12625_s1 + $0xeb0] ss:$8 sps:$4 sm:$0xff]   ;;  %v8214_v57 = vld [vmem:[%s12625_s1 + $0xc4] ss:$8 sps:$4 sm:$0xff]   ;;  %v8218_v63 = vld [vmem:[%s12625_s1 + $0xc0] ss:$8 sps:$4 sm:$0xff]  }
  0x12   :  { %v24_v56 = vld [vmem:[%s12624_s0 + $0x18] sm:$0xff]  ;;  %v8216_v58 = vld [vmem:[%s12625_s1 + $0xec4] ss:$8 sps:$4 sm:$0xff]   ;;  %v8219_v0 = vld [vmem:[%s12625_s1 + $0xec0] ss:$8 sps:$4 sm:$0xff]  }
  0x13   :  { %5831 = vmatpush1.bf16.msra.mxu1 %v8170_v18  ;;  %v958_v59 = vcombine.high %v950_v54, %v950_v54  ;;  %v1090_v60 = vcombine.high %v24_v56, %v24_v56  ;;  %v8220_v1 = vld [vmem:[%s12625_s1 + $0xd4] ss:$8 sps:$4 sm:$0xff]   ;;  %v8224_v5 = vld [vmem:[%s12625_s1 + $0xd0] ss:$8 sps:$4 sm:$0xff]   ;;  %v8226_v7 = vld [vmem:[%s12625_s1 + $0xe4] ss:$8 sps:$4 sm:$0xff]   ;;  %v9774_v17 = vrot.slane %v950_v54, %v9692_v49 }
  0x14   :  { %6405 = vmatpush1.bf16.msra.mxu0 %v8171_v19  ;;  %5832 = vmatprep.subr.bf16.mxu1 %v8172_v20  ;;  %v8222_v2 = vld [vmem:[%s12625_s1 + $0xed4] ss:$8 sps:$4 sm:$0xff]   ;;  %v8225_v6 = vld [vmem:[%s12625_s1 + $0xed0] ss:$8 sps:$4 sm:$0xff]   ;;  %v8228_v8 = vld [vmem:[%s12625_s1 + $0xee4] ss:$8 sps:$4 sm:$0xff]  }
  0x15   :  { %6406 = vmatprep.subr.bf16.mxu0 %v8174_v21  ;;  %v980_v61 = vrot.slane %v958_v59, %v9692_v49  ;;  %v1104_v62 = vrot.slane %v1090_v60, %v9692_v49  ;;  %v8230_v9 = vld [vmem:[%s12625_s1 + $0xe0] ss:$8 sps:$4 sm:$0xff]   ;;  %v8232_v11 = vld [vmem:[%s12625_s1 + $0xf4] ss:$8 sps:$4 sm:$0xff]   ;;  %v8236_v13 = vld [vmem:[%s12625_s1 + $0xf0] ss:$8 sps:$4 sm:$0xff]  }
  0x16   :  { %v8231_v10 = vld [vmem:[%s12625_s1 + $0xee0] ss:$8 sps:$4 sm:$0xff]   ;;  %v8234_v12 = vld [vmem:[%s12625_s1 + $0xef4] ss:$8 sps:$4 sm:$0xff]   ;;  %v8237_v14 = vld [vmem:[%s12625_s1 + $0xef0] ss:$8 sps:$4 sm:$0xff]  }
  0x17   :  { %5833 = vmatpush1.bf16.msra.mxu1 %v8176_v22  ;;  %v1106_v3 = vcombine.high %v1104_v62, %v1104_v62  ;;  %5854 = vmatprep.mubr.bf16.mxu1 %v980_v61  ;;  %v8241_v15 = vld [vmem:[%s12625_s1 + $0x104] ss:$8 sps:$4 sm:$0xff]   ;;  %v9777_v18 = vrot.slane %v1104_v62, %v9692_v49  ;;  %v8239_v19 = vld [vmem:[%s12625_s1 + $0x100] ss:$8 sps:$4 sm:$0xff]   ;;  %v8248_v21 = vld [vmem:[%s12625_s1 + $0x114] ss:$8 sps:$4 sm:$0xff]  }
  0x18   :  { %6407 = vmatpush1.bf16.msra.mxu0 %v8177_v23  ;;  %5834 = vmatprep.subr.bf16.mxu1 %v8178_v24  ;;  %v8245_v16 = vld [vmem:[%s12625_s1 + $0xf04] ss:$8 sps:$4 sm:$0xff]   ;;  %v8243_v20 = vld [vmem:[%s12625_s1 + $0xf00] ss:$8 sps:$4 sm:$0xff]   ;;  %v8251_v22 = vld [vmem:[%s12625_s1 + $0xf14] ss:$8 sps:$4 sm:$0xff]   ;;  %v990_v23 = vcombine.high %v980_v61, %v980_v61 }
  0x19   :  { %6408 = vmatprep.subr.bf16.mxu0 %v8180_v25  ;;  %v1134_v4 = vrot.slane %v1106_v3, %v9692_v49  ;;  %v8246_v25 = vld [vmem:[%s12625_s1 + $0x110] ss:$8 sps:$4 sm:$0xff]   ;;  %v8269_v36 = vld [vmem:[%s12625_s1 + $0xf44] ss:$8 sps:$4 sm:$0xff]   ;;  %v8264_v37 = vld [vmem:[%s12625_s1 + $0x140] ss:$8 sps:$4 sm:$0xff]  }
  0x1a   :  { %v8267_v38 = vld [vmem:[%s12625_s1 + $0xf40] ss:$8 sps:$4 sm:$0xff]   ;;  %v8273_v43 = vld [vmem:[%s12625_s1 + $0xf50] ss:$8 sps:$4 sm:$0xff]   ;;  %v8290_v54 = vld [vmem:[%s12625_s1 + $0x184] ss:$8 sps:$4 sm:$0xff]  }
  0x1b   :  { %5835 = vmatpush1.bf16.msra.mxu1 %v8182_v26  ;;  %6428 = vmatprep.mubr.bf16.mxu0 %v1134_v4  ;;  %v1138_v24 = vcombine.high %v1134_v4, %v1134_v4  ;;  %v8249_v26 = vld [vmem:[%s12625_s1 + $0xf10] ss:$8 sps:$4 sm:$0xff]   ;;  %v8288_v56 = vld [vmem:[%s12625_s1 + $0x180] ss:$8 sps:$4 sm:$0xff]   ;;  %v8299_v59 = vld [vmem:[%s12625_s1 + $0xf94] ss:$8 sps:$4 sm:$0xff]  }
  0x1c   :  { %6409 = vmatpush1.bf16.msra.mxu0 %v8183_v27  ;;  %5836 = vmatprep.subr.bf16.mxu1 %v8184_v28  ;;  %v8254_v27 = vld [vmem:[%s12625_s1 + $0x124] ss:$8 sps:$4 sm:$0xff]   ;;  %v8294_v60 = vld [vmem:[%s12625_s1 + $0x190] ss:$8 sps:$4 sm:$0xff]   ;;  %v8311_v3 = vld [vmem:[%s12625_s1 + $0xfb4] ss:$8 sps:$4 sm:$0xff]  }
  0x1d   :  { %6410 = vmatprep.subr.bf16.mxu0 %v8186_v29  ;;  %v8257_v28 = vld [vmem:[%s12625_s1 + $0xf24] ss:$8 sps:$4 sm:$0xff]   ;;  %v8252_v29 = vld [vmem:[%s12625_s1 + $0x120] ss:$8 sps:$4 sm:$0xff]   ;;  %v8297_v61 = vld [vmem:[%s12625_s1 + $0xf90] ss:$8 sps:$4 sm:$0xff]  }
  0x1e   :  { %v8302_v62 = vld [vmem:[%s12625_s1 + $0x1a4] ss:$8 sps:$4 sm:$0xff]   ;;  %v8306_v4 = vld [vmem:[%s12625_s1 + $0x1b0] ss:$8 sps:$4 sm:$0xff]  }
  0x1f   :  { %5837 = vmatpush1.bf16.msra.mxu1 %v8188_v30  ;;  %v8255_v30 = vld [vmem:[%s12625_s1 + $0xf20] ss:$8 sps:$4 sm:$0xff]  }
  0x20   :  { %6411 = vmatpush1.bf16.msra.mxu0 %v8189_v31  ;;  %5838 = vmatprep.subr.bf16.mxu1 %v8190_v32  ;;  %v8260_v31 = vld [vmem:[%s12625_s1 + $0x134] ss:$8 sps:$4 sm:$0xff]  }
  0x21   :  { %6412 = vmatprep.subr.bf16.mxu0 %v8192_v33  ;;  %v8263_v32 = vld [vmem:[%s12625_s1 + $0xf34] ss:$8 sps:$4 sm:$0xff]   ;;  %v8258_v33 = vld [vmem:[%s12625_s1 + $0x130] ss:$8 sps:$4 sm:$0xff]  }
  0x23   :  { %5839 = vmatpush1.bf16.msra.mxu1 %v8194_v34  ;;  %v8261_v34 = vld [vmem:[%s12625_s1 + $0xf30] ss:$8 sps:$4 sm:$0xff]  }
  0x24   :  { %6413 = vmatpush1.bf16.msra.mxu0 %v8195_v35  ;;  %5840 = vmatprep.subr.bf16.mxu1 %v8196_v39  ;;  %v8266_v35 = vld [vmem:[%s12625_s1 + $0x144] ss:$8 sps:$4 sm:$0xff]   ;;  %v8272_v39 = vld [vmem:[%s12625_s1 + $0x154] ss:$8 sps:$4 sm:$0xff]  }
  0x25   :  { %6414 = vmatprep.subr.bf16.mxu0 %v8198_v40  ;;  %v8275_v40 = vld [vmem:[%s12625_s1 + $0xf54] ss:$8 sps:$4 sm:$0xff]  }
  0x27   :  { %5841 = vmatpush1.bf16.msra.mxu1 %v8200_v41  ;;  %v8270_v41 = vld [vmem:[%s12625_s1 + $0x150] ss:$8 sps:$4 sm:$0xff]  }
  0x28   :  { %6415 = vmatpush1.bf16.msra.mxu0 %v8201_v44  ;;  %5842 = vmatprep.subr.bf16.mxu1 %v8202_v45  ;;  %v8278_v44 = vld [vmem:[%s12625_s1 + $0x164] ss:$8 sps:$4 sm:$0xff]  }
  0x29   :  { %6416 = vmatprep.subr.bf16.mxu0 %v8204_v46  ;;  %v8281_v45 = vld [vmem:[%s12625_s1 + $0xf64] ss:$8 sps:$4 sm:$0xff]   ;;  %v8276_v46 = vld [vmem:[%s12625_s1 + $0x160] ss:$8 sps:$4 sm:$0xff]  }
  0x2b   :  { %5843 = vmatpush1.bf16.msra.mxu1 %v8206_v47  ;;  %v8279_v47 = vld [vmem:[%s12625_s1 + $0xf60] ss:$8 sps:$4 sm:$0xff]  }
  0x2c   :  { %6417 = vmatpush1.bf16.msra.mxu0 %v8207_v48  ;;  %5844 = vmatprep.subr.bf16.mxu1 %v8208_v50  ;;  %v8284_v48 = vld [vmem:[%s12625_s1 + $0x174] ss:$8 sps:$4 sm:$0xff]  }
  0x2d   :  { %6418 = vmatprep.subr.bf16.mxu0 %v8210_v51  ;;  %v8287_v50 = vld [vmem:[%s12625_s1 + $0xf74] ss:$8 sps:$4 sm:$0xff]   ;;  %v8282_v51 = vld [vmem:[%s12625_s1 + $0x170] ss:$8 sps:$4 sm:$0xff]  }
  0x2f   :  { %5845 = vmatpush1.bf16.msra.mxu1 %v8212_v53  ;;  %v8285_v53 = vld [vmem:[%s12625_s1 + $0xf70] ss:$8 sps:$4 sm:$0xff]  }
  0x30   :  { %6419 = vmatpush1.bf16.msra.mxu0 %v8213_v55  ;;  %5846 = vmatprep.subr.bf16.mxu1 %v8214_v57  ;;  %v8293_v55 = vld [vmem:[%s12625_s1 + $0xf84] ss:$8 sps:$4 sm:$0xff]   ;;  %v8291_v57 = vld [vmem:[%s12625_s1 + $0xf80] ss:$8 sps:$4 sm:$0xff]  }
  0x31   :  { %6420 = vmatprep.subr.bf16.mxu0 %v8216_v58  ;;  %v8296_v58 = vld [vmem:[%s12625_s1 + $0x194] ss:$8 sps:$4 sm:$0xff]  }
  0x33   :  { %5847 = vmatpush1.bf16.msra.mxu1 %v8218_v63  ;;  %v8305_v63 = vld [vmem:[%s12625_s1 + $0xfa4] ss:$8 sps:$4 sm:$0xff]  }
  0x34   :  { %6421 = vmatpush1.bf16.msra.mxu0 %v8219_v0  ;;  %5848 = vmatprep.subr.bf16.mxu1 %v8220_v1  ;;  %v8300_v0 = vld [vmem:[%s12625_s1 + $0x1a0] ss:$8 sps:$4 sm:$0xff]  }
  0x35   :  { %6422 = vmatprep.subr.bf16.mxu0 %v8222_v2  ;;  %v8303_v1 = vld [vmem:[%s12625_s1 + $0xfa0] ss:$8 sps:$4 sm:$0xff]   ;;  %v8308_v2 = vld [vmem:[%s12625_s1 + $0x1b4] ss:$8 sps:$4 sm:$0xff]  }
  0x37   :  { %5849 = vmatpush1.bf16.msra.mxu1 %v8224_v5  ;;  %v8309_v5 = vld [vmem:[%s12625_s1 + $0xfb0] ss:$8 sps:$4 sm:$0xff]  }
  0x38   :  { %6423 = vmatpush1.bf16.msra.mxu0 %v8225_v6  ;;  %5850 = vmatprep.subr.bf16.mxu1 %v8226_v7  ;;  %v8314_v6 = vld [vmem:[%s12625_s1 + $0x1c4] ss:$8 sps:$4 sm:$0xff]  }
  0x39   :  { %6424 = vmatprep.subr.bf16.mxu0 %v8228_v8  ;;  %v8317_v7 = vld [vmem:[%s12625_s1 + $0xfc4] ss:$8 sps:$4 sm:$0xff]   ;;  %v8312_v8 = vld [vmem:[%s12625_s1 + $0x1c0] ss:$8 sps:$4 sm:$0xff]  }
  0x3b   :  { %5851 = vmatpush1.bf16.msra.mxu1 %v8230_v9  ;;  %v8315_v9 = vld [vmem:[%s12625_s1 + $0xfc0] ss:$8 sps:$4 sm:$0xff]  }
  0x3c   :  { %6425 = vmatpush1.bf16.msra.mxu0 %v8231_v10  ;;  %5852 = vmatprep.subr.bf16.mxu1 %v8232_v11  ;;  %v8320_v10 = vld [vmem:[%s12625_s1 + $0x1d4] ss:$8 sps:$4 sm:$0xff]  }
  0x3d   :  { %6426 = vmatprep.subr.bf16.mxu0 %v8234_v12  ;;  %v8323_v11 = vld [vmem:[%s12625_s1 + $0xfd4] ss:$8 sps:$4 sm:$0xff]   ;;  %v8318_v12 = vld [vmem:[%s12625_s1 + $0x1d0] ss:$8 sps:$4 sm:$0xff]  }
  0x3f   :  { %5853 = vmatpush1.bf16.msra.mxu1 %v8236_v13  ;;  %v8321_v13 = vld [vmem:[%s12625_s1 + $0xfd0] ss:$8 sps:$4 sm:$0xff]  }
  0x40   :  { %6427 = vmatpush1.bf16.msra.mxu0 %v8237_v14  ;;  %5863 = vmatprep.subr.bf16.mxu1 %v8241_v15  ;;  %v8326_v14 = vld [vmem:[%s12625_s1 + $0x1e4] ss:$8 sps:$4 sm:$0xff]  }
  0x41   :  { %6437 = vmatprep.subr.bf16.mxu0 %v8245_v16  ;;  %v8329_v15 = vld [vmem:[%s12625_s1 + $0xfe4] ss:$8 sps:$4 sm:$0xff]   ;;  %v943_v16 = vcombine.high %v9703_v52, %v9703_v52  ;;  %v8335_v52 = vld [vmem:[%s12625_s1 + $0xff4] ss:$8 sps:$4 sm:$0xff]  }
  0x42   :  { %5855 = vmatmul.mubr.bf16.vlgmr.msra.gmra.mrb[0].mxu1 %v9774_v17 }
  0x43   :  { %6429 = vmatmul.mubr.bf16.vlgmr.msra.gmra.mrb[0].mxu0 %v9777_v18  ;;  %5864 = vmatpush1.bf16.msra.mxu1 %v8239_v19  ;;  %v8324_v19 = vld [vmem:[%s12625_s1 + $0x1e0] ss:$8 sps:$4 sm:$0xff]  }
  0x44   :  { %6438 = vmatpush1.bf16.msra.mxu0 %v8243_v20  ;;  %5865 = vmatprep.subr.bf16.mxu1 %v8248_v21  ;;  %v8327_v20 = vld [vmem:[%s12625_s1 + $0xfe0] ss:$8 sps:$4 sm:$0xff]   ;;  %v8332_v21 = vld [vmem:[%s12625_s1 + $0x1f4] ss:$8 sps:$4 sm:$0xff]  }
  0x45   :  { %6439 = vmatprep.subr.bf16.mxu0 %v8251_v22  ;;  %5895 = vmatprep.mubr.bf16.mxu1 %v990_v23  ;;  %v9964_v22 = vrot.slane %v943_v16, %v9692_v49  ;;  %v8330_v23 = vld [vmem:[%s12625_s1 + $0x1f0] ss:$8 sps:$4 sm:$0xff]  }
  0x46   :  { %6469 = vmatprep.mubr.bf16.mxu0 %v1138_v24  ;;  %v8333_v24 = vld [vmem:[%s12625_s1 + $0xff0] ss:$8 sps:$4 sm:$0xff]  }
  0x47   :  { %5866 = vmatpush1.bf16.msra.mxu1 %v8246_v25  ;;  %v8338_v25 = vld [vmem:[%s12625_s1 + $0x204] ss:$8 sps:$4 sm:$0xff]   ;;  %v8402_v16 = vld [vmem:[%s12625_s1 + $0x2b0] ss:$8 sps:$4 sm:$0xff]  }
  0x48   :  { %6440 = vmatpush1.bf16.msra.mxu0 %v8249_v26  ;;  %5867 = vmatprep.subr.bf16.mxu1 %v8254_v27  ;;  %v8341_v26 = vld [vmem:[%s12625_s1 + $0x1004] ss:$8 sps:$4 sm:$0xff]   ;;  %v959_v27 = vcombine.high %v9964_v22, %v9964_v22 }
  0x49   :  { %6441 = vmatprep.subr.bf16.mxu0 %v8257_v28  ;;  %v988_v28 = vcombine.high %v9774_v17, %v9774_v17  ;;  %v8347_v17 = vld [vmem:[%s12625_s1 + $0x1014] ss:$8 sps:$4 sm:$0xff]  }
  0x4b   :  { %5868 = vmatpush1.bf16.msra.mxu1 %v8252_v29  ;;  %v1136_v29 = vcombine.high %v9777_v18, %v9777_v18  ;;  %v9997_v18 = vrot.slane %v959_v27, %v9692_v49  ;;  %v8417_v27 = vld [vmem:[%s12625_s1 + $0x10d0] ss:$8 sps:$4 sm:$0xff]  }
  0x4c   :  { %6442 = vmatpush1.bf16.msra.mxu0 %v8255_v30  ;;  %5869 = vmatprep.subr.bf16.mxu1 %v8260_v31  ;;  %v8336_v30 = vld [vmem:[%s12625_s1 + $0x200] ss:$8 sps:$4 sm:$0xff]  }
  0x4d   :  { %6443 = vmatprep.subr.bf16.mxu0 %v8263_v32  ;;  %v8339_v31 = vld [vmem:[%s12625_s1 + $0x1000] ss:$8 sps:$4 sm:$0xff]   ;;  %v8344_v32 = vld [vmem:[%s12625_s1 + $0x214] ss:$8 sps:$4 sm:$0xff]  }
  0x4f   :  { %5870 = vmatpush1.bf16.msra.mxu1 %v8258_v33  ;;  %v10002_v33 = vld [vmem:[%s12624_s0 + $0x20] sm:$0xff] }
  0x50   :  { %6444 = vmatpush1.bf16.msra.mxu0 %v8261_v34  ;;  %5871 = vmatprep.subr.bf16.mxu1 %v8266_v35  ;;  %v8342_v34 = vld [vmem:[%s12625_s1 + $0x210] ss:$8 sps:$4 sm:$0xff]   ;;  %v10009_v35 = vrot.slane %v10002_v33, %v9692_v49 }
  0x51   :  { %6445 = vmatprep.subr.bf16.mxu0 %v8269_v36  ;;  %v8345_v36 = vld [vmem:[%s12625_s1 + $0x1010] ss:$8 sps:$4 sm:$0xff]  }
  0x53   :  { %5872 = vmatpush1.bf16.msra.mxu1 %v8264_v37  ;;  %v8350_v37 = vld [vmem:[%s12625_s1 + $0x224] ss:$8 sps:$4 sm:$0xff]  }
  0x54   :  { %6446 = vmatpush1.bf16.msra.mxu0 %v8267_v38  ;;  %5873 = vmatprep.subr.bf16.mxu1 %v8272_v39  ;;  %v8353_v38 = vld [vmem:[%s12625_s1 + $0x1024] ss:$8 sps:$4 sm:$0xff]   ;;  %v1154_v39 = vcombine.high %v10009_v35, %v10009_v35 }
  0x55   :  { %6447 = vmatprep.subr.bf16.mxu0 %v8275_v40  ;;  %v8348_v40 = vld [vmem:[%s12625_s1 + $0x220] ss:$8 sps:$4 sm:$0xff]  }
  0x57   :  { %5874 = vmatpush1.bf16.msra.mxu1 %v8270_v41  ;;  %v10027_v41 = vrot.slane %v1154_v39, %v9692_v49  ;;  %v8432_v39 = vld [vmem:[%s12625_s1 + $0x300] ss:$8 sps:$4 sm:$0xff]  }
  0x58   :  { %6448 = vmatpush1.bf16.msra.mxu0 %v8273_v43  ;;  %5875 = vmatprep.subr.bf16.mxu1 %v8278_v44  ;;  %v8351_v43 = vld [vmem:[%s12625_s1 + $0x1020] ss:$8 sps:$4 sm:$0xff]   ;;  %v8356_v44 = vld [vmem:[%s12625_s1 + $0x234] ss:$8 sps:$4 sm:$0xff]  }
  0x59   :  { %6449 = vmatprep.subr.bf16.mxu0 %v8281_v45  ;;  %v8359_v45 = vld [vmem:[%s12625_s1 + $0x1034] ss:$8 sps:$4 sm:$0xff]  }
  0x5b   :  { %5876 = vmatpush1.bf16.msra.mxu1 %v8276_v46  ;;  %v8354_v46 = vld [vmem:[%s12625_s1 + $0x230] ss:$8 sps:$4 sm:$0xff]  }
  0x5c   :  { %6450 = vmatpush1.bf16.msra.mxu0 %v8279_v47  ;;  %5877 = vmatprep.subr.bf16.mxu1 %v8284_v48  ;;  %v8357_v47 = vld [vmem:[%s12625_s1 + $0x1030] ss:$8 sps:$4 sm:$0xff]   ;;  %v8362_v48 = vld [vmem:[%s12625_s1 + $0x244] ss:$8 sps:$4 sm:$0xff]  }
  0x5d   :  { %6451 = vmatprep.subr.bf16.mxu0 %v8287_v50  ;;  %v8365_v50 = vld [vmem:[%s12625_s1 + $0x1044] ss:$8 sps:$4 sm:$0xff]  }
  0x5f   :  { %5878 = vmatpush1.bf16.msra.mxu1 %v8282_v51  ;;  %v8360_v51 = vld [vmem:[%s12625_s1 + $0x240] ss:$8 sps:$4 sm:$0xff]  }
  0x60   :  { %6452 = vmatpush1.bf16.msra.mxu0 %v8285_v53  ;;  %5879 = vmatprep.subr.bf16.mxu1 %v8290_v54  ;;  %v8363_v53 = vld [vmem:[%s12625_s1 + $0x1040] ss:$8 sps:$4 sm:$0xff]   ;;  %v8368_v54 = vld [vmem:[%s12625_s1 + $0x254] ss:$8 sps:$4 sm:$0xff]  }
  0x61   :  { %6453 = vmatprep.subr.bf16.mxu0 %v8293_v55  ;;  %v8371_v55 = vld [vmem:[%s12625_s1 + $0x1054] ss:$8 sps:$4 sm:$0xff]  }
  0x63   :  { %5880 = vmatpush1.bf16.msra.mxu1 %v8288_v56  ;;  %v8366_v56 = vld [vmem:[%s12625_s1 + $0x250] ss:$8 sps:$4 sm:$0xff]  }
  0x64   :  { %6454 = vmatpush1.bf16.msra.mxu0 %v8291_v57  ;;  %5881 = vmatprep.subr.bf16.mxu1 %v8296_v58  ;;  %v8369_v57 = vld [vmem:[%s12625_s1 + $0x1050] ss:$8 sps:$4 sm:$0xff]   ;;  %v8374_v58 = vld [vmem:[%s12625_s1 + $0x264] ss:$8 sps:$4 sm:$0xff]  }
  0x65   :  { %6455 = vmatprep.subr.bf16.mxu0 %v8299_v59  ;;  %v8377_v59 = vld [vmem:[%s12625_s1 + $0x1064] ss:$8 sps:$4 sm:$0xff]  }
  0x67   :  { %5882 = vmatpush1.bf16.msra.mxu1 %v8294_v60  ;;  %v8372_v60 = vld [vmem:[%s12625_s1 + $0x260] ss:$8 sps:$4 sm:$0xff]  }
  0x68   :  { %6456 = vmatpush1.bf16.msra.mxu0 %v8297_v61  ;;  %5883 = vmatprep.subr.bf16.mxu1 %v8302_v62  ;;  %v8375_v61 = vld [vmem:[%s12625_s1 + $0x1060] ss:$8 sps:$4 sm:$0xff]   ;;  %v8380_v62 = vld [vmem:[%s12625_s1 + $0x274] ss:$8 sps:$4 sm:$0xff]  }
  0x69   :  { %6457 = vmatprep.subr.bf16.mxu0 %v8305_v63  ;;  %v8383_v63 = vld [vmem:[%s12625_s1 + $0x1074] ss:$8 sps:$4 sm:$0xff]  }
  0x6b   :  { %5884 = vmatpush1.bf16.msra.mxu1 %v8300_v0  ;;  %v8378_v0 = vld [vmem:[%s12625_s1 + $0x270] ss:$8 sps:$4 sm:$0xff]  }
  0x6c   :  { %6458 = vmatpush1.bf16.msra.mxu0 %v8303_v1  ;;  %5885 = vmatprep.subr.bf16.mxu1 %v8308_v2  ;;  %v8381_v1 = vld [vmem:[%s12625_s1 + $0x1070] ss:$8 sps:$4 sm:$0xff]   ;;  %v8386_v2 = vld [vmem:[%s12625_s1 + $0x284] ss:$8 sps:$4 sm:$0xff]  }
  0x6d   :  { %6459 = vmatprep.subr.bf16.mxu0 %v8311_v3  ;;  %v8389_v3 = vld [vmem:[%s12625_s1 + $0x1084] ss:$8 sps:$4 sm:$0xff]  }
  0x6f   :  { %5886 = vmatpush1.bf16.msra.mxu1 %v8306_v4  ;;  %v8384_v4 = vld [vmem:[%s12625_s1 + $0x280] ss:$8 sps:$4 sm:$0xff]  }
  0x70   :  { %6460 = vmatpush1.bf16.msra.mxu0 %v8309_v5  ;;  %5887 = vmatprep.subr.bf16.mxu1 %v8314_v6  ;;  %v8387_v5 = vld [vmem:[%s12625_s1 + $0x1080] ss:$8 sps:$4 sm:$0xff]   ;;  %v8392_v6 = vld [vmem:[%s12625_s1 + $0x294] ss:$8 sps:$4 sm:$0xff]  }
  0x71   :  { %6461 = vmatprep.subr.bf16.mxu0 %v8317_v7  ;;  %v8395_v7 = vld [vmem:[%s12625_s1 + $0x1094] ss:$8 sps:$4 sm:$0xff]  }
  0x73   :  { %5888 = vmatpush1.bf16.msra.mxu1 %v8312_v8  ;;  %v8390_v8 = vld [vmem:[%s12625_s1 + $0x290] ss:$8 sps:$4 sm:$0xff]  }
  0x74   :  { %6462 = vmatpush1.bf16.msra.mxu0 %v8315_v9  ;;  %5889 = vmatprep.subr.bf16.mxu1 %v8320_v10  ;;  %v8393_v9 = vld [vmem:[%s12625_s1 + $0x1090] ss:$8 sps:$4 sm:$0xff]   ;;  %v8398_v10 = vld [vmem:[%s12625_s1 + $0x2a4] ss:$8 sps:$4 sm:$0xff]  }
  0x75   :  { %6463 = vmatprep.subr.bf16.mxu0 %v8323_v11  ;;  %v8401_v11 = vld [vmem:[%s12625_s1 + $0x10a4] ss:$8 sps:$4 sm:$0xff]  }
  0x77   :  { %5890 = vmatpush1.bf16.msra.mxu1 %v8318_v12  ;;  %v8396_v12 = vld [vmem:[%s12625_s1 + $0x2a0] ss:$8 sps:$4 sm:$0xff]  }
  0x78   :  { %6464 = vmatpush1.bf16.msra.mxu0 %v8321_v13  ;;  %5891 = vmatprep.subr.bf16.mxu1 %v8326_v14  ;;  %v8399_v13 = vld [vmem:[%s12625_s1 + $0x10a0] ss:$8 sps:$4 sm:$0xff]   ;;  %v8404_v14 = vld [vmem:[%s12625_s1 + $0x2b4] ss:$8 sps:$4 sm:$0xff]  }
  0x79   :  { %6465 = vmatprep.subr.bf16.mxu0 %v8329_v15  ;;  %v8407_v15 = vld [vmem:[%s12625_s1 + $0x10b4] ss:$8 sps:$4 sm:$0xff]  }
  0x7b   :  { %5892 = vmatpush1.bf16.msra.mxu1 %v8324_v19  ;;  %v8405_v19 = vld [vmem:[%s12625_s1 + $0x10b0] ss:$8 sps:$4 sm:$0xff]  }
  0x7c   :  { %6466 = vmatpush1.bf16.msra.mxu0 %v8327_v20  ;;  %5893 = vmatprep.subr.bf16.mxu1 %v8332_v21  ;;  %v8410_v20 = vld [vmem:[%s12625_s1 + $0x2c4] ss:$8 sps:$4 sm:$0xff]  }
  0x7d   :  { %6467 = vmatprep.subr.bf16.mxu0 %v8335_v52  ;;  %v8413_v21 = vld [vmem:[%s12625_s1 + $0x10c4] ss:$8 sps:$4 sm:$0xff]   ;;  %v8408_v52 = vld [vmem:[%s12625_s1 + $0x2c0] ss:$8 sps:$4 sm:$0xff]  }
  0x7f   :  { %5894 = vmatpush1.bf16.msra.mxu1 %v8330_v23  ;;  %v8411_v23 = vld [vmem:[%s12625_s1 + $0x10c0] ss:$8 sps:$4 sm:$0xff]  }
  0x80   :  { %6468 = vmatpush1.bf16.msra.mxu0 %v8333_v24  ;;  %5904 = vmatprep.subr.bf16.mxu1 %v8338_v25  ;;  %v8416_v24 = vld [vmem:[%s12625_s1 + $0x2d4] ss:$8 sps:$4 sm:$0xff]  }
  0x81   :  { %6478 = vmatprep.subr.bf16.mxu0 %v8341_v26  ;;  %v8419_v25 = vld [vmem:[%s12625_s1 + $0x10d4] ss:$8 sps:$4 sm:$0xff]   ;;  %v8414_v26 = vld [vmem:[%s12625_s1 + $0x2d0] ss:$8 sps:$4 sm:$0xff]  }
  0x82   :  { %5896 = vmatmul.mubr.bf16.vlgmr.msra.gmra.mrb[0].mxu1 %v988_v28  ;;  %v8422_v28 = vld [vmem:[%s12625_s1 + $0x2e4] ss:$8 sps:$4 sm:$0xff]  }
  0x83   :  { %6470 = vmatmul.mubr.bf16.vlgmr.msra.gmra.mrb[0].mxu0 %v1136_v29  ;;  %5905 = vmatpush1.bf16.msra.mxu1 %v8336_v30  ;;  %v8425_v29 = vld [vmem:[%s12625_s1 + $0x10e4] ss:$8 sps:$4 sm:$0xff]   ;;  %v8420_v30 = vld [vmem:[%s12625_s1 + $0x2e0] ss:$8 sps:$4 sm:$0xff]  }
  0x84   :  { %6479 = vmatpush1.bf16.msra.mxu0 %v8339_v31  ;;  %5906 = vmatprep.subr.bf16.mxu1 %v8344_v32  ;;  %v8423_v31 = vld [vmem:[%s12625_s1 + $0x10e0] ss:$8 sps:$4 sm:$0xff]   ;;  %v8428_v32 = vld [vmem:[%s12625_s1 + $0x2f4] ss:$8 sps:$4 sm:$0xff]  }
  0x85   :  { %6480 = vmatprep.subr.bf16.mxu0 %v8347_v17  ;;  %5936 = vmatprep.mubr.bf16.mxu1 %v9997_v18  ;;  %v8431_v17 = vld [vmem:[%s12625_s1 + $0x10f4] ss:$8 sps:$4 sm:$0xff]  }
  0x86   :  { %6510 = vmatprep.mubr.bf16.mxu0 %v10027_v41 }
  0x87   :  { %5907 = vmatpush1.bf16.msra.mxu1 %v8342_v34  ;;  %v8426_v34 = vld [vmem:[%s12625_s1 + $0x2f0] ss:$8 sps:$4 sm:$0xff]  }
  0x88   :  { %6481 = vmatpush1.bf16.msra.mxu0 %v8345_v36  ;;  %5908 = vmatprep.subr.bf16.mxu1 %v8350_v37  ;;  %v8429_v36 = vld [vmem:[%s12625_s1 + $0x10f0] ss:$8 sps:$4 sm:$0xff]   ;;  %v8434_v37 = vld [vmem:[%s12625_s1 + $0x304] ss:$8 sps:$4 sm:$0xff]  }
  0x89   :  { %6482 = vmatprep.subr.bf16.mxu0 %v8353_v38  ;;  %v8437_v38 = vld [vmem:[%s12625_s1 + $0x1104] ss:$8 sps:$4 sm:$0xff]  }
  0x8b   :  { %5909 = vmatpush1.bf16.msra.mxu1 %v8348_v40  ;;  %v10200_v40 = vrot.slane %v9964_v22, %v9692_v49  ;;  %v8443_v22 = vld [vmem:[%s12625_s1 + $0x1114] ss:$8 sps:$4 sm:$0xff]  }
  0x8c   :  { %6483 = vmatpush1.bf16.msra.mxu0 %v8351_v43  ;;  %5910 = vmatprep.subr.bf16.mxu1 %v8356_v44  ;;  %v10204_v43 = vrot.slane %v10009_v35, %v9692_v49  ;;  %v8435_v44 = vld [vmem:[%s12625_s1 + $0x1100] ss:$8 sps:$4 sm:$0xff]   ;;  %v991_v35 = vcombine.high %v9997_v18, %v9997_v18  ;;  %v8446_v18 = vld [vmem:[%s12625_s1 + $0x324] ss:$8 sps:$4 sm:$0xff]  }
  0x8d   :  { %6484 = vmatprep.subr.bf16.mxu0 %v8359_v45  ;;  %v8440_v45 = vld [vmem:[%s12625_s1 + $0x314] ss:$8 sps:$4 sm:$0xff]  }
  0x8f   :  { %5911 = vmatpush1.bf16.msra.mxu1 %v8354_v46  ;;  %v1186_v46 = vcombine.high %v10027_v41, %v10027_v41  ;;  %v8449_v41 = vld [vmem:[%s12625_s1 + $0x1124] ss:$8 sps:$4 sm:$0xff]  }
  0x90   :  { %6485 = vmatpush1.bf16.msra.mxu0 %v8357_v47  ;;  %5912 = vmatprep.subr.bf16.mxu1 %v8362_v48  ;;  %v8438_v47 = vld [vmem:[%s12625_s1 + $0x310] ss:$8 sps:$4 sm:$0xff]  }
  0x91   :  { %6486 = vmatprep.subr.bf16.mxu0 %v8365_v50  ;;  %v8441_v48 = vld [vmem:[%s12625_s1 + $0x1110] ss:$8 sps:$4 sm:$0xff]   ;;  %v8444_v50 = vld [vmem:[%s12625_s1 + $0x320] ss:$8 sps:$4 sm:$0xff]  }
  0x93   :  { %5913 = vmatpush1.bf16.msra.mxu1 %v8360_v51  ;;  %v8447_v51 = vld [vmem:[%s12625_s1 + $0x1120] ss:$8 sps:$4 sm:$0xff]  }
  0x94   :  { %6487 = vmatpush1.bf16.msra.mxu0 %v8363_v53  ;;  %5914 = vmatprep.subr.bf16.mxu1 %v8368_v54  ;;  %v8452_v53 = vld [vmem:[%s12625_s1 + $0x334] ss:$8 sps:$4 sm:$0xff]  }
  0x95   :  { %6488 = vmatprep.subr.bf16.mxu0 %v8371_v55  ;;  %v8455_v54 = vld [vmem:[%s12625_s1 + $0x1134] ss:$8 sps:$4 sm:$0xff]   ;;  %v8450_v55 = vld [vmem:[%s12625_s1 + $0x330] ss:$8 sps:$4 sm:$0xff]  }
  0x97   :  { %5915 = vmatpush1.bf16.msra.mxu1 %v8366_v56  ;;  %v8453_v56 = vld [vmem:[%s12625_s1 + $0x1130] ss:$8 sps:$4 sm:$0xff]  }
  0x98   :  { %6489 = vmatpush1.bf16.msra.mxu0 %v8369_v57  ;;  %5916 = vmatprep.subr.bf16.mxu1 %v8374_v58  ;;  %v8458_v57 = vld [vmem:[%s12625_s1 + $0x344] ss:$8 sps:$4 sm:$0xff]  }
  0x99   :  { %6490 = vmatprep.subr.bf16.mxu0 %v8377_v59  ;;  %v8461_v58 = vld [vmem:[%s12625_s1 + $0x1144] ss:$8 sps:$4 sm:$0xff]   ;;  %v8456_v59 = vld [vmem:[%s12625_s1 + $0x340] ss:$8 sps:$4 sm:$0xff]  }
  0x9b   :  { %5917 = vmatpush1.bf16.msra.mxu1 %v8372_v60  ;;  %v8459_v60 = vld [vmem:[%s12625_s1 + $0x1140] ss:$8 sps:$4 sm:$0xff]  }
  0x9c   :  { %6491 = vmatpush1.bf16.msra.mxu0 %v8375_v61  ;;  %5918 = vmatprep.subr.bf16.mxu1 %v8380_v62  ;;  %v8464_v61 = vld [vmem:[%s12625_s1 + $0x354] ss:$8 sps:$4 sm:$0xff]  }
  0x9d   :  { %6492 = vmatprep.subr.bf16.mxu0 %v8383_v63  ;;  %v8467_v62 = vld [vmem:[%s12625_s1 + $0x1154] ss:$8 sps:$4 sm:$0xff]   ;;  %v8462_v63 = vld [vmem:[%s12625_s1 + $0x350] ss:$8 sps:$4 sm:$0xff]  }
  0x9f   :  { %5919 = vmatpush1.bf16.msra.mxu1 %v8378_v0  ;;  %v8465_v0 = vld [vmem:[%s12625_s1 + $0x1150] ss:$8 sps:$4 sm:$0xff]  }
  0xa0   :  { %6493 = vmatpush1.bf16.msra.mxu0 %v8381_v1  ;;  %5920 = vmatprep.subr.bf16.mxu1 %v8386_v2  ;;  %v8470_v1 = vld [vmem:[%s12625_s1 + $0x364] ss:$8 sps:$4 sm:$0xff]  }
  0xa1   :  { %6494 = vmatprep.subr.bf16.mxu0 %v8389_v3  ;;  %v8473_v2 = vld [vmem:[%s12625_s1 + $0x1164] ss:$8 sps:$4 sm:$0xff]   ;;  %v8468_v3 = vld [vmem:[%s12625_s1 + $0x360] ss:$8 sps:$4 sm:$0xff]  }
  0xa3   :  { %5921 = vmatpush1.bf16.msra.mxu1 %v8384_v4  ;;  %v8471_v4 = vld [vmem:[%s12625_s1 + $0x1160] ss:$8 sps:$4 sm:$0xff]  }
  0xa4   :  { %6495 = vmatpush1.bf16.msra.mxu0 %v8387_v5  ;;  %5922 = vmatprep.subr.bf16.mxu1 %v8392_v6  ;;  %v8476_v5 = vld [vmem:[%s12625_s1 + $0x374] ss:$8 sps:$4 sm:$0xff]  }
  0xa5   :  { %6496 = vmatprep.subr.bf16.mxu0 %v8395_v7  ;;  %v8479_v6 = vld [vmem:[%s12625_s1 + $0x1174] ss:$8 sps:$4 sm:$0xff]   ;;  %v8474_v7 = vld [vmem:[%s12625_s1 + $0x370] ss:$8 sps:$4 sm:$0xff]  }
  0xa7   :  { %5923 = vmatpush1.bf16.msra.mxu1 %v8390_v8  ;;  %v8477_v8 = vld [vmem:[%s12625_s1 + $0x1170] ss:$8 sps:$4 sm:$0xff]  }
  0xa8   :  { %6497 = vmatpush1.bf16.msra.mxu0 %v8393_v9  ;;  %5924 = vmatprep.subr.bf16.mxu1 %v8398_v10  ;;  %v8482_v9 = vld [vmem:[%s12625_s1 + $0x384] ss:$8 sps:$4 sm:$0xff]  }
  0xa9   :  { %6498 = vmatprep.subr.bf16.mxu0 %v8401_v11  ;;  %v8485_v10 = vld [vmem:[%s12625_s1 + $0x1184] ss:$8 sps:$4 sm:$0xff]   ;;  %v8480_v11 = vld [vmem:[%s12625_s1 + $0x380] ss:$8 sps:$4 sm:$0xff]  }
  0xab   :  { %5925 = vmatpush1.bf16.msra.mxu1 %v8396_v12  ;;  %v8483_v12 = vld [vmem:[%s12625_s1 + $0x1180] ss:$8 sps:$4 sm:$0xff]  }
  0xac   :  { %6499 = vmatpush1.bf16.msra.mxu0 %v8399_v13  ;;  %5926 = vmatprep.subr.bf16.mxu1 %v8404_v14  ;;  %v8488_v13 = vld [vmem:[%s12625_s1 + $0x394] ss:$8 sps:$4 sm:$0xff]  }
  0xad   :  { %6500 = vmatprep.subr.bf16.mxu0 %v8407_v15  ;;  %v8491_v14 = vld [vmem:[%s12625_s1 + $0x1194] ss:$8 sps:$4 sm:$0xff]   ;;  %v8486_v15 = vld [vmem:[%s12625_s1 + $0x390] ss:$8 sps:$4 sm:$0xff]  }
  0xaf   :  { %5927 = vmatpush1.bf16.msra.mxu1 %v8402_v16  ;;  %v8489_v16 = vld [vmem:[%s12625_s1 + $0x1190] ss:$8 sps:$4 sm:$0xff]  }
  0xb0   :  { %6501 = vmatpush1.bf16.msra.mxu0 %v8405_v19  ;;  %5928 = vmatprep.subr.bf16.mxu1 %v8410_v20  ;;  %v8494_v19 = vld [vmem:[%s12625_s1 + $0x3a4] ss:$8 sps:$4 sm:$0xff]  }
  0xb1   :  { %6502 = vmatprep.subr.bf16.mxu0 %v8413_v21  ;;  %v8497_v20 = vld [vmem:[%s12625_s1 + $0x11a4] ss:$8 sps:$4 sm:$0xff]   ;;  %v8492_v21 = vld [vmem:[%s12625_s1 + $0x3a0] ss:$8 sps:$4 sm:$0xff]  }
  0xb3   :  { %5929 = vmatpush1.bf16.msra.mxu1 %v8408_v52  ;;  %v8495_v52 = vld [vmem:[%s12625_s1 + $0x11a0] ss:$8 sps:$4 sm:$0xff]  }
  0xb4   :  { %6503 = vmatpush1.bf16.msra.mxu0 %v8411_v23  ;;  %5930 = vmatprep.subr.bf16.mxu1 %v8416_v24  ;;  %v8500_v23 = vld [vmem:[%s12625_s1 + $0x3b4] ss:$8 sps:$4 sm:$0xff]  }
  0xb5   :  { %6504 = vmatprep.subr.bf16.mxu0 %v8419_v25  ;;  %v8503_v24 = vld [vmem:[%s12625_s1 + $0x11b4] ss:$8 sps:$4 sm:$0xff]   ;;  %v8498_v25 = vld [vmem:[%s12625_s1 + $0x3b0] ss:$8 sps:$4 sm:$0xff]  }
  0xb7   :  { %5931 = vmatpush1.bf16.msra.mxu1 %v8414_v26  ;;  %v8501_v26 = vld [vmem:[%s12625_s1 + $0x11b0] ss:$8 sps:$4 sm:$0xff]  }
  0xb8   :  { %6505 = vmatpush1.bf16.msra.mxu0 %v8417_v27  ;;  %5932 = vmatprep.subr.bf16.mxu1 %v8422_v28  ;;  %v8506_v27 = vld [vmem:[%s12625_s1 + $0x3c4] ss:$8 sps:$4 sm:$0xff]  }
  0xb9   :  { %6506 = vmatprep.subr.bf16.mxu0 %v8425_v29  ;;  %v8509_v28 = vld [vmem:[%s12625_s1 + $0x11c4] ss:$8 sps:$4 sm:$0xff]   ;;  %v8504_v29 = vld [vmem:[%s12625_s1 + $0x3c0] ss:$8 sps:$4 sm:$0xff]  }
  0xbb   :  { %5933 = vmatpush1.bf16.msra.mxu1 %v8420_v30  ;;  %v8507_v30 = vld [vmem:[%s12625_s1 + $0x11c0] ss:$8 sps:$4 sm:$0xff]  }
  0xbc   :  { %6507 = vmatpush1.bf16.msra.mxu0 %v8423_v31  ;;  %5934 = vmatprep.subr.bf16.mxu1 %v8428_v32  ;;  %v8512_v31 = vld [vmem:[%s12625_s1 + $0x3d4] ss:$8 sps:$4 sm:$0xff]  }
  0xbd   :  { %6508 = vmatprep.subr.bf16.mxu0 %v8431_v17  ;;  %v8515_v32 = vld [vmem:[%s12625_s1 + $0x11d4] ss:$8 sps:$4 sm:$0xff]   ;;  %v8510_v17 = vld [vmem:[%s12625_s1 + $0x3d0] ss:$8 sps:$4 sm:$0xff]  }
  0xbf   :  { %5935 = vmatpush1.bf16.msra.mxu1 %v8426_v34  ;;  %v8513_v34 = vld [vmem:[%s12625_s1 + $0x11d0] ss:$8 sps:$4 sm:$0xff]  }
  0xc0   :  { %6509 = vmatpush1.bf16.msra.mxu0 %v8429_v36  ;;  %5945 = vmatprep.subr.bf16.mxu1 %v8434_v37  ;;  %v8518_v36 = vld [vmem:[%s12625_s1 + $0x3e4] ss:$8 sps:$4 sm:$0xff]  }
  0xc1   :  { %6519 = vmatprep.subr.bf16.mxu0 %v8437_v38  ;;  %v8521_v37 = vld [vmem:[%s12625_s1 + $0x11e4] ss:$8 sps:$4 sm:$0xff]   ;;  %v8516_v38 = vld [vmem:[%s12625_s1 + $0x3e0] ss:$8 sps:$4 sm:$0xff]  }
  0xc2   :  { %5937 = vmatmul.mubr.bf16.vlgmr.msra.gmra.mrb[0].mxu1 %v10200_v40 }
  0xc3   :  { %6511 = vmatmul.mubr.bf16.vlgmr.msra.gmra.mrb[0].mxu0 %v10204_v43  ;;  %5946 = vmatpush1.bf16.msra.mxu1 %v8432_v39  ;;  %v1139_v39 = vcombine.high %v10002_v33, %v10002_v33  ;;  %v8527_v33 = vld [vmem:[%s12625_s1 + $0x11f4] ss:$8 sps:$4 sm:$0xff]  }
  0xc4   :  { %6520 = vmatpush1.bf16.msra.mxu0 %v8435_v44  ;;  %5947 = vmatprep.subr.bf16.mxu1 %v8440_v45  ;;  %v8519_v44 = vld [vmem:[%s12625_s1 + $0x11e0] ss:$8 sps:$4 sm:$0xff]  }
  0xc5   :  { %6521 = vmatprep.subr.bf16.mxu0 %v8443_v22  ;;  %5977 = vmatprep.mubr.bf16.mxu1 %v991_v35  ;;  %v10388_v45 = vld.sshfl [vmem:[%s12624_s0 + $0x8] sm:$0xff pattern:$0x75316420]  ;;  %v8524_v22 = vld [vmem:[%s12625_s1 + $0x3f4] ss:$8 sps:$4 sm:$0xff]   ;;  %v10397_v35 = vrot.slane %v1139_v39, %v9692_v49 }
  0xc6   :  { %6551 = vmatprep.mubr.bf16.mxu0 %v1186_v46  ;;  %v8522_v46 = vld [vmem:[%s12625_s1 + $0x3f0] ss:$8 sps:$4 sm:$0xff]   ;;  %v8602_v39 = vld [vmem:[%s12625_s1 + $0x4c4] ss:$8 sps:$4 sm:$0xff]  }
  0xc7   :  { %5948 = vmatpush1.bf16.msra.mxu1 %v8438_v47  ;;  %v8525_v47 = vld [vmem:[%s12625_s1 + $0x11f0] ss:$8 sps:$4 sm:$0xff]  }
  0xc8   :  { %6522 = vmatpush1.bf16.msra.mxu0 %v8441_v48  ;;  %5949 = vmatprep.subr.bf16.mxu1 %v8446_v18  ;;  %v8530_v48 = vld [vmem:[%s12625_s1 + $0x404] ss:$8 sps:$4 sm:$0xff]  }
  0xc9   :  { %6523 = vmatprep.subr.bf16.mxu0 %v8449_v41  ;;  %v8533_v18 = vld [vmem:[%s12625_s1 + $0x1204] ss:$8 sps:$4 sm:$0xff]   ;;  %v1007_v41 = vcombine.high %v10388_v45, %v10388_v45 }
  0xcb   :  { %5950 = vmatpush1.bf16.msra.mxu1 %v8444_v50  ;;  %v1155_v50 = vcombine.high %v10397_v35, %v10397_v35 }
  0xcc   :  { %6524 = vmatpush1.bf16.msra.mxu0 %v8447_v51  ;;  %5951 = vmatprep.subr.bf16.mxu1 %v8452_v53  ;;  %v8528_v51 = vld [vmem:[%s12625_s1 + $0x400] ss:$8 sps:$4 sm:$0xff]  }
  0xcd   :  { %6525 = vmatprep.subr.bf16.mxu0 %v8455_v54  ;;  %v8531_v53 = vld [vmem:[%s12625_s1 + $0x1200] ss:$8 sps:$4 sm:$0xff]   ;;  %v989_v54 = vcombine.high %v10200_v40, %v10200_v40  ;;  %v10435_v40 = vrot.slane %v1155_v50, %v9692_v49  ;;  %v8617_v50 = vld [vmem:[%s12625_s1 + $0x12e4] ss:$8 sps:$4 sm:$0xff]  }
  0xcf   :  { %5952 = vmatpush1.bf16.msra.mxu1 %v8450_v55  ;;  %v1184_v55 = vcombine.high %v10204_v43, %v10204_v43  ;;  %v8534_v43 = vld [vmem:[%s12625_s1 + $0x410] ss:$8 sps:$4 sm:$0xff]  }
  0xd0   :  { %6526 = vmatpush1.bf16.msra.mxu0 %v8453_v56  ;;  %5953 = vmatprep.subr.bf16.mxu1 %v8458_v57  ;;  %v8536_v56 = vld [vmem:[%s12625_s1 + $0x414] ss:$8 sps:$4 sm:$0xff]  }
  0xd1   :  { %6527 = vmatprep.subr.bf16.mxu0 %v8461_v58  ;;  %v8539_v57 = vld [vmem:[%s12625_s1 + $0x1214] ss:$8 sps:$4 sm:$0xff]   ;;  %v10432_v58 = vrot.slane %v1007_v41, %v9692_v49  ;;  %v8614_v41 = vld [vmem:[%s12625_s1 + $0x4e4] ss:$8 sps:$4 sm:$0xff]  }
  0xd3   :  { %5954 = vmatpush1.bf16.msra.mxu1 %v8456_v59  ;;  %v8537_v59 = vld [vmem:[%s12625_s1 + $0x1210] ss:$8 sps:$4 sm:$0xff]  }
  0xd4   :  { %6528 = vmatpush1.bf16.msra.mxu0 %v8459_v60  ;;  %5955 = vmatprep.subr.bf16.mxu1 %v8464_v61  ;;  %v8542_v60 = vld [vmem:[%s12625_s1 + $0x424] ss:$8 sps:$4 sm:$0xff]  }
  0xd5   :  { %6529 = vmatprep.subr.bf16.mxu0 %v8467_v62  ;;  %v8545_v61 = vld [vmem:[%s12625_s1 + $0x1224] ss:$8 sps:$4 sm:$0xff]   ;;  %v8540_v62 = vld [vmem:[%s12625_s1 + $0x420] ss:$8 sps:$4 sm:$0xff]  }
  0xd7   :  { %5956 = vmatpush1.bf16.msra.mxu1 %v8462_v63  ;;  %v8543_v63 = vld [vmem:[%s12625_s1 + $0x1220] ss:$8 sps:$4 sm:$0xff]  }
  0xd8   :  { %6530 = vmatpush1.bf16.msra.mxu0 %v8465_v0  ;;  %5957 = vmatprep.subr.bf16.mxu1 %v8470_v1  ;;  %v8548_v0 = vld [vmem:[%s12625_s1 + $0x434] ss:$8 sps:$4 sm:$0xff]  }
  0xd9   :  { %6531 = vmatprep.subr.bf16.mxu0 %v8473_v2  ;;  %v8551_v1 = vld [vmem:[%s12625_s1 + $0x1234] ss:$8 sps:$4 sm:$0xff]   ;;  %v8546_v2 = vld [vmem:[%s12625_s1 + $0x430] ss:$8 sps:$4 sm:$0xff]  }
  0xdb   :  { %5958 = vmatpush1.bf16.msra.mxu1 %v8468_v3  ;;  %v8549_v3 = vld [vmem:[%s12625_s1 + $0x1230] ss:$8 sps:$4 sm:$0xff]  }
  0xdc   :  { %6532 = vmatpush1.bf16.msra.mxu0 %v8471_v4  ;;  %5959 = vmatprep.subr.bf16.mxu1 %v8476_v5  ;;  %v8554_v4 = vld [vmem:[%s12625_s1 + $0x444] ss:$8 sps:$4 sm:$0xff]  }
  0xdd   :  { %6533 = vmatprep.subr.bf16.mxu0 %v8479_v6  ;;  %v8557_v5 = vld [vmem:[%s12625_s1 + $0x1244] ss:$8 sps:$4 sm:$0xff]   ;;  %v8552_v6 = vld [vmem:[%s12625_s1 + $0x440] ss:$8 sps:$4 sm:$0xff]  }
  0xdf   :  { %5960 = vmatpush1.bf16.msra.mxu1 %v8474_v7  ;;  %v8555_v7 = vld [vmem:[%s12625_s1 + $0x1240] ss:$8 sps:$4 sm:$0xff]  }
  0xe0   :  { %6534 = vmatpush1.bf16.msra.mxu0 %v8477_v8  ;;  %5961 = vmatprep.subr.bf16.mxu1 %v8482_v9  ;;  %v8560_v8 = vld [vmem:[%s12625_s1 + $0x454] ss:$8 sps:$4 sm:$0xff]  }
  0xe1   :  { %6535 = vmatprep.subr.bf16.mxu0 %v8485_v10  ;;  %v8563_v9 = vld [vmem:[%s12625_s1 + $0x1254] ss:$8 sps:$4 sm:$0xff]   ;;  %v8558_v10 = vld [vmem:[%s12625_s1 + $0x450] ss:$8 sps:$4 sm:$0xff]  }
  0xe3   :  { %5962 = vmatpush1.bf16.msra.mxu1 %v8480_v11  ;;  %v8561_v11 = vld [vmem:[%s12625_s1 + $0x1250] ss:$8 sps:$4 sm:$0xff]  }
  0xe4   :  { %6536 = vmatpush1.bf16.msra.mxu0 %v8483_v12  ;;  %5963 = vmatprep.subr.bf16.mxu1 %v8488_v13  ;;  %v8566_v12 = vld [vmem:[%s12625_s1 + $0x464] ss:$8 sps:$4 sm:$0xff]  }
  0xe5   :  { %6537 = vmatprep.subr.bf16.mxu0 %v8491_v14  ;;  %v8569_v13 = vld [vmem:[%s12625_s1 + $0x1264] ss:$8 sps:$4 sm:$0xff]   ;;  %v8564_v14 = vld [vmem:[%s12625_s1 + $0x460] ss:$8 sps:$4 sm:$0xff]  }
  0xe7   :  { %5964 = vmatpush1.bf16.msra.mxu1 %v8486_v15  ;;  %v8567_v15 = vld [vmem:[%s12625_s1 + $0x1260] ss:$8 sps:$4 sm:$0xff]  }
  0xe8   :  { %6538 = vmatpush1.bf16.msra.mxu0 %v8489_v16  ;;  %5965 = vmatprep.subr.bf16.mxu1 %v8494_v19  ;;  %v8572_v16 = vld [vmem:[%s12625_s1 + $0x474] ss:$8 sps:$4 sm:$0xff]  }
  0xe9   :  { %6539 = vmatprep.subr.bf16.mxu0 %v8497_v20  ;;  %v8575_v19 = vld [vmem:[%s12625_s1 + $0x1274] ss:$8 sps:$4 sm:$0xff]   ;;  %v8570_v20 = vld [vmem:[%s12625_s1 + $0x470] ss:$8 sps:$4 sm:$0xff]  }
  0xeb   :  { %5966 = vmatpush1.bf16.msra.mxu1 %v8492_v21  ;;  %v8573_v21 = vld [vmem:[%s12625_s1 + $0x1270] ss:$8 sps:$4 sm:$0xff]  }
  0xec   :  { %6540 = vmatpush1.bf16.msra.mxu0 %v8495_v52  ;;  %5967 = vmatprep.subr.bf16.mxu1 %v8500_v23  ;;  %v8578_v52 = vld [vmem:[%s12625_s1 + $0x484] ss:$8 sps:$4 sm:$0xff]  }
  0xed   :  { %6541 = vmatprep.subr.bf16.mxu0 %v8503_v24  ;;  %v8581_v23 = vld [vmem:[%s12625_s1 + $0x1284] ss:$8 sps:$4 sm:$0xff]   ;;  %v8576_v24 = vld [vmem:[%s12625_s1 + $0x480] ss:$8 sps:$4 sm:$0xff]  }
  0xef   :  { %5968 = vmatpush1.bf16.msra.mxu1 %v8498_v25  ;;  %v8579_v25 = vld [vmem:[%s12625_s1 + $0x1280] ss:$8 sps:$4 sm:$0xff]  }
  0xf0   :  { %6542 = vmatpush1.bf16.msra.mxu0 %v8501_v26  ;;  %5969 = vmatprep.subr.bf16.mxu1 %v8506_v27  ;;  %v8584_v26 = vld [vmem:[%s12625_s1 + $0x494] ss:$8 sps:$4 sm:$0xff]  }
  0xf1   :  { %6543 = vmatprep.subr.bf16.mxu0 %v8509_v28  ;;  %v8587_v27 = vld [vmem:[%s12625_s1 + $0x1294] ss:$8 sps:$4 sm:$0xff]   ;;  %v8582_v28 = vld [vmem:[%s12625_s1 + $0x490] ss:$8 sps:$4 sm:$0xff]  }
  0xf3   :  { %5970 = vmatpush1.bf16.msra.mxu1 %v8504_v29  ;;  %v8585_v29 = vld [vmem:[%s12625_s1 + $0x1290] ss:$8 sps:$4 sm:$0xff]  }
  0xf4   :  { %6544 = vmatpush1.bf16.msra.mxu0 %v8507_v30  ;;  %5971 = vmatprep.subr.bf16.mxu1 %v8512_v31  ;;  %v8590_v30 = vld [vmem:[%s12625_s1 + $0x4a4] ss:$8 sps:$4 sm:$0xff]  }
  0xf5   :  { %6545 = vmatprep.subr.bf16.mxu0 %v8515_v32  ;;  %v8593_v31 = vld [vmem:[%s12625_s1 + $0x12a4] ss:$8 sps:$4 sm:$0xff]   ;;  %v8588_v32 = vld [vmem:[%s12625_s1 + $0x4a0] ss:$8 sps:$4 sm:$0xff]  }
  0xf7   :  { %5972 = vmatpush1.bf16.msra.mxu1 %v8510_v17  ;;  %v8591_v17 = vld [vmem:[%s12625_s1 + $0x12a0] ss:$8 sps:$4 sm:$0xff]  }
  0xf8   :  { %6546 = vmatpush1.bf16.msra.mxu0 %v8513_v34  ;;  %5973 = vmatprep.subr.bf16.mxu1 %v8518_v36  ;;  %v8596_v34 = vld [vmem:[%s12625_s1 + $0x4b4] ss:$8 sps:$4 sm:$0xff]  }
  0xf9   :  { %6547 = vmatprep.subr.bf16.mxu0 %v8521_v37  ;;  %v8599_v36 = vld [vmem:[%s12625_s1 + $0x12b4] ss:$8 sps:$4 sm:$0xff]   ;;  %v8594_v37 = vld [vmem:[%s12625_s1 + $0x4b0] ss:$8 sps:$4 sm:$0xff]  }
  0xfb   :  { %5974 = vmatpush1.bf16.msra.mxu1 %v8516_v38  ;;  %v8597_v38 = vld [vmem:[%s12625_s1 + $0x12b0] ss:$8 sps:$4 sm:$0xff]  }
  0xfc   :  { %6548 = vmatpush1.bf16.msra.mxu0 %v8519_v44  ;;  %5975 = vmatprep.subr.bf16.mxu1 %v8524_v22  ;;  %v8605_v44 = vld [vmem:[%s12625_s1 + $0x12c4] ss:$8 sps:$4 sm:$0xff]   ;;  %v8600_v22 = vld [vmem:[%s12625_s1 + $0x4c0] ss:$8 sps:$4 sm:$0xff]  }
  0xfd   :  { %6549 = vmatprep.subr.bf16.mxu0 %v8527_v33  ;;  %v8603_v33 = vld [vmem:[%s12625_s1 + $0x12c0] ss:$8 sps:$4 sm:$0xff]  }
  0xff   :  { %5976 = vmatpush1.bf16.msra.mxu1 %v8522_v46  ;;  %v8608_v46 = vld [vmem:[%s12625_s1 + $0x4d4] ss:$8 sps:$4 sm:$0xff]  }
 0x100   :  { %6550 = vmatpush1.bf16.msra.mxu0 %v8525_v47  ;;  %5986 = vmatprep.subr.bf16.mxu1 %v8530_v48  ;;  %v8611_v47 = vld [vmem:[%s12625_s1 + $0x12d4] ss:$8 sps:$4 sm:$0xff]   ;;  %v8606_v48 = vld [vmem:[%s12625_s1 + $0x4d0] ss:$8 sps:$4 sm:$0xff]  }
 0x101   :  { %6560 = vmatprep.subr.bf16.mxu0 %v8533_v18  ;;  %v8609_v18 = vld [vmem:[%s12625_s1 + $0x12d0] ss:$8 sps:$4 sm:$0xff]  }
 0x102   :  { %5978 = vmatmul.mubr.bf16.vlgmr.msra.gmra.mrb[0].mxu1 %v989_v54  ;;  %v8620_v54 = vld [vmem:[%s12625_s1 + $0x4f4] ss:$8 sps:$4 sm:$0xff]  }
 0x103   :  { %6552 = vmatmul.mubr.bf16.vlgmr.msra.gmra.mrb[0].mxu0 %v1184_v55  ;;  %5987 = vmatpush1.bf16.msra.mxu1 %v8528_v51  ;;  %v8612_v51 = vld [vmem:[%s12625_s1 + $0x4e0] ss:$8 sps:$4 sm:$0xff]   ;;  %v8623_v55 = vld [vmem:[%s12625_s1 + $0x12f4] ss:$8 sps:$4 sm:$0xff]  }
 0x104   :  { %6561 = vmatpush1.bf16.msra.mxu0 %v8531_v53  ;;  %5988 = vmatprep.subr.bf16.mxu1 %v8536_v56  ;;  %v8615_v53 = vld [vmem:[%s12625_s1 + $0x12e0] ss:$8 sps:$4 sm:$0xff]   ;;  %v8618_v56 = vld [vmem:[%s12625_s1 + $0x4f0] ss:$8 sps:$4 sm:$0xff]  }
 0x105   :  { %6562 = vmatprep.subr.bf16.mxu0 %v8539_v57  ;;  %6018 = vmatprep.mubr.bf16.mxu1 %v10432_v58  ;;  %v8621_v57 = vld [vmem:[%s12625_s1 + $0x12f0] ss:$8 sps:$4 sm:$0xff]  }
 0x106   :  { %6592 = vmatprep.mubr.bf16.mxu0 %v10435_v40 }
 0x107   :  { %5989 = vmatpush1.bf16.msra.mxu1 %v8534_v43  ;;  %v8626_v43 = vld [vmem:[%s12625_s1 + $0x504] ss:$8 sps:$4 sm:$0xff]  }
 0x108   :  { %6563 = vmatpush1.bf16.msra.mxu0 %v8537_v59  ;;  %5990 = vmatprep.subr.bf16.mxu1 %v8542_v60  ;;  %v8630_v59 = vld [vmem:[%s12625_s1 + $0x1304] ss:$8 sps:$4 sm:$0xff]   ;;  %v10621_v60 = vrot.slane %v10388_v45, %v9692_v49  ;;  %v8633_v45 = vld [vmem:[%s12625_s1 + $0x514] ss:$8 sps:$4 sm:$0xff]  }
 0x109   :  { %6564 = vmatprep.subr.bf16.mxu0 %v8545_v61  ;;  %v10625_v61 = vrot.slane %v10397_v35, %v9692_v49  ;;  %v8636_v35 = vld [vmem:[%s12625_s1 + $0x1314] ss:$8 sps:$4 sm:$0xff]  }
 0x10b   :  { %5991 = vmatpush1.bf16.msra.mxu1 %v8540_v62  ;;  %v8624_v62 = vld [vmem:[%s12625_s1 + $0x500] ss:$8 sps:$4 sm:$0xff]  }
 0x10c   :  { %6565 = vmatpush1.bf16.msra.mxu0 %v8543_v63  ;;  %5992 = vmatprep.subr.bf16.mxu1 %v8548_v0  ;;  %v8628_v63 = vld [vmem:[%s12625_s1 + $0x1300] ss:$8 sps:$4 sm:$0xff]   ;;  %v1039_v0 = vcombine.high %v10432_v58, %v10432_v58  ;;  %v8639_v58 = vld [vmem:[%s12625_s1 + $0x524] ss:$8 sps:$4 sm:$0xff]  }
 0x10d   :  { %6566 = vmatprep.subr.bf16.mxu0 %v8551_v1  ;;  %v1187_v1 = vcombine.high %v10435_v40, %v10435_v40  ;;  %v8642_v40 = vld [vmem:[%s12625_s1 + $0x1324] ss:$8 sps:$4 sm:$0xff]  }
 0x10f   :  { %5993 = vmatpush1.bf16.msra.mxu1 %v8546_v2  ;;  %v8631_v2 = vld [vmem:[%s12625_s1 + $0x510] ss:$8 sps:$4 sm:$0xff]  }
 0x110   :  { %6567 = vmatpush1.bf16.msra.mxu0 %v8549_v3  ;;  %5994 = vmatprep.subr.bf16.mxu1 %v8554_v4  ;;  %v8634_v3 = vld [vmem:[%s12625_s1 + $0x1310] ss:$8 sps:$4 sm:$0xff]   ;;  %v8637_v4 = vld [vmem:[%s12625_s1 + $0x520] ss:$8 sps:$4 sm:$0xff]  }
 0x111   :  { %6568 = vmatprep.subr.bf16.mxu0 %v8557_v5  ;;  %v8640_v5 = vld [vmem:[%s12625_s1 + $0x1320] ss:$8 sps:$4 sm:$0xff]  }
 0x113   :  { %5995 = vmatpush1.bf16.msra.mxu1 %v8552_v6  ;;  %v8645_v6 = vld [vmem:[%s12625_s1 + $0x534] ss:$8 sps:$4 sm:$0xff]  }
 0x114   :  { %6569 = vmatpush1.bf16.msra.mxu0 %v8555_v7  ;;  %5996 = vmatprep.subr.bf16.mxu1 %v8560_v8  ;;  %v8648_v7 = vld [vmem:[%s12625_s1 + $0x1334] ss:$8 sps:$4 sm:$0xff]   ;;  %v8643_v8 = vld [vmem:[%s12625_s1 + $0x530] ss:$8 sps:$4 sm:$0xff]  }
 0x115   :  { %6570 = vmatprep.subr.bf16.mxu0 %v8563_v9  ;;  %v8646_v9 = vld [vmem:[%s12625_s1 + $0x1330] ss:$8 sps:$4 sm:$0xff]  }
 0x117   :  { %5997 = vmatpush1.bf16.msra.mxu1 %v8558_v10  ;;  %v8651_v10 = vld [vmem:[%s12625_s1 + $0x544] ss:$8 sps:$4 sm:$0xff]  }
 0x118   :  { %6571 = vmatpush1.bf16.msra.mxu0 %v8561_v11  ;;  %5998 = vmatprep.subr.bf16.mxu1 %v8566_v12  ;;  %v8654_v11 = vld [vmem:[%s12625_s1 + $0x1344] ss:$8 sps:$4 sm:$0xff]   ;;  %v8649_v12 = vld [vmem:[%s12625_s1 + $0x540] ss:$8 sps:$4 sm:$0xff]  }
 0x119   :  { %6572 = vmatprep.subr.bf16.mxu0 %v8569_v13  ;;  %v8652_v13 = vld [vmem:[%s12625_s1 + $0x1340] ss:$8 sps:$4 sm:$0xff]  }
 0x11b   :  { %5999 = vmatpush1.bf16.msra.mxu1 %v8564_v14  ;;  %v8657_v14 = vld [vmem:[%s12625_s1 + $0x554] ss:$8 sps:$4 sm:$0xff]  }
 0x11c   :  { %6573 = vmatpush1.bf16.msra.mxu0 %v8567_v15  ;;  %6000 = vmatprep.subr.bf16.mxu1 %v8572_v16  ;;  %v8660_v15 = vld [vmem:[%s12625_s1 + $0x1354] ss:$8 sps:$4 sm:$0xff]   ;;  %v8655_v16 = vld [vmem:[%s12625_s1 + $0x550] ss:$8 sps:$4 sm:$0xff]  }
 0x11d   :  { %6574 = vmatprep.subr.bf16.mxu0 %v8575_v19  ;;  %v8658_v19 = vld [vmem:[%s12625_s1 + $0x1350] ss:$8 sps:$4 sm:$0xff]  }
 0x11f   :  { %6001 = vmatpush1.bf16.msra.mxu1 %v8570_v20  ;;  %v8663_v20 = vld [vmem:[%s12625_s1 + $0x564] ss:$8 sps:$4 sm:$0xff]  }
 0x120   :  { %6575 = vmatpush1.bf16.msra.mxu0 %v8573_v21  ;;  %6002 = vmatprep.subr.bf16.mxu1 %v8578_v52  ;;  %v8666_v21 = vld [vmem:[%s12625_s1 + $0x1364] ss:$8 sps:$4 sm:$0xff]   ;;  %v8661_v52 = vld [vmem:[%s12625_s1 + $0x560] ss:$8 sps:$4 sm:$0xff]  }
 0x121   :  { %6576 = vmatprep.subr.bf16.mxu0 %v8581_v23  ;;  %v8664_v23 = vld [vmem:[%s12625_s1 + $0x1360] ss:$8 sps:$4 sm:$0xff]  }
 0x123   :  { %6003 = vmatpush1.bf16.msra.mxu1 %v8576_v24  ;;  %v8669_v24 = vld [vmem:[%s12625_s1 + $0x574] ss:$8 sps:$4 sm:$0xff]  }
 0x124   :  { %6577 = vmatpush1.bf16.msra.mxu0 %v8579_v25  ;;  %6004 = vmatprep.subr.bf16.mxu1 %v8584_v26  ;;  %v8672_v25 = vld [vmem:[%s12625_s1 + $0x1374] ss:$8 sps:$4 sm:$0xff]   ;;  %v8667_v26 = vld [vmem:[%s12625_s1 + $0x570] ss:$8 sps:$4 sm:$0xff]  }
 0x125   :  { %6578 = vmatprep.subr.bf16.mxu0 %v8587_v27  ;;  %v8670_v27 = vld [vmem:[%s12625_s1 + $0x1370] ss:$8 sps:$4 sm:$0xff]  }
 0x127   :  { %6005 = vmatpush1.bf16.msra.mxu1 %v8582_v28  ;;  %v8675_v28 = vld [vmem:[%s12625_s1 + $0x584] ss:$8 sps:$4 sm:$0xff]  }
 0x128   :  { %6579 = vmatpush1.bf16.msra.mxu0 %v8585_v29  ;;  %6006 = vmatprep.subr.bf16.mxu1 %v8590_v30  ;;  %v8678_v29 = vld [vmem:[%s12625_s1 + $0x1384] ss:$8 sps:$4 sm:$0xff]   ;;  %v8673_v30 = vld [vmem:[%s12625_s1 + $0x580] ss:$8 sps:$4 sm:$0xff]  }
 0x129   :  { %6580 = vmatprep.subr.bf16.mxu0 %v8593_v31  ;;  %v8676_v31 = vld [vmem:[%s12625_s1 + $0x1380] ss:$8 sps:$4 sm:$0xff]  }
 0x12b   :  { %6007 = vmatpush1.bf16.msra.mxu1 %v8588_v32  ;;  %v8681_v32 = vld [vmem:[%s12625_s1 + $0x594] ss:$8 sps:$4 sm:$0xff]  }
 0x12c   :  { %6581 = vmatpush1.bf16.msra.mxu0 %v8591_v17  ;;  %6008 = vmatprep.subr.bf16.mxu1 %v8596_v34  ;;  %v8684_v17 = vld [vmem:[%s12625_s1 + $0x1394] ss:$8 sps:$4 sm:$0xff]   ;;  %v8679_v34 = vld [vmem:[%s12625_s1 + $0x590] ss:$8 sps:$4 sm:$0xff]  }
 0x12d   :  { %6582 = vmatprep.subr.bf16.mxu0 %v8599_v36  ;;  %v8682_v36 = vld [vmem:[%s12625_s1 + $0x1390] ss:$8 sps:$4 sm:$0xff]  }
 0x12f   :  { %6009 = vmatpush1.bf16.msra.mxu1 %v8594_v37  ;;  %v8687_v37 = vld [vmem:[%s12625_s1 + $0x5a4] ss:$8 sps:$4 sm:$0xff]  }
 0x130   :  { %6583 = vmatpush1.bf16.msra.mxu0 %v8597_v38  ;;  %6010 = vmatprep.subr.bf16.mxu1 %v8602_v39  ;;  %v8690_v38 = vld [vmem:[%s12625_s1 + $0x13a4] ss:$8 sps:$4 sm:$0xff]   ;;  %v8685_v39 = vld [vmem:[%s12625_s1 + $0x5a0] ss:$8 sps:$4 sm:$0xff]  }
 0x131   :  { %6584 = vmatprep.subr.bf16.mxu0 %v8605_v44  ;;  %v8688_v44 = vld [vmem:[%s12625_s1 + $0x13a0] ss:$8 sps:$4 sm:$0xff]  }
 0x133   :  { %6011 = vmatpush1.bf16.msra.mxu1 %v8600_v22  ;;  %v8693_v22 = vld [vmem:[%s12625_s1 + $0x5b4] ss:$8 sps:$4 sm:$0xff]  }
 0x134   :  { %6585 = vmatpush1.bf16.msra.mxu0 %v8603_v33  ;;  %6012 = vmatprep.subr.bf16.mxu1 %v8608_v46  ;;  %v8696_v33 = vld [vmem:[%s12625_s1 + $0x13b4] ss:$8 sps:$4 sm:$0xff]   ;;  %v8691_v46 = vld [vmem:[%s12625_s1 + $0x5b0] ss:$8 sps:$4 sm:$0xff]  }
 0x135   :  { %6586 = vmatprep.subr.bf16.mxu0 %v8611_v47  ;;  %v8694_v47 = vld [vmem:[%s12625_s1 + $0x13b0] ss:$8 sps:$4 sm:$0xff]  }
 0x137   :  { %6013 = vmatpush1.bf16.msra.mxu1 %v8606_v48  ;;  %v8699_v48 = vld [vmem:[%s12625_s1 + $0x5c4] ss:$8 sps:$4 sm:$0xff]  }
 0x138   :  { %6587 = vmatpush1.bf16.msra.mxu0 %v8609_v18  ;;  %6014 = vmatprep.subr.bf16.mxu1 %v8614_v41  ;;  %v8702_v18 = vld [vmem:[%s12625_s1 + $0x13c4] ss:$8 sps:$4 sm:$0xff]   ;;  %v8697_v41 = vld [vmem:[%s12625_s1 + $0x5c0] ss:$8 sps:$4 sm:$0xff]  }
 0x139   :  { %6588 = vmatprep.subr.bf16.mxu0 %v8617_v50  ;;  %v8700_v50 = vld [vmem:[%s12625_s1 + $0x13c0] ss:$8 sps:$4 sm:$0xff]  }
 0x13b   :  { %6015 = vmatpush1.bf16.msra.mxu1 %v8612_v51  ;;  %v8705_v51 = vld [vmem:[%s12625_s1 + $0x5d4] ss:$8 sps:$4 sm:$0xff]  }
 0x13c   :  { %6589 = vmatpush1.bf16.msra.mxu0 %v8615_v53  ;;  %6016 = vmatprep.subr.bf16.mxu1 %v8620_v54  ;;  %v8708_v53 = vld [vmem:[%s12625_s1 + $0x13d4] ss:$8 sps:$4 sm:$0xff]   ;;  %v8703_v54 = vld [vmem:[%s12625_s1 + $0x5d0] ss:$8 sps:$4 sm:$0xff]  }
 0x13d   :  { %6590 = vmatprep.subr.bf16.mxu0 %v8623_v55  ;;  %v8706_v55 = vld [vmem:[%s12625_s1 + $0x13d0] ss:$8 sps:$4 sm:$0xff]  }
 0x13f   :  { %6017 = vmatpush1.bf16.msra.mxu1 %v8618_v56  ;;  %v8711_v56 = vld [vmem:[%s12625_s1 + $0x5e4] ss:$8 sps:$4 sm:$0xff]  }
 0x140   :  { %6591 = vmatpush1.bf16.msra.mxu0 %v8621_v57  ;;  %6027 = vmatprep.subr.bf16.mxu1 %v8626_v43  ;;  %v8714_v57 = vld [vmem:[%s12625_s1 + $0x13e4] ss:$8 sps:$4 sm:$0xff]  }
 0x141   :  { %6601 = vmatprep.subr.bf16.mxu0 %v8630_v59  ;;  %v10804_v43 = vld.sshfl [vmem:[%s12624_s0 + $0x28] sm:$0xff pattern:$0x75316420] }
 0x142   :  { %6019 = vmatmul.mubr.bf16.vlgmr.msra.gmra.mrb[0].mxu1 %v10621_v60  ;;  %v9493_v59 = vld [vmem:[%s12624_s0 + $0x8] sm:$0xff] }
 0x143   :  { %6593 = vmatmul.mubr.bf16.vlgmr.msra.gmra.mrb[0].mxu0 %v10625_v61  ;;  %6028 = vmatpush1.bf16.msra.mxu1 %v8624_v62  ;;  %v992_v62 = vcombine.high %v9493_v59, %v9493_v59  ;;  %v8787_v59 = vld [vmem:[%s12625_s1 + $0x6b0] ss:$8 sps:$4 sm:$0xff]  }
 0x144   :  { %6602 = vmatpush1.bf16.msra.mxu0 %v8628_v63  ;;  %6029 = vmatprep.subr.bf16.mxu1 %v8633_v45  ;;  %v8709_v63 = vld [vmem:[%s12625_s1 + $0x5e0] ss:$8 sps:$4 sm:$0xff]  }
 0x145   :  { %6603 = vmatprep.subr.bf16.mxu0 %v8636_v35  ;;  %6059 = vmatprep.mubr.bf16.mxu1 %v1039_v0  ;;  %v8712_v45 = vld [vmem:[%s12625_s1 + $0x13e0] ss:$8 sps:$4 sm:$0xff]   ;;  %v8717_v35 = vld [vmem:[%s12625_s1 + $0x5f4] ss:$8 sps:$4 sm:$0xff]  }
 0x146   :  { %6633 = vmatprep.mubr.bf16.mxu0 %v1187_v1  ;;  %v8720_v0 = vld [vmem:[%s12625_s1 + $0x13f4] ss:$8 sps:$4 sm:$0xff]   ;;  %v10822_v1 = vrot.slane %v992_v62, %v9692_v49  ;;  %v8790_v62 = vld [vmem:[%s12625_s1 + $0x14b0] ss:$8 sps:$4 sm:$0xff]  }
 0x147   :  { %6030 = vmatpush1.bf16.msra.mxu1 %v8631_v2  ;;  %v8715_v2 = vld [vmem:[%s12625_s1 + $0x5f0] ss:$8 sps:$4 sm:$0xff]  }
 0x148   :  { %6604 = vmatpush1.bf16.msra.mxu0 %v8634_v3  ;;  %6031 = vmatprep.subr.bf16.mxu1 %v8639_v58  ;;  %v8718_v3 = vld [vmem:[%s12625_s1 + $0x13f0] ss:$8 sps:$4 sm:$0xff]   ;;  %v8723_v58 = vld [vmem:[%s12625_s1 + $0x604] ss:$8 sps:$4 sm:$0xff]  }
 0x149   :  { %6605 = vmatprep.subr.bf16.mxu0 %v8642_v40  ;;  %v8726_v40 = vld [vmem:[%s12625_s1 + $0x1404] ss:$8 sps:$4 sm:$0xff]  }
 0x14b   :  { %6032 = vmatpush1.bf16.msra.mxu1 %v8637_v4  ;;  %v1008_v4 = vcombine.high %v10822_v1, %v10822_v1 }
 0x14c   :  { %6606 = vmatpush1.bf16.msra.mxu0 %v8640_v5  ;;  %6033 = vmatprep.subr.bf16.mxu1 %v8645_v6  ;;  %v1203_v5 = vcombine.high %v10804_v43, %v10804_v43  ;;  %v1037_v6 = vcombine.high %v10621_v60, %v10621_v60  ;;  %v8732_v60 = vld [vmem:[%s12625_s1 + $0x1414] ss:$8 sps:$4 sm:$0xff]  }
 0x14d   :  { %6607 = vmatprep.subr.bf16.mxu0 %v8648_v7  ;;  %v1185_v7 = vcombine.high %v10625_v61, %v10625_v61  ;;  %v10857_v61 = vrot.slane %v1008_v4, %v9692_v49  ;;  %v8807_v4 = vld [vmem:[%s12625_s1 + $0x6e4] ss:$8 sps:$4 sm:$0xff]  }
 0x14f   :  { %6034 = vmatpush1.bf16.msra.mxu1 %v8643_v8  ;;  %v8721_v8 = vld [vmem:[%s12625_s1 + $0x600] ss:$8 sps:$4 sm:$0xff]  }
 0x150   :  { %6608 = vmatpush1.bf16.msra.mxu0 %v8646_v9  ;;  %6035 = vmatprep.subr.bf16.mxu1 %v8651_v10  ;;  %v8724_v9 = vld [vmem:[%s12625_s1 + $0x1400] ss:$8 sps:$4 sm:$0xff]   ;;  %v8729_v10 = vld [vmem:[%s12625_s1 + $0x614] ss:$8 sps:$4 sm:$0xff]  }
 0x151   :  { %6609 = vmatprep.subr.bf16.mxu0 %v8654_v11  ;;  %v10860_v11 = vrot.slane %v1203_v5, %v9692_v49  ;;  %v8810_v5 = vld [vmem:[%s12625_s1 + $0x14e4] ss:$8 sps:$4 sm:$0xff]  }
 0x153   :  { %6036 = vmatpush1.bf16.msra.mxu1 %v8649_v12  ;;  %v8727_v12 = vld [vmem:[%s12625_s1 + $0x610] ss:$8 sps:$4 sm:$0xff]  }
 0x154   :  { %6610 = vmatpush1.bf16.msra.mxu0 %v8652_v13  ;;  %6037 = vmatprep.subr.bf16.mxu1 %v8657_v14  ;;  %v8730_v13 = vld [vmem:[%s12625_s1 + $0x1410] ss:$8 sps:$4 sm:$0xff]   ;;  %v8735_v14 = vld [vmem:[%s12625_s1 + $0x624] ss:$8 sps:$4 sm:$0xff]  }
 0x155   :  { %6611 = vmatprep.subr.bf16.mxu0 %v8660_v15  ;;  %v8738_v15 = vld [vmem:[%s12625_s1 + $0x1424] ss:$8 sps:$4 sm:$0xff]  }
 0x157   :  { %6038 = vmatpush1.bf16.msra.mxu1 %v8655_v16  ;;  %v8733_v16 = vld [vmem:[%s12625_s1 + $0x620] ss:$8 sps:$4 sm:$0xff]  }
 0x158   :  { %6612 = vmatpush1.bf16.msra.mxu0 %v8658_v19  ;;  %6039 = vmatprep.subr.bf16.mxu1 %v8663_v20  ;;  %v8736_v19 = vld [vmem:[%s12625_s1 + $0x1420] ss:$8 sps:$4 sm:$0xff]   ;;  %v8741_v20 = vld [vmem:[%s12625_s1 + $0x634] ss:$8 sps:$4 sm:$0xff]  }
 0x159   :  { %6613 = vmatprep.subr.bf16.mxu0 %v8666_v21  ;;  %v8744_v21 = vld [vmem:[%s12625_s1 + $0x1434] ss:$8 sps:$4 sm:$0xff]  }
 0x15b   :  { %6040 = vmatpush1.bf16.msra.mxu1 %v8661_v52  ;;  %v8739_v52 = vld [vmem:[%s12625_s1 + $0x630] ss:$8 sps:$4 sm:$0xff]  }
 0x15c   :  { %6614 = vmatpush1.bf16.msra.mxu0 %v8664_v23  ;;  %6041 = vmatprep.subr.bf16.mxu1 %v8669_v24  ;;  %v8742_v23 = vld [vmem:[%s12625_s1 + $0x1430] ss:$8 sps:$4 sm:$0xff]   ;;  %v8747_v24 = vld [vmem:[%s12625_s1 + $0x644] ss:$8 sps:$4 sm:$0xff]  }
 0x15d   :  { %6615 = vmatprep.subr.bf16.mxu0 %v8672_v25  ;;  %v8750_v25 = vld [vmem:[%s12625_s1 + $0x1444] ss:$8 sps:$4 sm:$0xff]  }
 0x15f   :  { %6042 = vmatpush1.bf16.msra.mxu1 %v8667_v26  ;;  %v8745_v26 = vld [vmem:[%s12625_s1 + $0x640] ss:$8 sps:$4 sm:$0xff]  }
 0x160   :  { %6616 = vmatpush1.bf16.msra.mxu0 %v8670_v27  ;;  %6043 = vmatprep.subr.bf16.mxu1 %v8675_v28  ;;  %v8748_v27 = vld [vmem:[%s12625_s1 + $0x1440] ss:$8 sps:$4 sm:$0xff]   ;;  %v8753_v28 = vld [vmem:[%s12625_s1 + $0x654] ss:$8 sps:$4 sm:$0xff]  }
 0x161   :  { %6617 = vmatprep.subr.bf16.mxu0 %v8678_v29  ;;  %v8756_v29 = vld [vmem:[%s12625_s1 + $0x1454] ss:$8 sps:$4 sm:$0xff]  }
 0x163   :  { %6044 = vmatpush1.bf16.msra.mxu1 %v8673_v30  ;;  %v8751_v30 = vld [vmem:[%s12625_s1 + $0x650] ss:$8 sps:$4 sm:$0xff]  }
 0x164   :  { %6618 = vmatpush1.bf16.msra.mxu0 %v8676_v31  ;;  %6045 = vmatprep.subr.bf16.mxu1 %v8681_v32  ;;  %v8754_v31 = vld [vmem:[%s12625_s1 + $0x1450] ss:$8 sps:$4 sm:$0xff]   ;;  %v8759_v32 = vld [vmem:[%s12625_s1 + $0x664] ss:$8 sps:$4 sm:$0xff]  }
 0x165   :  { %6619 = vmatprep.subr.bf16.mxu0 %v8684_v17  ;;  %v8762_v17 = vld [vmem:[%s12625_s1 + $0x1464] ss:$8 sps:$4 sm:$0xff]  }
 0x167   :  { %6046 = vmatpush1.bf16.msra.mxu1 %v8679_v34  ;;  %v8757_v34 = vld [vmem:[%s12625_s1 + $0x660] ss:$8 sps:$4 sm:$0xff]  }
 0x168   :  { %6620 = vmatpush1.bf16.msra.mxu0 %v8682_v36  ;;  %6047 = vmatprep.subr.bf16.mxu1 %v8687_v37  ;;  %v8760_v36 = vld [vmem:[%s12625_s1 + $0x1460] ss:$8 sps:$4 sm:$0xff]   ;;  %v8765_v37 = vld [vmem:[%s12625_s1 + $0x674] ss:$8 sps:$4 sm:$0xff]  }
 0x169   :  { %6621 = vmatprep.subr.bf16.mxu0 %v8690_v38  ;;  %v8768_v38 = vld [vmem:[%s12625_s1 + $0x1474] ss:$8 sps:$4 sm:$0xff]  }
 0x16b   :  { %6048 = vmatpush1.bf16.msra.mxu1 %v8685_v39  ;;  %v8763_v39 = vld [vmem:[%s12625_s1 + $0x670] ss:$8 sps:$4 sm:$0xff]  }
 0x16c   :  { %6622 = vmatpush1.bf16.msra.mxu0 %v8688_v44  ;;  %6049 = vmatprep.subr.bf16.mxu1 %v8693_v22  ;;  %v8766_v44 = vld [vmem:[%s12625_s1 + $0x1470] ss:$8 sps:$4 sm:$0xff]   ;;  %v8771_v22 = vld [vmem:[%s12625_s1 + $0x684] ss:$8 sps:$4 sm:$0xff]  }
 0x16d   :  { %6623 = vmatprep.subr.bf16.mxu0 %v8696_v33  ;;  %v8774_v33 = vld [vmem:[%s12625_s1 + $0x1484] ss:$8 sps:$4 sm:$0xff]  }
 0x16f   :  { %6050 = vmatpush1.bf16.msra.mxu1 %v8691_v46  ;;  %v8769_v46 = vld [vmem:[%s12625_s1 + $0x680] ss:$8 sps:$4 sm:$0xff]  }
 0x170   :  { %6624 = vmatpush1.bf16.msra.mxu0 %v8694_v47  ;;  %6051 = vmatprep.subr.bf16.mxu1 %v8699_v48  ;;  %v8772_v47 = vld [vmem:[%s12625_s1 + $0x1480] ss:$8 sps:$4 sm:$0xff]   ;;  %v8777_v48 = vld [vmem:[%s12625_s1 + $0x694] ss:$8 sps:$4 sm:$0xff]  }
 0x171   :  { %6625 = vmatprep.subr.bf16.mxu0 %v8702_v18  ;;  %v8780_v18 = vld [vmem:[%s12625_s1 + $0x1494] ss:$8 sps:$4 sm:$0xff]  }
 0x173   :  { %6052 = vmatpush1.bf16.msra.mxu1 %v8697_v41  ;;  %v8775_v41 = vld [vmem:[%s12625_s1 + $0x690] ss:$8 sps:$4 sm:$0xff]  }
 0x174   :  { %6626 = vmatpush1.bf16.msra.mxu0 %v8700_v50  ;;  %6053 = vmatprep.subr.bf16.mxu1 %v8705_v51  ;;  %v8778_v50 = vld [vmem:[%s12625_s1 + $0x1490] ss:$8 sps:$4 sm:$0xff]   ;;  %v8783_v51 = vld [vmem:[%s12625_s1 + $0x6a4] ss:$8 sps:$4 sm:$0xff]  }
 0x175   :  { %6627 = vmatprep.subr.bf16.mxu0 %v8708_v53  ;;  %v8786_v53 = vld [vmem:[%s12625_s1 + $0x14a4] ss:$8 sps:$4 sm:$0xff]  }
 0x177   :  { %6054 = vmatpush1.bf16.msra.mxu1 %v8703_v54  ;;  %v8781_v54 = vld [vmem:[%s12625_s1 + $0x6a0] ss:$8 sps:$4 sm:$0xff]  }
 0x178   :  { %6628 = vmatpush1.bf16.msra.mxu0 %v8706_v55  ;;  %6055 = vmatprep.subr.bf16.mxu1 %v8711_v56  ;;  %v8784_v55 = vld [vmem:[%s12625_s1 + $0x14a0] ss:$8 sps:$4 sm:$0xff]   ;;  %v8789_v56 = vld [vmem:[%s12625_s1 + $0x6b4] ss:$8 sps:$4 sm:$0xff]  }
 0x179   :  { %6629 = vmatprep.subr.bf16.mxu0 %v8714_v57  ;;  %v8792_v57 = vld [vmem:[%s12625_s1 + $0x14b4] ss:$8 sps:$4 sm:$0xff]  }
 0x17b   :  { %6056 = vmatpush1.bf16.msra.mxu1 %v8709_v63  ;;  %v8795_v63 = vld [vmem:[%s12625_s1 + $0x6c4] ss:$8 sps:$4 sm:$0xff]  }
 0x17c   :  { %6630 = vmatpush1.bf16.msra.mxu0 %v8712_v45  ;;  %6057 = vmatprep.subr.bf16.mxu1 %v8717_v35  ;;  %v8798_v45 = vld [vmem:[%s12625_s1 + $0x14c4] ss:$8 sps:$4 sm:$0xff]   ;;  %v8793_v35 = vld [vmem:[%s12625_s1 + $0x6c0] ss:$8 sps:$4 sm:$0xff]  }
 0x17d   :  { %6631 = vmatprep.subr.bf16.mxu0 %v8720_v0  ;;  %v8796_v0 = vld [vmem:[%s12625_s1 + $0x14c0] ss:$8 sps:$4 sm:$0xff]  }
 0x17f   :  { %6058 = vmatpush1.bf16.msra.mxu1 %v8715_v2  ;;  %v8801_v2 = vld [vmem:[%s12625_s1 + $0x6d4] ss:$8 sps:$4 sm:$0xff]  }
 0x180   :  { %6632 = vmatpush1.bf16.msra.mxu0 %v8718_v3  ;;  %6068 = vmatprep.subr.bf16.mxu1 %v8723_v58  ;;  %v8804_v3 = vld [vmem:[%s12625_s1 + $0x14d4] ss:$8 sps:$4 sm:$0xff]   ;;  %v8799_v58 = vld [vmem:[%s12625_s1 + $0x6d0] ss:$8 sps:$4 sm:$0xff]  }
 0x181   :  { %6642 = vmatprep.subr.bf16.mxu0 %v8726_v40  ;;  %v8802_v40 = vld [vmem:[%s12625_s1 + $0x14d0] ss:$8 sps:$4 sm:$0xff]  }
 0x182   :  { %6060 = vmatmul.mubr.bf16.vlgmr.msra.gmra.mrb[0].mxu1 %v1037_v6  ;;  %v8805_v6 = vld [vmem:[%s12625_s1 + $0x6e0] ss:$8 sps:$4 sm:$0xff]  }
 0x183   :  { %6634 = vmatmul.mubr.bf16.vlgmr.msra.gmra.mrb[0].mxu0 %v1185_v7  ;;  %6069 = vmatpush1.bf16.msra.mxu1 %v8721_v8  ;;  %v8808_v7 = vld [vmem:[%s12625_s1 + $0x14e0] ss:$8 sps:$4 sm:$0xff]   ;;  %v8813_v8 = vld [vmem:[%s12625_s1 + $0x6f4] ss:$8 sps:$4 sm:$0xff]  }
 0x184   :  { %6643 = vmatpush1.bf16.msra.mxu0 %v8724_v9  ;;  %6070 = vmatprep.subr.bf16.mxu1 %v8729_v10  ;;  %v8816_v9 = vld [vmem:[%s12625_s1 + $0x14f4] ss:$8 sps:$4 sm:$0xff]   ;;  %v8811_v10 = vld [vmem:[%s12625_s1 + $0x6f0] ss:$8 sps:$4 sm:$0xff]  }
 0x185   :  { %6644 = vmatprep.subr.bf16.mxu0 %v8732_v60  ;;  %6100 = vmatprep.mubr.bf16.mxu1 %v10857_v61  ;;  %v8814_v60 = vld [vmem:[%s12625_s1 + $0x14f0] ss:$8 sps:$4 sm:$0xff]  }
 0x186   :  { %6674 = vmatprep.mubr.bf16.mxu0 %v10860_v11 }
 0x187   :  { %6071 = vmatpush1.bf16.msra.mxu1 %v8727_v12  ;;  %v8820_v12 = vld [vmem:[%s12625_s1 + $0x704] ss:$8 sps:$4 sm:$0xff]  }
 0x188   :  { %6645 = vmatpush1.bf16.msra.mxu0 %v8730_v13  ;;  %6072 = vmatprep.subr.bf16.mxu1 %v8735_v14  ;;  %v8823_v13 = vld [vmem:[%s12625_s1 + $0x1504] ss:$8 sps:$4 sm:$0xff]   ;;  %v11046_v14 = vrot.slane %v10822_v1, %v9692_v49  ;;  %v8826_v1 = vld [vmem:[%s12625_s1 + $0x714] ss:$8 sps:$4 sm:$0xff]  }
 0x189   :  { %6646 = vmatprep.subr.bf16.mxu0 %v8738_v15  ;;  %v11050_v15 = vrot.slane %v10804_v43, %v9692_v49  ;;  %v8829_v43 = vld [vmem:[%s12625_s1 + $0x1514] ss:$8 sps:$4 sm:$0xff]  }
 0x18b   :  { %6073 = vmatpush1.bf16.msra.mxu1 %v8733_v16  ;;  %v8818_v16 = vld [vmem:[%s12625_s1 + $0x700] ss:$8 sps:$4 sm:$0xff]  }
 0x18c   :  { %6647 = vmatpush1.bf16.msra.mxu0 %v8736_v19  ;;  %6074 = vmatprep.subr.bf16.mxu1 %v8741_v20  ;;  %v8821_v19 = vld [vmem:[%s12625_s1 + $0x1500] ss:$8 sps:$4 sm:$0xff]   ;;  %v1040_v20 = vcombine.high %v10857_v61, %v10857_v61  ;;  %v8832_v61 = vld [vmem:[%s12625_s1 + $0x724] ss:$8 sps:$4 sm:$0xff]  }
 0x18d   :  { %6648 = vmatprep.subr.bf16.mxu0 %v8744_v21  ;;  %v1235_v21 = vcombine.high %v10860_v11, %v10860_v11  ;;  %v8835_v11 = vld [vmem:[%s12625_s1 + $0x1524] ss:$8 sps:$4 sm:$0xff]  }
 0x18f   :  { %6075 = vmatpush1.bf16.msra.mxu1 %v8739_v52  ;;  %v8824_v52 = vld [vmem:[%s12625_s1 + $0x710] ss:$8 sps:$4 sm:$0xff]  }
 0x190   :  { %6649 = vmatpush1.bf16.msra.mxu0 %v8742_v23  ;;  %6076 = vmatprep.subr.bf16.mxu1 %v8747_v24  ;;  %v8827_v23 = vld [vmem:[%s12625_s1 + $0x1510] ss:$8 sps:$4 sm:$0xff]   ;;  %v8830_v24 = vld [vmem:[%s12625_s1 + $0x720] ss:$8 sps:$4 sm:$0xff]  }
 0x191   :  { %6650 = vmatprep.subr.bf16.mxu0 %v8750_v25  ;;  %v8833_v25 = vld [vmem:[%s12625_s1 + $0x1520] ss:$8 sps:$4 sm:$0xff]  }
 0x193   :  { %6077 = vmatpush1.bf16.msra.mxu1 %v8745_v26  ;;  %v8838_v26 = vld [vmem:[%s12625_s1 + $0x734] ss:$8 sps:$4 sm:$0xff]  }
 0x194   :  { %6651 = vmatpush1.bf16.msra.mxu0 %v8748_v27  ;;  %6078 = vmatprep.subr.bf16.mxu1 %v8753_v28  ;;  %v8841_v27 = vld [vmem:[%s12625_s1 + $0x1534] ss:$8 sps:$4 sm:$0xff]   ;;  %v8836_v28 = vld [vmem:[%s12625_s1 + $0x730] ss:$8 sps:$4 sm:$0xff]  }
 0x195   :  { %6652 = vmatprep.subr.bf16.mxu0 %v8756_v29  ;;  %v8839_v29 = vld [vmem:[%s12625_s1 + $0x1530] ss:$8 sps:$4 sm:$0xff]  }
 0x197   :  { %6079 = vmatpush1.bf16.msra.mxu1 %v8751_v30  ;;  %v8844_v30 = vld [vmem:[%s12625_s1 + $0x744] ss:$8 sps:$4 sm:$0xff]  }
 0x198   :  { %6653 = vmatpush1.bf16.msra.mxu0 %v8754_v31  ;;  %6080 = vmatprep.subr.bf16.mxu1 %v8759_v32  ;;  %v8847_v31 = vld [vmem:[%s12625_s1 + $0x1544] ss:$8 sps:$4 sm:$0xff]   ;;  %v8842_v32 = vld [vmem:[%s12625_s1 + $0x740] ss:$8 sps:$4 sm:$0xff]  }
 0x199   :  { %6654 = vmatprep.subr.bf16.mxu0 %v8762_v17  ;;  %v8845_v17 = vld [vmem:[%s12625_s1 + $0x1540] ss:$8 sps:$4 sm:$0xff]  }
 0x19b   :  { %6081 = vmatpush1.bf16.msra.mxu1 %v8757_v34  ;;  %v8850_v34 = vld [vmem:[%s12625_s1 + $0x754] ss:$8 sps:$4 sm:$0xff]  }
 0x19c   :  { %6655 = vmatpush1.bf16.msra.mxu0 %v8760_v36  ;;  %6082 = vmatprep.subr.bf16.mxu1 %v8765_v37  ;;  %v8853_v36 = vld [vmem:[%s12625_s1 + $0x1554] ss:$8 sps:$4 sm:$0xff]   ;;  %v8848_v37 = vld [vmem:[%s12625_s1 + $0x750] ss:$8 sps:$4 sm:$0xff]  }
 0x19d   :  { %6656 = vmatprep.subr.bf16.mxu0 %v8768_v38  ;;  %v8851_v38 = vld [vmem:[%s12625_s1 + $0x1550] ss:$8 sps:$4 sm:$0xff]  }
 0x19f   :  { %6083 = vmatpush1.bf16.msra.mxu1 %v8763_v39  ;;  %v8856_v39 = vld [vmem:[%s12625_s1 + $0x764] ss:$8 sps:$4 sm:$0xff]  }
 0x1a0   :  { %6657 = vmatpush1.bf16.msra.mxu0 %v8766_v44  ;;  %6084 = vmatprep.subr.bf16.mxu1 %v8771_v22  ;;  %v8859_v44 = vld [vmem:[%s12625_s1 + $0x1564] ss:$8 sps:$4 sm:$0xff]   ;;  %v8854_v22 = vld [vmem:[%s12625_s1 + $0x760] ss:$8 sps:$4 sm:$0xff]  }
 0x1a1   :  { %6658 = vmatprep.subr.bf16.mxu0 %v8774_v33  ;;  %v8857_v33 = vld [vmem:[%s12625_s1 + $0x1560] ss:$8 sps:$4 sm:$0xff]  }
 0x1a3   :  { %6085 = vmatpush1.bf16.msra.mxu1 %v8769_v46  ;;  %v8862_v46 = vld [vmem:[%s12625_s1 + $0x774] ss:$8 sps:$4 sm:$0xff]  }
 0x1a4   :  { %6659 = vmatpush1.bf16.msra.mxu0 %v8772_v47  ;;  %6086 = vmatprep.subr.bf16.mxu1 %v8777_v48  ;;  %v8865_v47 = vld [vmem:[%s12625_s1 + $0x1574] ss:$8 sps:$4 sm:$0xff]   ;;  %v8860_v48 = vld [vmem:[%s12625_s1 + $0x770] ss:$8 sps:$4 sm:$0xff]  }
 0x1a5   :  { %6660 = vmatprep.subr.bf16.mxu0 %v8780_v18  ;;  %v8863_v18 = vld [vmem:[%s12625_s1 + $0x1570] ss:$8 sps:$4 sm:$0xff]  }
 0x1a7   :  { %6087 = vmatpush1.bf16.msra.mxu1 %v8775_v41  ;;  %v8868_v41 = vld [vmem:[%s12625_s1 + $0x784] ss:$8 sps:$4 sm:$0xff]  }
 0x1a8   :  { %6661 = vmatpush1.bf16.msra.mxu0 %v8778_v50  ;;  %6088 = vmatprep.subr.bf16.mxu1 %v8783_v51  ;;  %v8871_v50 = vld [vmem:[%s12625_s1 + $0x1584] ss:$8 sps:$4 sm:$0xff]   ;;  %v8866_v51 = vld [vmem:[%s12625_s1 + $0x780] ss:$8 sps:$4 sm:$0xff]  }
 0x1a9   :  { %6662 = vmatprep.subr.bf16.mxu0 %v8786_v53  ;;  %v8869_v53 = vld [vmem:[%s12625_s1 + $0x1580] ss:$8 sps:$4 sm:$0xff]  }
 0x1ab   :  { %6089 = vmatpush1.bf16.msra.mxu1 %v8781_v54  ;;  %v8874_v54 = vld [vmem:[%s12625_s1 + $0x794] ss:$8 sps:$4 sm:$0xff]  }
 0x1ac   :  { %6663 = vmatpush1.bf16.msra.mxu0 %v8784_v55  ;;  %6090 = vmatprep.subr.bf16.mxu1 %v8789_v56  ;;  %v8877_v55 = vld [vmem:[%s12625_s1 + $0x1594] ss:$8 sps:$4 sm:$0xff]   ;;  %v8872_v56 = vld [vmem:[%s12625_s1 + $0x790] ss:$8 sps:$4 sm:$0xff]  }
 0x1ad   :  { %6664 = vmatprep.subr.bf16.mxu0 %v8792_v57  ;;  %v8875_v57 = vld [vmem:[%s12625_s1 + $0x1590] ss:$8 sps:$4 sm:$0xff]  }
 0x1af   :  { %6091 = vmatpush1.bf16.msra.mxu1 %v8787_v59  ;;  %v8880_v59 = vld [vmem:[%s12625_s1 + $0x7a4] ss:$8 sps:$4 sm:$0xff]  }
 0x1b0   :  { %6665 = vmatpush1.bf16.msra.mxu0 %v8790_v62  ;;  %6092 = vmatprep.subr.bf16.mxu1 %v8795_v63  ;;  %v8883_v62 = vld [vmem:[%s12625_s1 + $0x15a4] ss:$8 sps:$4 sm:$0xff]   ;;  %v8878_v63 = vld [vmem:[%s12625_s1 + $0x7a0] ss:$8 sps:$4 sm:$0xff]  }
 0x1b1   :  { %6666 = vmatprep.subr.bf16.mxu0 %v8798_v45  ;;  %v8881_v45 = vld [vmem:[%s12625_s1 + $0x15a0] ss:$8 sps:$4 sm:$0xff]  }
 0x1b3   :  { %6093 = vmatpush1.bf16.msra.mxu1 %v8793_v35  ;;  %v8886_v35 = vld [vmem:[%s12625_s1 + $0x7b4] ss:$8 sps:$4 sm:$0xff]  }
 0x1b4   :  { %6667 = vmatpush1.bf16.msra.mxu0 %v8796_v0  ;;  %6094 = vmatprep.subr.bf16.mxu1 %v8801_v2  ;;  %v8889_v0 = vld [vmem:[%s12625_s1 + $0x15b4] ss:$8 sps:$4 sm:$0xff]   ;;  %v8884_v2 = vld [vmem:[%s12625_s1 + $0x7b0] ss:$8 sps:$4 sm:$0xff]  }
 0x1b5   :  { %6668 = vmatprep.subr.bf16.mxu0 %v8804_v3  ;;  %v8887_v3 = vld [vmem:[%s12625_s1 + $0x15b0] ss:$8 sps:$4 sm:$0xff]  }
 0x1b7   :  { %6095 = vmatpush1.bf16.msra.mxu1 %v8799_v58  ;;  %v8892_v58 = vld [vmem:[%s12625_s1 + $0x7c4] ss:$8 sps:$4 sm:$0xff]  }
 0x1b8   :  { %6669 = vmatpush1.bf16.msra.mxu0 %v8802_v40  ;;  %6096 = vmatprep.subr.bf16.mxu1 %v8807_v4  ;;  %v8895_v40 = vld [vmem:[%s12625_s1 + $0x15c4] ss:$8 sps:$4 sm:$0xff]   ;;  %v8890_v4 = vld [vmem:[%s12625_s1 + $0x7c0] ss:$8 sps:$4 sm:$0xff]  }
 0x1b9   :  { %6670 = vmatprep.subr.bf16.mxu0 %v8810_v5  ;;  %v8893_v5 = vld [vmem:[%s12625_s1 + $0x15c0] ss:$8 sps:$4 sm:$0xff]  }
 0x1bb   :  { %6097 = vmatpush1.bf16.msra.mxu1 %v8805_v6  ;;  %v8898_v6 = vld [vmem:[%s12625_s1 + $0x7d4] ss:$8 sps:$4 sm:$0xff]  }
 0x1bc   :  { %6671 = vmatpush1.bf16.msra.mxu0 %v8808_v7  ;;  %6098 = vmatprep.subr.bf16.mxu1 %v8813_v8  ;;  %v8901_v7 = vld [vmem:[%s12625_s1 + $0x15d4] ss:$8 sps:$4 sm:$0xff]   ;;  %v8896_v8 = vld [vmem:[%s12625_s1 + $0x7d0] ss:$8 sps:$4 sm:$0xff]  }
 0x1bd   :  { %6672 = vmatprep.subr.bf16.mxu0 %v8816_v9  ;;  %v8899_v9 = vld [vmem:[%s12625_s1 + $0x15d0] ss:$8 sps:$4 sm:$0xff]  }
 0x1bf   :  { %6099 = vmatpush1.bf16.msra.mxu1 %v8811_v10  ;;  %v8904_v10 = vld [vmem:[%s12625_s1 + $0x7e4] ss:$8 sps:$4 sm:$0xff]  }
 0x1c0   :  { %6673 = vmatpush1.bf16.msra.mxu0 %v8814_v60  ;;  %6109 = vmatprep.subr.bf16.mxu1 %v8820_v12  ;;  %v8907_v60 = vld [vmem:[%s12625_s1 + $0x15e4] ss:$8 sps:$4 sm:$0xff]   ;;  %v11229_v12 = vld [vmem:[%s12624_s0 + $0x10] sm:$0xff] }
 0x1c1   :  { %6683 = vmatprep.subr.bf16.mxu0 %v8823_v13  ;;  %v9494_v13 = vld [vmem:[%s12624_s0 + $0x28] sm:$0xff] }
 0x1c2   :  { %6101 = vmatmul.mubr.bf16.vlgmr.msra.gmra.mrb[0].mxu1 %v11046_v14 }
 0x1c3   :  { %6675 = vmatmul.mubr.bf16.vlgmr.msra.gmra.mrb[0].mxu0 %v11050_v15  ;;  %6110 = vmatpush1.bf16.msra.mxu1 %v8818_v16  ;;  %v1188_v16 = vcombine.high %v9494_v13, %v9494_v13 }
 0x1c4   :  { %6684 = vmatpush1.bf16.msra.mxu0 %v8821_v19  ;;  %6111 = vmatprep.subr.bf16.mxu1 %v8826_v1  ;;  %v8902_v19 = vld [vmem:[%s12625_s1 + $0x7e0] ss:$8 sps:$4 sm:$0xff]  }
 0x1c5   :  { %6685 = vmatprep.subr.bf16.mxu0 %v8829_v43  ;;  %6141 = vmatprep.mubr.bf16.mxu1 %v1040_v20  ;;  %v8905_v1 = vld [vmem:[%s12625_s1 + $0x15e0] ss:$8 sps:$4 sm:$0xff]   ;;  %v8910_v43 = vld [vmem:[%s12625_s1 + $0x7f4] ss:$8 sps:$4 sm:$0xff]  }
 0x1c6   :  { %6715 = vmatprep.mubr.bf16.mxu0 %v1235_v21  ;;  %v8913_v20 = vld [vmem:[%s12625_s1 + $0x15f4] ss:$8 sps:$4 sm:$0xff]   ;;  %v11248_v21 = vrot.slane %v11229_v12, %v9692_v49 }
 0x1c7   :  { %6112 = vmatpush1.bf16.msra.mxu1 %v8824_v52  ;;  %v11251_v52 = vrot.slane %v1188_v16, %v9692_v49 }
 0x1c8   :  { %6686 = vmatpush1.bf16.msra.mxu0 %v8827_v23  ;;  %6113 = vmatprep.subr.bf16.mxu1 %v8832_v61  ;;  %v8908_v23 = vld [vmem:[%s12625_s1 + $0x7f0] ss:$8 sps:$4 sm:$0xff]  }
 0x1c9   :  { %6687 = vmatprep.subr.bf16.mxu0 %v8835_v11  ;;  %v8911_v61 = vld [vmem:[%s12625_s1 + $0x15f0] ss:$8 sps:$4 sm:$0xff]   ;;  %v8916_v11 = vld [vmem:[%s12625_s1 + $0x804] ss:$8 sps:$4 sm:$0xff]  }
 0x1cb   :  { %6114 = vmatpush1.bf16.msra.mxu1 %v8830_v24  ;;  %v8919_v24 = vld [vmem:[%s12625_s1 + $0x1604] ss:$8 sps:$4 sm:$0xff]  }
 0x1cc   :  { %6688 = vmatpush1.bf16.msra.mxu0 %v8833_v25  ;;  %6115 = vmatprep.subr.bf16.mxu1 %v8838_v26  ;;  %v1056_v25 = vcombine.high %v11248_v21, %v11248_v21  ;;  %v1204_v26 = vcombine.high %v11251_v52, %v11251_v52 }
 0x1cd   :  { %6689 = vmatprep.subr.bf16.mxu0 %v8841_v27  ;;  %v1038_v27 = vcombine.high %v11046_v14, %v11046_v14  ;;  %v8925_v14 = vld [vmem:[%s12625_s1 + $0x1614] ss:$8 sps:$4 sm:$0xff]  }
 0x1cf   :  { %6116 = vmatpush1.bf16.msra.mxu1 %v8836_v28  ;;  %v1233_v28 = vcombine.high %v11050_v15, %v11050_v15  ;;  %v11286_v15 = vrot.slane %v1056_v25, %v9692_v49 }
 0x1d0   :  { %6690 = vmatpush1.bf16.msra.mxu0 %v8839_v29  ;;  %6117 = vmatprep.subr.bf16.mxu1 %v8844_v30  ;;  %v8914_v29 = vld [vmem:[%s12625_s1 + $0x800] ss:$8 sps:$4 sm:$0xff]  }
 0x1d1   :  { %6691 = vmatprep.subr.bf16.mxu0 %v8847_v31  ;;  %v8917_v30 = vld [vmem:[%s12625_s1 + $0x1600] ss:$8 sps:$4 sm:$0xff]   ;;  %v8922_v31 = vld [vmem:[%s12625_s1 + $0x814] ss:$8 sps:$4 sm:$0xff]  }
 0x1d3   :  { %6118 = vmatpush1.bf16.msra.mxu1 %v8842_v32  ;;  %v11289_v32 = vrot.slane %v1204_v26, %v9692_v49 }
 0x1d4   :  { %6692 = vmatpush1.bf16.msra.mxu0 %v8845_v17  ;;  %6119 = vmatprep.subr.bf16.mxu1 %v8850_v34 }
 0x1d5   :  { %6693 = vmatprep.subr.bf16.mxu0 %v8853_v36 }
 0x1d7   :  { %6120 = vmatpush1.bf16.msra.mxu1 %v8848_v37 }
 0x1d8   :  { %6694 = vmatpush1.bf16.msra.mxu0 %v8851_v38  ;;  %6121 = vmatprep.subr.bf16.mxu1 %v8856_v39 }
 0x1d9   :  { %6695 = vmatprep.subr.bf16.mxu0 %v8859_v44 }
 0x1db   :  { %6122 = vmatpush1.bf16.msra.mxu1 %v8854_v22 }
 0x1dc   :  { %6696 = vmatpush1.bf16.msra.mxu0 %v8857_v33  ;;  %6123 = vmatprep.subr.bf16.mxu1 %v8862_v46 }
 0x1dd   :  { %6697 = vmatprep.subr.bf16.mxu0 %v8865_v47 }
 0x1df   :  { %6124 = vmatpush1.bf16.msra.mxu1 %v8860_v48 }
 0x1e0   :  { %6698 = vmatpush1.bf16.msra.mxu0 %v8863_v18  ;;  %6125 = vmatprep.subr.bf16.mxu1 %v8868_v41 }
 0x1e1   :  { %6699 = vmatprep.subr.bf16.mxu0 %v8871_v50 }
 0x1e3   :  { %6126 = vmatpush1.bf16.msra.mxu1 %v8866_v51 }
 0x1e4   :  { %6700 = vmatpush1.bf16.msra.mxu0 %v8869_v53  ;;  %6127 = vmatprep.subr.bf16.mxu1 %v8874_v54 }
 0x1e5   :  { %6701 = vmatprep.subr.bf16.mxu0 %v8877_v55 }
 0x1e7   :  { %6128 = vmatpush1.bf16.msra.mxu1 %v8872_v56 }
 0x1e8   :  { %6702 = vmatpush1.bf16.msra.mxu0 %v8875_v57  ;;  %6129 = vmatprep.subr.bf16.mxu1 %v8880_v59 }
 0x1e9   :  { %6703 = vmatprep.subr.bf16.mxu0 %v8883_v62 }
 0x1eb   :  { %6130 = vmatpush1.bf16.msra.mxu1 %v8878_v63 }
 0x1ec   :  { %6704 = vmatpush1.bf16.msra.mxu0 %v8881_v45  ;;  %6131 = vmatprep.subr.bf16.mxu1 %v8886_v35 }
 0x1ed   :  { %6705 = vmatprep.subr.bf16.mxu0 %v8889_v0 }
 0x1ef   :  { %6132 = vmatpush1.bf16.msra.mxu1 %v8884_v2 }
 0x1f0   :  { %6706 = vmatpush1.bf16.msra.mxu0 %v8887_v3  ;;  %6133 = vmatprep.subr.bf16.mxu1 %v8892_v58 }
 0x1f1   :  { %6707 = vmatprep.subr.bf16.mxu0 %v8895_v40 }
 0x1f3   :  { %6134 = vmatpush1.bf16.msra.mxu1 %v8890_v4 }
 0x1f4   :  { %6708 = vmatpush1.bf16.msra.mxu0 %v8893_v5  ;;  %6135 = vmatprep.subr.bf16.mxu1 %v8898_v6 }
 0x1f5   :  { %6709 = vmatprep.subr.bf16.mxu0 %v8901_v7 }
 0x1f7   :  { %6136 = vmatpush1.bf16.msra.mxu1 %v8896_v8 }
 0x1f8   :  { %6710 = vmatpush1.bf16.msra.mxu0 %v8899_v9  ;;  %6137 = vmatprep.subr.bf16.mxu1 %v8904_v10 }
 0x1f9   :  { %6711 = vmatprep.subr.bf16.mxu0 %v8907_v60 }
 0x1fb   :  { %6138 = vmatpush1.bf16.msra.mxu1 %v8902_v19 }
 0x1fc   :  { %6712 = vmatpush1.bf16.msra.mxu0 %v8905_v1  ;;  %6139 = vmatprep.subr.bf16.mxu1 %v8910_v43 }
 0x1fd   :  { %6713 = vmatprep.subr.bf16.mxu0 %v8913_v20 }
 0x1ff   :  { %6140 = vmatpush1.bf16.msra.mxu1 %v8908_v23 }
 0x200   :  { %6714 = vmatpush1.bf16.msra.mxu0 %v8911_v61  ;;  %6150 = vmatprep.subr.bf16.mxu1 %v8916_v11 }
 0x201   :  { %6724 = vmatprep.subr.bf16.mxu0 %v8919_v24 }
 0x202   :  { %6142 = vmatmul.mubr.bf16.vlgmr.msra.gmra.mrb[0].mxu1 %v1038_v27 }
 0x203   :  { %6716 = vmatmul.mubr.bf16.vlgmr.msra.gmra.mrb[0].mxu0 %v1233_v28 }
 0x204   :  { %10 = vsyncpa [#allocation3], 0  ;;  %6151 = vmatpush1.bf16.msra.mxu1 %v8914_v29  ;;  %6725 = vmatpush1.bf16.msra.mxu0 %v8917_v30  ;;  %v8920_v17 = vld [vmem:[%s12625_s1 + $0x810] ss:$8 sps:$4 sm:$0xff]   ;;  %v8928_v36 = vld [vmem:[%s12625_s1 + $0x824] ss:$8 sps:$4 sm:$0xff]  }
 0x205   :  { %v8923_v34 = vld [vmem:[%s12625_s1 + $0x1610] ss:$8 sps:$4 sm:$0xff]   ;;  %6152 = vmatprep.subr.bf16.mxu1 %v8922_v31  ;;  %6726 = vmatprep.subr.bf16.mxu0 %v8925_v14  ;;  %v8931_v37 = vld [vmem:[%s12625_s1 + $0x1624] ss:$8 sps:$4 sm:$0xff]   ;;  %v8926_v38 = vld [vmem:[%s12625_s1 + $0x820] ss:$8 sps:$4 sm:$0xff]  }
 0x206   :  { %6182 = vmatprep.mubr.bf16.mxu1 %v11286_v15  ;;  %6756 = vmatprep.mubr.bf16.mxu0 %v11289_v32  ;;  %v8929_v39 = vld [vmem:[%s12625_s1 + $0x1620] ss:$8 sps:$4 sm:$0xff]   ;;  %v8934_v44 = vld [vmem:[%s12625_s1 + $0x834] ss:$8 sps:$4 sm:$0xff]   ;;  %v8932_v33 = vld [vmem:[%s12625_s1 + $0x830] ss:$8 sps:$4 sm:$0xff]  }
 0x207   :  { %v8937_v22 = vld [vmem:[%s12625_s1 + $0x1634] ss:$8 sps:$4 sm:$0xff]   ;;  %v8935_v46 = vld [vmem:[%s12625_s1 + $0x1630] ss:$8 sps:$4 sm:$0xff]   ;;  %v8940_v47 = vld [vmem:[%s12625_s1 + $0x844] ss:$8 sps:$4 sm:$0xff]  }
 0x208   :  { %6153 = vmatpush1.bf16.msra.mxu1 %v8920_v17  ;;  %6727 = vmatpush1.bf16.msra.mxu0 %v8923_v34  ;;  %v8943_v48 = vld [vmem:[%s12625_s1 + $0x1644] ss:$8 sps:$4 sm:$0xff]   ;;  %v8938_v18 = vld [vmem:[%s12625_s1 + $0x840] ss:$8 sps:$4 sm:$0xff]   ;;  %v8946_v50 = vld [vmem:[%s12625_s1 + $0x854] ss:$8 sps:$4 sm:$0xff]  }
 0x209   :  { %6154 = vmatprep.subr.bf16.mxu1 %v8928_v36  ;;  %6728 = vmatprep.subr.bf16.mxu0 %v8931_v37  ;;  %v8941_v41 = vld [vmem:[%s12625_s1 + $0x1640] ss:$8 sps:$4 sm:$0xff]   ;;  %v8949_v51 = vld [vmem:[%s12625_s1 + $0x1654] ss:$8 sps:$4 sm:$0xff]   ;;  %v8944_v53 = vld [vmem:[%s12625_s1 + $0x850] ss:$8 sps:$4 sm:$0xff]   ;;  %v11475_v37 = vrot.slane %v11248_v21, %v9692_v49 }
 0x20a   :  { %v8947_v54 = vld [vmem:[%s12625_s1 + $0x1650] ss:$8 sps:$4 sm:$0xff]   ;;  %v8952_v55 = vld [vmem:[%s12625_s1 + $0x864] ss:$8 sps:$4 sm:$0xff]   ;;  %v8950_v57 = vld [vmem:[%s12625_s1 + $0x860] ss:$8 sps:$4 sm:$0xff]  }
 0x20b   :  { %v8955_v56 = vld [vmem:[%s12625_s1 + $0x1664] ss:$8 sps:$4 sm:$0xff]   ;;  %v8953_v59 = vld [vmem:[%s12625_s1 + $0x1660] ss:$8 sps:$4 sm:$0xff]   ;;  %v8958_v62 = vld [vmem:[%s12625_s1 + $0x874] ss:$8 sps:$4 sm:$0xff]  }
 0x20c   :  { %6155 = vmatpush1.bf16.msra.mxu1 %v8926_v38  ;;  %6729 = vmatpush1.bf16.msra.mxu0 %v8929_v39  ;;  %v8961_v63 = vld [vmem:[%s12625_s1 + $0x1674] ss:$8 sps:$4 sm:$0xff]   ;;  %v8956_v45 = vld [vmem:[%s12625_s1 + $0x870] ss:$8 sps:$4 sm:$0xff]   ;;  %v8964_v0 = vld [vmem:[%s12625_s1 + $0x884] ss:$8 sps:$4 sm:$0xff]   ;;  %v11479_v38 = vrot.slane %v11251_v52, %v9692_v49 }
 0x20d   :  { %6156 = vmatprep.subr.bf16.mxu1 %v8934_v44  ;;  %6730 = vmatprep.subr.bf16.mxu0 %v8937_v22  ;;  %v8959_v35 = vld [vmem:[%s12625_s1 + $0x1670] ss:$8 sps:$4 sm:$0xff]   ;;  %v8967_v2 = vld [vmem:[%s12625_s1 + $0x1684] ss:$8 sps:$4 sm:$0xff]   ;;  %v8962_v3 = vld [vmem:[%s12625_s1 + $0x880] ss:$8 sps:$4 sm:$0xff]   ;;  %v1088_v22 = vcombine.high %v11286_v15, %v11286_v15 }
 0x20e   :  { %v8965_v58 = vld [vmem:[%s12625_s1 + $0x1680] ss:$8 sps:$4 sm:$0xff]   ;;  %v8970_v40 = vld [vmem:[%s12625_s1 + $0x894] ss:$8 sps:$4 sm:$0xff]   ;;  %v8968_v5 = vld [vmem:[%s12625_s1 + $0x890] ss:$8 sps:$4 sm:$0xff]  }
 0x20f   :  { %v8973_v4 = vld [vmem:[%s12625_s1 + $0x1694] ss:$8 sps:$4 sm:$0xff]   ;;  %v8971_v6 = vld [vmem:[%s12625_s1 + $0x1690] ss:$8 sps:$4 sm:$0xff]   ;;  %v8976_v7 = vld [vmem:[%s12625_s1 + $0x8a4] ss:$8 sps:$4 sm:$0xff]  }
 0x210   :  { %6157 = vmatpush1.bf16.msra.mxu1 %v8932_v33  ;;  %6731 = vmatpush1.bf16.msra.mxu0 %v8935_v46  ;;  %v8979_v8 = vld [vmem:[%s12625_s1 + $0x16a4] ss:$8 sps:$4 sm:$0xff]   ;;  %v8974_v9 = vld [vmem:[%s12625_s1 + $0x8a0] ss:$8 sps:$4 sm:$0xff]   ;;  %v8982_v60 = vld [vmem:[%s12625_s1 + $0x8b4] ss:$8 sps:$4 sm:$0xff]   ;;  %v1236_v33 = vcombine.high %v11289_v32, %v11289_v32 }
 0x211   :  { %6158 = vmatprep.subr.bf16.mxu1 %v8940_v47  ;;  %6732 = vmatprep.subr.bf16.mxu0 %v8943_v48  ;;  %v8977_v10 = vld [vmem:[%s12625_s1 + $0x16a0] ss:$8 sps:$4 sm:$0xff]   ;;  %v8985_v13 = vld [vmem:[%s12625_s1 + $0x16b4] ss:$8 sps:$4 sm:$0xff]   ;;  %v8980_v16 = vld [vmem:[%s12625_s1 + $0x8b0] ss:$8 sps:$4 sm:$0xff]  }
 0x212   :  { %v8983_v19 = vld [vmem:[%s12625_s1 + $0x16b0] ss:$8 sps:$4 sm:$0xff]   ;;  %v8988_v1 = vld [vmem:[%s12625_s1 + $0x8c4] ss:$8 sps:$4 sm:$0xff]   ;;  %v8986_v20 = vld [vmem:[%s12625_s1 + $0x8c0] ss:$8 sps:$4 sm:$0xff]  }
 0x213   :  { %v8991_v43 = vld [vmem:[%s12625_s1 + $0x16c4] ss:$8 sps:$4 sm:$0xff]   ;;  %v8989_v23 = vld [vmem:[%s12625_s1 + $0x16c0] ss:$8 sps:$4 sm:$0xff]   ;;  %v8994_v61 = vld [vmem:[%s12625_s1 + $0x8d4] ss:$8 sps:$4 sm:$0xff]  }
 0x214   :  { %6159 = vmatpush1.bf16.msra.mxu1 %v8938_v18  ;;  %6733 = vmatpush1.bf16.msra.mxu0 %v8941_v41  ;;  %v8997_v11 = vld [vmem:[%s12625_s1 + $0x16d4] ss:$8 sps:$4 sm:$0xff]   ;;  %v8992_v24 = vld [vmem:[%s12625_s1 + $0x8d0] ss:$8 sps:$4 sm:$0xff]   ;;  %v9000_v26 = vld [vmem:[%s12625_s1 + $0x8e4] ss:$8 sps:$4 sm:$0xff]  }
 0x215   :  { %6160 = vmatprep.subr.bf16.mxu1 %v8946_v50  ;;  %6734 = vmatprep.subr.bf16.mxu0 %v8949_v51  ;;  %v8995_v25 = vld [vmem:[%s12625_s1 + $0x16d0] ss:$8 sps:$4 sm:$0xff]   ;;  %v9003_v27 = vld [vmem:[%s12625_s1 + $0x16e4] ss:$8 sps:$4 sm:$0xff]   ;;  %v8998_v28 = vld [vmem:[%s12625_s1 + $0x8e0] ss:$8 sps:$4 sm:$0xff]  }
 0x216   :  { %v9001_v29 = vld [vmem:[%s12625_s1 + $0x16e0] ss:$8 sps:$4 sm:$0xff]   ;;  %v9006_v30 = vld [vmem:[%s12625_s1 + $0x8f4] ss:$8 sps:$4 sm:$0xff]   ;;  %v9004_v14 = vld [vmem:[%s12625_s1 + $0x8f0] ss:$8 sps:$4 sm:$0xff]  }
 0x217   :  { %v9009_v31 = vld [vmem:[%s12625_s1 + $0x16f4] ss:$8 sps:$4 sm:$0xff]   ;;  %v9007_v17 = vld [vmem:[%s12625_s1 + $0x16f0] ss:$8 sps:$4 sm:$0xff]   ;;  %v9012_v34 = vld [vmem:[%s12625_s1 + $0x904] ss:$8 sps:$4 sm:$0xff]  }
 0x218   :  { %6161 = vmatpush1.bf16.msra.mxu1 %v8944_v53  ;;  %6735 = vmatpush1.bf16.msra.mxu0 %v8947_v54  ;;  %v9016_v36 = vld [vmem:[%s12625_s1 + $0x1704] ss:$8 sps:$4 sm:$0xff]   ;;  %v9010_v39 = vld [vmem:[%s12625_s1 + $0x900] ss:$8 sps:$4 sm:$0xff]   ;;  %v9019_v21 = vld [vmem:[%s12625_s1 + $0x914] ss:$8 sps:$4 sm:$0xff]  }
 0x219   :  { %6162 = vmatprep.subr.bf16.mxu1 %v8952_v55  ;;  %6736 = vmatprep.subr.bf16.mxu0 %v8955_v56  ;;  %v9014_v44 = vld [vmem:[%s12625_s1 + $0x1700] ss:$8 sps:$4 sm:$0xff]   ;;  %v9022_v52 = vld [vmem:[%s12625_s1 + $0x1714] ss:$8 sps:$4 sm:$0xff]   ;;  %v9017_v46 = vld [vmem:[%s12625_s1 + $0x910] ss:$8 sps:$4 sm:$0xff]  }
 0x21a   :  { %v9020_v47 = vld [vmem:[%s12625_s1 + $0x1710] ss:$8 sps:$4 sm:$0xff]   ;;  %v9025_v15 = vld [vmem:[%s12625_s1 + $0x924] ss:$8 sps:$4 sm:$0xff]   ;;  %v9023_v48 = vld [vmem:[%s12625_s1 + $0x920] ss:$8 sps:$4 sm:$0xff]  }
 0x21b   :  { %v9028_v32 = vld [vmem:[%s12625_s1 + $0x1724] ss:$8 sps:$4 sm:$0xff]   ;;  %v9026_v18 = vld [vmem:[%s12625_s1 + $0x1720] ss:$8 sps:$4 sm:$0xff]   ;;  %v9031_v41 = vld [vmem:[%s12625_s1 + $0x934] ss:$8 sps:$4 sm:$0xff]  }
 0x21c   :  { %6163 = vmatpush1.bf16.msra.mxu1 %v8950_v57  ;;  %6737 = vmatpush1.bf16.msra.mxu0 %v8953_v59  ;;  %v9034_v50 = vld [vmem:[%s12625_s1 + $0x1734] ss:$8 sps:$4 sm:$0xff]   ;;  %v9029_v51 = vld [vmem:[%s12625_s1 + $0x930] ss:$8 sps:$4 sm:$0xff]   ;;  %v9037_v54 = vld [vmem:[%s12625_s1 + $0x944] ss:$8 sps:$4 sm:$0xff]  }
 0x21d   :  { %6164 = vmatprep.subr.bf16.mxu1 %v8958_v62  ;;  %6738 = vmatprep.subr.bf16.mxu0 %v8961_v63  ;;  %v9032_v53 = vld [vmem:[%s12625_s1 + $0x1730] ss:$8 sps:$4 sm:$0xff]   ;;  %v9040_v55 = vld [vmem:[%s12625_s1 + $0x1744] ss:$8 sps:$4 sm:$0xff]   ;;  %v9035_v56 = vld [vmem:[%s12625_s1 + $0x940] ss:$8 sps:$4 sm:$0xff]  }
 0x21e   :  { %v9038_v57 = vld [vmem:[%s12625_s1 + $0x1740] ss:$8 sps:$4 sm:$0xff]   ;;  %v9043_v59 = vld [vmem:[%s12625_s1 + $0x954] ss:$8 sps:$4 sm:$0xff]   ;;  %v9041_v63 = vld [vmem:[%s12625_s1 + $0x950] ss:$8 sps:$4 sm:$0xff]  }
 0x21f   :  { %v9046_v62 = vld [vmem:[%s12625_s1 + $0x1754] ss:$8 sps:$4 sm:$0xff]   ;;  %vm7006_vm0 = vcmask 588800   ;;  %s9526_s18 = smov [#allocation2]   ;;  %vm7080_vm1 = vcmask 33792  }
 0x220   :  { %6165 = vmatpush1.bf16.msra.mxu1 %v8956_v45  ;;  %6739 = vmatpush1.bf16.msra.mxu0 %v8959_v35  ;;  %v9044_v45 = vld [vmem:[%s12625_s1 + $0x1750] ss:$8 sps:$4 sm:$0xff]   ;;  %v9049_v35 = vld [vmem:[%s12625_s1 + $0x964] ss:$8 sps:$4 sm:$0xff]   ;;  %s7088_s19 = sshll.u32 %s9526_s18, 4  ;;  %s7089_s19 = int_to_ptr.vmem [resolvable:$true] %s7088_s19 }
 0x221   :  { %6166 = vmatprep.subr.bf16.mxu1 %v8964_v0  ;;  %6740 = vmatprep.subr.bf16.mxu0 %v8967_v2  ;;  %v9052_v0 = vld [vmem:[%s12625_s1 + $0x1764] ss:$8 sps:$4 sm:$0xff]   ;;  %v9047_v2 = vld [vmem:[%s12625_s1 + $0x960] ss:$8 sps:$4 sm:$0xff]   ;;  %s9499_s20 = scalar_lea.vmem %s7089_s19, 32  ;;  %p9504_p1 = scmp.lt.s32.totalorder %s7089_s19, %s7089_s19 }
 0x222   :  { %p9500_p0 = scmp.ne.s32.totalorder %s7089_s19, %s9499_s20  ;;  %p9505_p2 = scmp.lt.s32.totalorder %s9499_s20, %s9499_s20 }
 0x224   :  { %6167 = vmatpush1.bf16.msra.mxu1 %v8962_v3  ;;  %6741 = vmatpush1.bf16.msra.mxu0 %v8965_v58  ;;  %v9050_v3 = vld [vmem:[%s12625_s1 + $0x1760] ss:$8 sps:$4 sm:$0xff]   ;;  %v9055_v58 = vld [vmem:[%s12625_s1 + $0x974] ss:$8 sps:$4 sm:$0xff]   ;;  %p9506_p3 = por %p9505_p2, %p9504_p1 }
 0x225   :  { %6168 = vmatprep.subr.bf16.mxu1 %v8970_v40  ;;  %6742 = vmatprep.subr.bf16.mxu0 %v8973_v4  ;;  %v9058_v40 = vld [vmem:[%s12625_s1 + $0x1774] ss:$8 sps:$4 sm:$0xff]   ;;  %v9053_v4 = vld [vmem:[%s12625_s1 + $0x970] ss:$8 sps:$4 sm:$0xff]  }
 0x226   :  { %p9507_p4 = pnand %p9506_p3, %p9500_p0 }
 0x228   :  { %6169 = vmatpush1.bf16.msra.mxu1 %v8968_v5  ;;  %6743 = vmatpush1.bf16.msra.mxu0 %v8971_v6  ;;  %v9056_v5 = vld [vmem:[%s12625_s1 + $0x1770] ss:$8 sps:$4 sm:$0xff]   ;;  %v9061_v6 = vld [vmem:[%s12625_s1 + $0x984] ss:$8 sps:$4 sm:$0xff]  }
 0x229   :  { %6170 = vmatprep.subr.bf16.mxu1 %v8976_v7  ;;  %6744 = vmatprep.subr.bf16.mxu0 %v8979_v8  ;;  %v9064_v7 = vld [vmem:[%s12625_s1 + $0x1784] ss:$8 sps:$4 sm:$0xff]   ;;  %v9059_v8 = vld [vmem:[%s12625_s1 + $0x980] ss:$8 sps:$4 sm:$0xff]  }
 0x22c   :  { %6171 = vmatpush1.bf16.msra.mxu1 %v8974_v9  ;;  %6745 = vmatpush1.bf16.msra.mxu0 %v8977_v10  ;;  %v9062_v9 = vld [vmem:[%s12625_s1 + $0x1780] ss:$8 sps:$4 sm:$0xff]   ;;  %v9067_v10 = vld [vmem:[%s12625_s1 + $0x994] ss:$8 sps:$4 sm:$0xff]  }
 0x22d   :  { %6172 = vmatprep.subr.bf16.mxu1 %v8982_v60  ;;  %6746 = vmatprep.subr.bf16.mxu0 %v8985_v13  ;;  %v9070_v60 = vld [vmem:[%s12625_s1 + $0x1794] ss:$8 sps:$4 sm:$0xff]   ;;  %v9065_v13 = vld [vmem:[%s12625_s1 + $0x990] ss:$8 sps:$4 sm:$0xff]  }
 0x230   :  { %6173 = vmatpush1.bf16.msra.mxu1 %v8980_v16  ;;  %6747 = vmatpush1.bf16.msra.mxu0 %v8983_v19  ;;  %v9068_v16 = vld [vmem:[%s12625_s1 + $0x1790] ss:$8 sps:$4 sm:$0xff]   ;;  %v9073_v19 = vld [vmem:[%s12625_s1 + $0x9a4] ss:$8 sps:$4 sm:$0xff]  }
 0x231   :  { %6174 = vmatprep.subr.bf16.mxu1 %v8988_v1  ;;  %6748 = vmatprep.subr.bf16.mxu0 %v8991_v43  ;;  %v9076_v1 = vld [vmem:[%s12625_s1 + $0x17a4] ss:$8 sps:$4 sm:$0xff]   ;;  %v9071_v43 = vld [vmem:[%s12625_s1 + $0x9a0] ss:$8 sps:$4 sm:$0xff]  }
 0x234   :  { %6175 = vmatpush1.bf16.msra.mxu1 %v8986_v20  ;;  %6749 = vmatpush1.bf16.msra.mxu0 %v8989_v23  ;;  %v9074_v20 = vld [vmem:[%s12625_s1 + $0x17a0] ss:$8 sps:$4 sm:$0xff]   ;;  %v9079_v23 = vld [vmem:[%s12625_s1 + $0x9b4] ss:$8 sps:$4 sm:$0xff]  }
 0x235   :  { %6176 = vmatprep.subr.bf16.mxu1 %v8994_v61  ;;  %6750 = vmatprep.subr.bf16.mxu0 %v8997_v11  ;;  %v9082_v61 = vld [vmem:[%s12625_s1 + $0x17b4] ss:$8 sps:$4 sm:$0xff]   ;;  %v9077_v11 = vld [vmem:[%s12625_s1 + $0x9b0] ss:$8 sps:$4 sm:$0xff]  }
 0x238   :  { %6177 = vmatpush1.bf16.msra.mxu1 %v8992_v24  ;;  %6751 = vmatpush1.bf16.msra.mxu0 %v8995_v25  ;;  %v9080_v24 = vld [vmem:[%s12625_s1 + $0x17b0] ss:$8 sps:$4 sm:$0xff]   ;;  %v9085_v25 = vld [vmem:[%s12625_s1 + $0x9c4] ss:$8 sps:$4 sm:$0xff]  }
 0x239   :  { %6178 = vmatprep.subr.bf16.mxu1 %v9000_v26  ;;  %6752 = vmatprep.subr.bf16.mxu0 %v9003_v27  ;;  %v9088_v26 = vld [vmem:[%s12625_s1 + $0x17c4] ss:$8 sps:$4 sm:$0xff]   ;;  %v9083_v27 = vld [vmem:[%s12625_s1 + $0x9c0] ss:$8 sps:$4 sm:$0xff]  }
 0x23c   :  { %6179 = vmatpush1.bf16.msra.mxu1 %v8998_v28  ;;  %6753 = vmatpush1.bf16.msra.mxu0 %v9001_v29  ;;  %v9086_v28 = vld [vmem:[%s12625_s1 + $0x17c0] ss:$8 sps:$4 sm:$0xff]   ;;  %v9091_v29 = vld [vmem:[%s12625_s1 + $0x9d4] ss:$8 sps:$4 sm:$0xff]  }
 0x23d   :  { %6180 = vmatprep.subr.bf16.mxu1 %v9006_v30  ;;  %6754 = vmatprep.subr.bf16.mxu0 %v9009_v31  ;;  %v9094_v30 = vld [vmem:[%s12625_s1 + $0x17d4] ss:$8 sps:$4 sm:$0xff]   ;;  %v9089_v31 = vld [vmem:[%s12625_s1 + $0x9d0] ss:$8 sps:$4 sm:$0xff]  }
 0x240   :  { %6181 = vmatpush1.bf16.msra.mxu1 %v9004_v14  ;;  %6755 = vmatpush1.bf16.msra.mxu0 %v9007_v17  ;;  %v9092_v14 = vld [vmem:[%s12625_s1 + $0x17d0] ss:$8 sps:$4 sm:$0xff]   ;;  %v9097_v17 = vld [vmem:[%s12625_s1 + $0x9e4] ss:$8 sps:$4 sm:$0xff]  }
 0x241   :  { %6191 = vmatprep.subr.bf16.mxu1 %v9012_v34  ;;  %6765 = vmatprep.subr.bf16.mxu0 %v9016_v36  ;;  %v9100_v34 = vld [vmem:[%s12625_s1 + $0x17e4] ss:$8 sps:$4 sm:$0xff]   ;;  %v1041_v36 = vcombine.high %v11229_v12, %v11229_v12  ;;  %v9103_v12 = vld [vmem:[%s12625_s1 + $0x9f4] ss:$8 sps:$4 sm:$0xff]  }
 0x243   :  { %6183 = vmatmul.mubr.bf16.vlgmr.msra.gmra.mrb[0].mxu1 %v11475_v37  ;;  %6757 = vmatmul.mubr.bf16.vlgmr.msra.gmra.mrb[0].mxu0 %v11479_v38 }
 0x244   :  { %6192 = vmatpush1.bf16.msra.mxu1 %v9010_v39  ;;  %6766 = vmatpush1.bf16.msra.mxu0 %v9014_v44  ;;  %v11660_v39 = vld [vmem:[%s12624_s0 + $0x30] sm:$0xff]  ;;  %v9095_v44 = vld [vmem:[%s12625_s1 + $0x9e0] ss:$8 sps:$4 sm:$0xff]  }
 0x245   :  { %6193 = vmatprep.subr.bf16.mxu1 %v9019_v21  ;;  %6767 = vmatprep.subr.bf16.mxu0 %v9022_v52  ;;  %v9098_v21 = vld [vmem:[%s12625_s1 + $0x17e0] ss:$8 sps:$4 sm:$0xff]   ;;  %v9106_v52 = vld [vmem:[%s12625_s1 + $0x17f4] ss:$8 sps:$4 sm:$0xff]  }
 0x246   :  { %6223 = vmatprep.mubr.bf16.mxu1 %v1088_v22  ;;  %6797 = vmatprep.mubr.bf16.mxu0 %v1236_v33  ;;  %v11675_v22 = vrot.slane %v1041_v36, %v9692_v49  ;;  %v11679_v33 = vrot.slane %v11660_v39, %v9692_v49  ;;  %v9173_v36 = vld [vmem:[%s12625_s1 + $0xab0] ss:$8 sps:$4 sm:$0xff]  }
 0x248   :  { %6194 = vmatpush1.bf16.msra.mxu1 %v9017_v46  ;;  %6768 = vmatpush1.bf16.msra.mxu0 %v9020_v47  ;;  %v9101_v46 = vld [vmem:[%s12625_s1 + $0x9f0] ss:$8 sps:$4 sm:$0xff]  }
 0x249   :  { %6195 = vmatprep.subr.bf16.mxu1 %v9025_v15  ;;  %6769 = vmatprep.subr.bf16.mxu0 %v9028_v32  ;;  %v9104_v47 = vld [vmem:[%s12625_s1 + $0x17f0] ss:$8 sps:$4 sm:$0xff]   ;;  %v9109_v15 = vld [vmem:[%s12625_s1 + $0xa04] ss:$8 sps:$4 sm:$0xff]  }
 0x24a   :  { %v9112_v32 = vld [vmem:[%s12625_s1 + $0x1804] ss:$8 sps:$4 sm:$0xff]  }
 0x24c   :  { %6196 = vmatpush1.bf16.msra.mxu1 %v9023_v48  ;;  %6770 = vmatpush1.bf16.msra.mxu0 %v9026_v18  ;;  %v1057_v48 = vcombine.high %v11675_v22, %v11675_v22  ;;  %v1252_v18 = vcombine.high %v11679_v33, %v11679_v33 }
 0x24d   :  { %6197 = vmatprep.subr.bf16.mxu1 %v9031_v41  ;;  %6771 = vmatprep.subr.bf16.mxu0 %v9034_v50  ;;  %v1086_v41 = vcombine.high %v11475_v37, %v11475_v37  ;;  %v1234_v50 = vcombine.high %v11479_v38, %v11479_v38  ;;  %v9118_v37 = vld [vmem:[%s12625_s1 + $0x1814] ss:$8 sps:$4 sm:$0xff]  }
 0x24e   :  { %v11714_v38 = vrot.slane %v1057_v48, %v9692_v49  ;;  %v9188_v48 = vld [vmem:[%s12625_s1 + $0x18d0] ss:$8 sps:$4 sm:$0xff]  }
 0x250   :  { %6198 = vmatpush1.bf16.msra.mxu1 %v9029_v51  ;;  %6772 = vmatpush1.bf16.msra.mxu0 %v9032_v53  ;;  %v9107_v51 = vld [vmem:[%s12625_s1 + $0xa00] ss:$8 sps:$4 sm:$0xff]  }
 0x251   :  { %6199 = vmatprep.subr.bf16.mxu1 %v9037_v54  ;;  %6773 = vmatprep.subr.bf16.mxu0 %v9040_v55  ;;  %v9110_v53 = vld [vmem:[%s12625_s1 + $0x1800] ss:$8 sps:$4 sm:$0xff]   ;;  %v9115_v54 = vld [vmem:[%s12625_s1 + $0xa14] ss:$8 sps:$4 sm:$0xff]   ;;  %v11717_v55 = vrot.slane %v1252_v18, %v9692_v49  ;;  %v9193_v18 = vld [vmem:[%s12625_s1 + $0xae4] ss:$8 sps:$4 sm:$0xff]  }
 0x254   :  { %6200 = vmatpush1.bf16.msra.mxu1 %v9035_v56  ;;  %6774 = vmatpush1.bf16.msra.mxu0 %v9038_v57  ;;  %v9113_v56 = vld [vmem:[%s12625_s1 + $0xa10] ss:$8 sps:$4 sm:$0xff]  }
 0x255   :  { %6201 = vmatprep.subr.bf16.mxu1 %v9043_v59  ;;  %6775 = vmatprep.subr.bf16.mxu0 %v9046_v62  ;;  %v9116_v57 = vld [vmem:[%s12625_s1 + $0x1810] ss:$8 sps:$4 sm:$0xff]   ;;  %v9121_v59 = vld [vmem:[%s12625_s1 + $0xa24] ss:$8 sps:$4 sm:$0xff]  }
 0x256   :  { %v9124_v62 = vld [vmem:[%s12625_s1 + $0x1824] ss:$8 sps:$4 sm:$0xff]  }
 0x258   :  { %6202 = vmatpush1.bf16.msra.mxu1 %v9041_v63  ;;  %6776 = vmatpush1.bf16.msra.mxu0 %v9044_v45  ;;  %v9119_v63 = vld [vmem:[%s12625_s1 + $0xa20] ss:$8 sps:$4 sm:$0xff]  }
 0x259   :  { %6203 = vmatprep.subr.bf16.mxu1 %v9049_v35  ;;  %6777 = vmatprep.subr.bf16.mxu0 %v9052_v0  ;;  %v9122_v45 = vld [vmem:[%s12625_s1 + $0x1820] ss:$8 sps:$4 sm:$0xff]   ;;  %v9127_v35 = vld [vmem:[%s12625_s1 + $0xa34] ss:$8 sps:$4 sm:$0xff]  }
 0x25a   :  { %v9130_v0 = vld [vmem:[%s12625_s1 + $0x1834] ss:$8 sps:$4 sm:$0xff]  }
 0x25c   :  { %6204 = vmatpush1.bf16.msra.mxu1 %v9047_v2  ;;  %6778 = vmatpush1.bf16.msra.mxu0 %v9050_v3  ;;  %v9125_v2 = vld [vmem:[%s12625_s1 + $0xa30] ss:$8 sps:$4 sm:$0xff]  }
 0x25d   :  { %6205 = vmatprep.subr.bf16.mxu1 %v9055_v58  ;;  %6779 = vmatprep.subr.bf16.mxu0 %v9058_v40  ;;  %v9128_v3 = vld [vmem:[%s12625_s1 + $0x1830] ss:$8 sps:$4 sm:$0xff]   ;;  %v9133_v58 = vld [vmem:[%s12625_s1 + $0xa44] ss:$8 sps:$4 sm:$0xff]  }
 0x25e   :  { %v9136_v40 = vld [vmem:[%s12625_s1 + $0x1844] ss:$8 sps:$4 sm:$0xff]  }
 0x260   :  { %6206 = vmatpush1.bf16.msra.mxu1 %v9053_v4  ;;  %6780 = vmatpush1.bf16.msra.mxu0 %v9056_v5  ;;  %v9131_v4 = vld [vmem:[%s12625_s1 + $0xa40] ss:$8 sps:$4 sm:$0xff]  }
 0x261   :  { %6207 = vmatprep.subr.bf16.mxu1 %v9061_v6  ;;  %6781 = vmatprep.subr.bf16.mxu0 %v9064_v7  ;;  %v9134_v5 = vld [vmem:[%s12625_s1 + $0x1840] ss:$8 sps:$4 sm:$0xff]   ;;  %v9139_v6 = vld [vmem:[%s12625_s1 + $0xa54] ss:$8 sps:$4 sm:$0xff]  }
 0x262   :  { %v9142_v7 = vld [vmem:[%s12625_s1 + $0x1854] ss:$8 sps:$4 sm:$0xff]  }
 0x264   :  { %6208 = vmatpush1.bf16.msra.mxu1 %v9059_v8  ;;  %6782 = vmatpush1.bf16.msra.mxu0 %v9062_v9  ;;  %v9137_v8 = vld [vmem:[%s12625_s1 + $0xa50] ss:$8 sps:$4 sm:$0xff]  }
 0x265   :  { %6209 = vmatprep.subr.bf16.mxu1 %v9067_v10  ;;  %6783 = vmatprep.subr.bf16.mxu0 %v9070_v60  ;;  %v9140_v9 = vld [vmem:[%s12625_s1 + $0x1850] ss:$8 sps:$4 sm:$0xff]   ;;  %v9145_v10 = vld [vmem:[%s12625_s1 + $0xa64] ss:$8 sps:$4 sm:$0xff]  }
 0x266   :  { %v9148_v60 = vld [vmem:[%s12625_s1 + $0x1864] ss:$8 sps:$4 sm:$0xff]  }
 0x268   :  { %6210 = vmatpush1.bf16.msra.mxu1 %v9065_v13  ;;  %6784 = vmatpush1.bf16.msra.mxu0 %v9068_v16  ;;  %v9143_v13 = vld [vmem:[%s12625_s1 + $0xa60] ss:$8 sps:$4 sm:$0xff]  }
 0x269   :  { %6211 = vmatprep.subr.bf16.mxu1 %v9073_v19  ;;  %6785 = vmatprep.subr.bf16.mxu0 %v9076_v1  ;;  %v9146_v16 = vld [vmem:[%s12625_s1 + $0x1860] ss:$8 sps:$4 sm:$0xff]   ;;  %v9151_v19 = vld [vmem:[%s12625_s1 + $0xa74] ss:$8 sps:$4 sm:$0xff]  }
 0x26a   :  { %v9154_v1 = vld [vmem:[%s12625_s1 + $0x1874] ss:$8 sps:$4 sm:$0xff]  }
 0x26c   :  { %6212 = vmatpush1.bf16.msra.mxu1 %v9071_v43  ;;  %6786 = vmatpush1.bf16.msra.mxu0 %v9074_v20  ;;  %v9149_v43 = vld [vmem:[%s12625_s1 + $0xa70] ss:$8 sps:$4 sm:$0xff]  }
 0x26d   :  { %6213 = vmatprep.subr.bf16.mxu1 %v9079_v23  ;;  %6787 = vmatprep.subr.bf16.mxu0 %v9082_v61  ;;  %v9152_v20 = vld [vmem:[%s12625_s1 + $0x1870] ss:$8 sps:$4 sm:$0xff]   ;;  %v9157_v23 = vld [vmem:[%s12625_s1 + $0xa84] ss:$8 sps:$4 sm:$0xff]  }
 0x26e   :  { %v9160_v61 = vld [vmem:[%s12625_s1 + $0x1884] ss:$8 sps:$4 sm:$0xff]  }
 0x270   :  { %6214 = vmatpush1.bf16.msra.mxu1 %v9077_v11  ;;  %6788 = vmatpush1.bf16.msra.mxu0 %v9080_v24  ;;  %v9155_v11 = vld [vmem:[%s12625_s1 + $0xa80] ss:$8 sps:$4 sm:$0xff]  }
 0x271   :  { %6215 = vmatprep.subr.bf16.mxu1 %v9085_v25  ;;  %6789 = vmatprep.subr.bf16.mxu0 %v9088_v26  ;;  %v9158_v24 = vld [vmem:[%s12625_s1 + $0x1880] ss:$8 sps:$4 sm:$0xff]   ;;  %v9163_v25 = vld [vmem:[%s12625_s1 + $0xa94] ss:$8 sps:$4 sm:$0xff]  }
 0x272   :  { %v9166_v26 = vld [vmem:[%s12625_s1 + $0x1894] ss:$8 sps:$4 sm:$0xff]  }
 0x274   :  { %6216 = vmatpush1.bf16.msra.mxu1 %v9083_v27  ;;  %6790 = vmatpush1.bf16.msra.mxu0 %v9086_v28  ;;  %v9161_v27 = vld [vmem:[%s12625_s1 + $0xa90] ss:$8 sps:$4 sm:$0xff]  }
 0x275   :  { %6217 = vmatprep.subr.bf16.mxu1 %v9091_v29  ;;  %6791 = vmatprep.subr.bf16.mxu0 %v9094_v30  ;;  %v9164_v28 = vld [vmem:[%s12625_s1 + $0x1890] ss:$8 sps:$4 sm:$0xff]   ;;  %v9169_v29 = vld [vmem:[%s12625_s1 + $0xaa4] ss:$8 sps:$4 sm:$0xff]  }
 0x276   :  { %v9172_v30 = vld [vmem:[%s12625_s1 + $0x18a4] ss:$8 sps:$4 sm:$0xff]  }
 0x278   :  { %6218 = vmatpush1.bf16.msra.mxu1 %v9089_v31  ;;  %6792 = vmatpush1.bf16.msra.mxu0 %v9092_v14  ;;  %v9167_v31 = vld [vmem:[%s12625_s1 + $0xaa0] ss:$8 sps:$4 sm:$0xff]  }
 0x279   :  { %6219 = vmatprep.subr.bf16.mxu1 %v9097_v17  ;;  %6793 = vmatprep.subr.bf16.mxu0 %v9100_v34  ;;  %v9170_v14 = vld [vmem:[%s12625_s1 + $0x18a0] ss:$8 sps:$4 sm:$0xff]   ;;  %v9175_v17 = vld [vmem:[%s12625_s1 + $0xab4] ss:$8 sps:$4 sm:$0xff]  }
 0x27a   :  { %v9178_v34 = vld [vmem:[%s12625_s1 + $0x18b4] ss:$8 sps:$4 sm:$0xff]  }
 0x27c   :  { %6220 = vmatpush1.bf16.msra.mxu1 %v9095_v44  ;;  %6794 = vmatpush1.bf16.msra.mxu0 %v9098_v21  ;;  %v9176_v44 = vld [vmem:[%s12625_s1 + $0x18b0] ss:$8 sps:$4 sm:$0xff]   ;;  %v9181_v21 = vld [vmem:[%s12625_s1 + $0xac4] ss:$8 sps:$4 sm:$0xff]  }
 0x27d   :  { %6221 = vmatprep.subr.bf16.mxu1 %v9103_v12  ;;  %6795 = vmatprep.subr.bf16.mxu0 %v9106_v52  ;;  %v9184_v12 = vld [vmem:[%s12625_s1 + $0x18c4] ss:$8 sps:$4 sm:$0xff]   ;;  %v9179_v52 = vld [vmem:[%s12625_s1 + $0xac0] ss:$8 sps:$4 sm:$0xff]  }
 0x280   :  { %6222 = vmatpush1.bf16.msra.mxu1 %v9101_v46  ;;  %6796 = vmatpush1.bf16.msra.mxu0 %v9104_v47  ;;  %v9182_v46 = vld [vmem:[%s12625_s1 + $0x18c0] ss:$8 sps:$4 sm:$0xff]   ;;  %v9187_v47 = vld [vmem:[%s12625_s1 + $0xad4] ss:$8 sps:$4 sm:$0xff]  }
 0x281   :  { %6232 = vmatprep.subr.bf16.mxu1 %v9109_v15  ;;  %6806 = vmatprep.subr.bf16.mxu0 %v9112_v32  ;;  %v9190_v15 = vld [vmem:[%s12625_s1 + $0x18d4] ss:$8 sps:$4 sm:$0xff]   ;;  %v9185_v32 = vld [vmem:[%s12625_s1 + $0xad0] ss:$8 sps:$4 sm:$0xff]  }
 0x283   :  { %6224 = vmatmul.mubr.bf16.vlgmr.msra.gmra.mrb[0].mxu1 %v1086_v41  ;;  %6798 = vmatmul.mubr.bf16.vlgmr.msra.gmra.mrb[0].mxu0 %v1234_v50  ;;  %v9196_v41 = vld [vmem:[%s12625_s1 + $0x18e4] ss:$8 sps:$4 sm:$0xff]   ;;  %v9191_v50 = vld [vmem:[%s12625_s1 + $0xae0] ss:$8 sps:$4 sm:$0xff]  }
 0x284   :  { %6233 = vmatpush1.bf16.msra.mxu1 %v9107_v51  ;;  %6807 = vmatpush1.bf16.msra.mxu0 %v9110_v53  ;;  %v9194_v51 = vld [vmem:[%s12625_s1 + $0x18e0] ss:$8 sps:$4 sm:$0xff]   ;;  %v9199_v53 = vld [vmem:[%s12625_s1 + $0xaf4] ss:$8 sps:$4 sm:$0xff]  }
 0x285   :  { %6234 = vmatprep.subr.bf16.mxu1 %v9115_v54  ;;  %6808 = vmatprep.subr.bf16.mxu0 %v9118_v37  ;;  %v9202_v54 = vld [vmem:[%s12625_s1 + $0x18f4] ss:$8 sps:$4 sm:$0xff]   ;;  %v9197_v37 = vld [vmem:[%s12625_s1 + $0xaf0] ss:$8 sps:$4 sm:$0xff]  }
 0x286   :  { %6264 = vmatprep.mubr.bf16.mxu1 %v11714_v38  ;;  %6838 = vmatprep.mubr.bf16.mxu0 %v11717_v55 }
 0x288   :  { %6235 = vmatpush1.bf16.msra.mxu1 %v9113_v56  ;;  %6809 = vmatpush1.bf16.msra.mxu0 %v9116_v57  ;;  %v9200_v56 = vld [vmem:[%s12625_s1 + $0x18f0] ss:$8 sps:$4 sm:$0xff]   ;;  %v9206_v57 = vld [vmem:[%s12625_s1 + $0xb04] ss:$8 sps:$4 sm:$0xff]  }
 0x289   :  { %6236 = vmatprep.subr.bf16.mxu1 %v9121_v59  ;;  %6810 = vmatprep.subr.bf16.mxu0 %v9124_v62  ;;  %v9209_v59 = vld [vmem:[%s12625_s1 + $0x1904] ss:$8 sps:$4 sm:$0xff]   ;;  %v11903_v62 = vrot.slane %v11675_v22, %v9692_v49  ;;  %v9212_v22 = vld [vmem:[%s12625_s1 + $0xb14] ss:$8 sps:$4 sm:$0xff]  }
 0x28c   :  { %6237 = vmatpush1.bf16.msra.mxu1 %v9119_v63  ;;  %6811 = vmatpush1.bf16.msra.mxu0 %v9122_v45  ;;  %v11907_v63 = vrot.slane %v11679_v33, %v9692_v49  ;;  %v9204_v45 = vld [vmem:[%s12625_s1 + $0xb00] ss:$8 sps:$4 sm:$0xff]   ;;  %v9215_v33 = vld [vmem:[%s12625_s1 + $0x1914] ss:$8 sps:$4 sm:$0xff]  }
 0x28d   :  { %6238 = vmatprep.subr.bf16.mxu1 %v9127_v35  ;;  %6812 = vmatprep.subr.bf16.mxu0 %v9130_v0  ;;  %v9207_v35 = vld [vmem:[%s12625_s1 + $0x1900] ss:$8 sps:$4 sm:$0xff]   ;;  %v1089_v0 = vcombine.high %v11714_v38, %v11714_v38  ;;  %v9218_v38 = vld [vmem:[%s12625_s1 + $0xb24] ss:$8 sps:$4 sm:$0xff]  }
 0x290   :  { %6239 = vmatpush1.bf16.msra.mxu1 %v9125_v2  ;;  %6813 = vmatpush1.bf16.msra.mxu0 %v9128_v3  ;;  %v1284_v2 = vcombine.high %v11717_v55, %v11717_v55  ;;  %v9210_v3 = vld [vmem:[%s12625_s1 + $0xb10] ss:$8 sps:$4 sm:$0xff]   ;;  %v9221_v55 = vld [vmem:[%s12625_s1 + $0x1924] ss:$8 sps:$4 sm:$0xff]  }
 0x291   :  { %6240 = vmatprep.subr.bf16.mxu1 %v9133_v58  ;;  %6814 = vmatprep.subr.bf16.mxu0 %v9136_v40  ;;  %v9213_v58 = vld [vmem:[%s12625_s1 + $0x1910] ss:$8 sps:$4 sm:$0xff]   ;;  %v9216_v40 = vld [vmem:[%s12625_s1 + $0xb20] ss:$8 sps:$4 sm:$0xff]  }
 0x294   :  { %6241 = vmatpush1.bf16.msra.mxu1 %v9131_v4  ;;  %6815 = vmatpush1.bf16.msra.mxu0 %v9134_v5  ;;  %v9219_v4 = vld [vmem:[%s12625_s1 + $0x1920] ss:$8 sps:$4 sm:$0xff]   ;;  %v9224_v5 = vld [vmem:[%s12625_s1 + $0xb34] ss:$8 sps:$4 sm:$0xff]  }
 0x295   :  { %6242 = vmatprep.subr.bf16.mxu1 %v9139_v6  ;;  %6816 = vmatprep.subr.bf16.mxu0 %v9142_v7  ;;  %v9227_v6 = vld [vmem:[%s12625_s1 + $0x1934] ss:$8 sps:$4 sm:$0xff]   ;;  %v9222_v7 = vld [vmem:[%s12625_s1 + $0xb30] ss:$8 sps:$4 sm:$0xff]  }
 0x298   :  { %6243 = vmatpush1.bf16.msra.mxu1 %v9137_v8  ;;  %6817 = vmatpush1.bf16.msra.mxu0 %v9140_v9  ;;  %v9225_v8 = vld [vmem:[%s12625_s1 + $0x1930] ss:$8 sps:$4 sm:$0xff]   ;;  %v9230_v9 = vld [vmem:[%s12625_s1 + $0xb44] ss:$8 sps:$4 sm:$0xff]  }
 0x299   :  { %6244 = vmatprep.subr.bf16.mxu1 %v9145_v10  ;;  %6818 = vmatprep.subr.bf16.mxu0 %v9148_v60  ;;  %v9233_v10 = vld [vmem:[%s12625_s1 + $0x1944] ss:$8 sps:$4 sm:$0xff]   ;;  %v9228_v60 = vld [vmem:[%s12625_s1 + $0xb40] ss:$8 sps:$4 sm:$0xff]  }
 0x29c   :  { %6245 = vmatpush1.bf16.msra.mxu1 %v9143_v13  ;;  %6819 = vmatpush1.bf16.msra.mxu0 %v9146_v16  ;;  %v9231_v13 = vld [vmem:[%s12625_s1 + $0x1940] ss:$8 sps:$4 sm:$0xff]   ;;  %v9236_v16 = vld [vmem:[%s12625_s1 + $0xb54] ss:$8 sps:$4 sm:$0xff]  }
 0x29d   :  { %6246 = vmatprep.subr.bf16.mxu1 %v9151_v19  ;;  %6820 = vmatprep.subr.bf16.mxu0 %v9154_v1  ;;  %v9239_v19 = vld [vmem:[%s12625_s1 + $0x1954] ss:$8 sps:$4 sm:$0xff]   ;;  %v9234_v1 = vld [vmem:[%s12625_s1 + $0xb50] ss:$8 sps:$4 sm:$0xff]  }
 0x2a0   :  { %6247 = vmatpush1.bf16.msra.mxu1 %v9149_v43  ;;  %6821 = vmatpush1.bf16.msra.mxu0 %v9152_v20  ;;  %v9237_v43 = vld [vmem:[%s12625_s1 + $0x1950] ss:$8 sps:$4 sm:$0xff]   ;;  %v9242_v20 = vld [vmem:[%s12625_s1 + $0xb64] ss:$8 sps:$4 sm:$0xff]  }
 0x2a1   :  { %6248 = vmatprep.subr.bf16.mxu1 %v9157_v23  ;;  %6822 = vmatprep.subr.bf16.mxu0 %v9160_v61  ;;  %v9245_v23 = vld [vmem:[%s12625_s1 + $0x1964] ss:$8 sps:$4 sm:$0xff]   ;;  %v9240_v61 = vld [vmem:[%s12625_s1 + $0xb60] ss:$8 sps:$4 sm:$0xff]  }
 0x2a4   :  { %6249 = vmatpush1.bf16.msra.mxu1 %v9155_v11  ;;  %6823 = vmatpush1.bf16.msra.mxu0 %v9158_v24  ;;  %v9243_v11 = vld [vmem:[%s12625_s1 + $0x1960] ss:$8 sps:$4 sm:$0xff]   ;;  %v9248_v24 = vld [vmem:[%s12625_s1 + $0xb74] ss:$8 sps:$4 sm:$0xff]  }
 0x2a5   :  { %6250 = vmatprep.subr.bf16.mxu1 %v9163_v25  ;;  %6824 = vmatprep.subr.bf16.mxu0 %v9166_v26  ;;  %v9251_v25 = vld [vmem:[%s12625_s1 + $0x1974] ss:$8 sps:$4 sm:$0xff]   ;;  %v9246_v26 = vld [vmem:[%s12625_s1 + $0xb70] ss:$8 sps:$4 sm:$0xff]  }
 0x2a8   :  { %6251 = vmatpush1.bf16.msra.mxu1 %v9161_v27  ;;  %6825 = vmatpush1.bf16.msra.mxu0 %v9164_v28  ;;  %v9249_v27 = vld [vmem:[%s12625_s1 + $0x1970] ss:$8 sps:$4 sm:$0xff]   ;;  %v9254_v28 = vld [vmem:[%s12625_s1 + $0xb84] ss:$8 sps:$4 sm:$0xff]  }
 0x2a9   :  { %6252 = vmatprep.subr.bf16.mxu1 %v9169_v29  ;;  %6826 = vmatprep.subr.bf16.mxu0 %v9172_v30  ;;  %v9257_v29 = vld [vmem:[%s12625_s1 + $0x1984] ss:$8 sps:$4 sm:$0xff]   ;;  %v9252_v30 = vld [vmem:[%s12625_s1 + $0xb80] ss:$8 sps:$4 sm:$0xff]  }
 0x2ac   :  { %6253 = vmatpush1.bf16.msra.mxu1 %v9167_v31  ;;  %6827 = vmatpush1.bf16.msra.mxu0 %v9170_v14  ;;  %v9255_v31 = vld [vmem:[%s12625_s1 + $0x1980] ss:$8 sps:$4 sm:$0xff]   ;;  %v9260_v14 = vld [vmem:[%s12625_s1 + $0xb94] ss:$8 sps:$4 sm:$0xff]  }
 0x2ad   :  { %6254 = vmatprep.subr.bf16.mxu1 %v9175_v17  ;;  %6828 = vmatprep.subr.bf16.mxu0 %v9178_v34  ;;  %v9263_v17 = vld [vmem:[%s12625_s1 + $0x1994] ss:$8 sps:$4 sm:$0xff]   ;;  %v9258_v34 = vld [vmem:[%s12625_s1 + $0xb90] ss:$8 sps:$4 sm:$0xff]  }
 0x2b0   :  { %6255 = vmatpush1.bf16.msra.mxu1 %v9173_v36  ;;  %6829 = vmatpush1.bf16.msra.mxu0 %v9176_v44  ;;  %v9261_v36 = vld [vmem:[%s12625_s1 + $0x1990] ss:$8 sps:$4 sm:$0xff]   ;;  %v9266_v44 = vld [vmem:[%s12625_s1 + $0xba4] ss:$8 sps:$4 sm:$0xff]  }
 0x2b1   :  { %6256 = vmatprep.subr.bf16.mxu1 %v9181_v21  ;;  %6830 = vmatprep.subr.bf16.mxu0 %v9184_v12  ;;  %v9269_v21 = vld [vmem:[%s12625_s1 + $0x19a4] ss:$8 sps:$4 sm:$0xff]   ;;  %v9264_v12 = vld [vmem:[%s12625_s1 + $0xba0] ss:$8 sps:$4 sm:$0xff]  }
 0x2b4   :  { %6257 = vmatpush1.bf16.msra.mxu1 %v9179_v52  ;;  %6831 = vmatpush1.bf16.msra.mxu0 %v9182_v46  ;;  %v9267_v52 = vld [vmem:[%s12625_s1 + $0x19a0] ss:$8 sps:$4 sm:$0xff]   ;;  %v9272_v46 = vld [vmem:[%s12625_s1 + $0xbb4] ss:$8 sps:$4 sm:$0xff]  }
 0x2b5   :  { %6258 = vmatprep.subr.bf16.mxu1 %v9187_v47  ;;  %6832 = vmatprep.subr.bf16.mxu0 %v9190_v15  ;;  %v9275_v47 = vld [vmem:[%s12625_s1 + $0x19b4] ss:$8 sps:$4 sm:$0xff]   ;;  %v9270_v15 = vld [vmem:[%s12625_s1 + $0xbb0] ss:$8 sps:$4 sm:$0xff]  }
 0x2b8   :  { %6259 = vmatpush1.bf16.msra.mxu1 %v9185_v32  ;;  %6833 = vmatpush1.bf16.msra.mxu0 %v9188_v48  ;;  %v9273_v32 = vld [vmem:[%s12625_s1 + $0x19b0] ss:$8 sps:$4 sm:$0xff]   ;;  %v9278_v48 = vld [vmem:[%s12625_s1 + $0xbc4] ss:$8 sps:$4 sm:$0xff]  }
 0x2b9   :  { %6260 = vmatprep.subr.bf16.mxu1 %v9193_v18  ;;  %6834 = vmatprep.subr.bf16.mxu0 %v9196_v41  ;;  %v9281_v18 = vld [vmem:[%s12625_s1 + $0x19c4] ss:$8 sps:$4 sm:$0xff]   ;;  %v9276_v41 = vld [vmem:[%s12625_s1 + $0xbc0] ss:$8 sps:$4 sm:$0xff]  }
 0x2bc   :  { %6261 = vmatpush1.bf16.msra.mxu1 %v9191_v50  ;;  %6835 = vmatpush1.bf16.msra.mxu0 %v9194_v51  ;;  %v9279_v50 = vld [vmem:[%s12625_s1 + $0x19c0] ss:$8 sps:$4 sm:$0xff]   ;;  %v9284_v51 = vld [vmem:[%s12625_s1 + $0xbd4] ss:$8 sps:$4 sm:$0xff]  }
 0x2bd   :  { %6262 = vmatprep.subr.bf16.mxu1 %v9199_v53  ;;  %6836 = vmatprep.subr.bf16.mxu0 %v9202_v54  ;;  %v9287_v53 = vld [vmem:[%s12625_s1 + $0x19d4] ss:$8 sps:$4 sm:$0xff]   ;;  %v9282_v54 = vld [vmem:[%s12625_s1 + $0xbd0] ss:$8 sps:$4 sm:$0xff]  }
 0x2c0   :  { %6263 = vmatpush1.bf16.msra.mxu1 %v9197_v37  ;;  %6837 = vmatpush1.bf16.msra.mxu0 %v9200_v56  ;;  %v9285_v37 = vld [vmem:[%s12625_s1 + $0x19d0] ss:$8 sps:$4 sm:$0xff]   ;;  %v9290_v56 = vld [vmem:[%s12625_s1 + $0xbe4] ss:$8 sps:$4 sm:$0xff]  }
 0x2c1   :  { %6273 = vmatprep.subr.bf16.mxu1 %v9206_v57  ;;  %6847 = vmatprep.subr.bf16.mxu0 %v9209_v59  ;;  %v9293_v57 = vld [vmem:[%s12625_s1 + $0x19e4] ss:$8 sps:$4 sm:$0xff]   ;;  %v1237_v59 = vcombine.high %v11660_v39, %v11660_v39  ;;  %v9299_v39 = vld [vmem:[%s12625_s1 + $0x19f4] ss:$8 sps:$4 sm:$0xff]  }
 0x2c3   :  { %6265 = vmatmul.mubr.bf16.vlgmr.msra.gmra.mrb[0].mxu1 %v11903_v62  ;;  %6839 = vmatmul.mubr.bf16.vlgmr.msra.gmra.mrb[0].mxu0 %v11907_v63 }
 0x2c4   :  { %6274 = vmatpush1.bf16.msra.mxu1 %v9204_v45  ;;  %6848 = vmatpush1.bf16.msra.mxu0 %v9207_v35  ;;  %v9288_v45 = vld [vmem:[%s12625_s1 + $0xbe0] ss:$8 sps:$4 sm:$0xff]  }
 0x2c5   :  { %6275 = vmatprep.subr.bf16.mxu1 %v9212_v22  ;;  %6849 = vmatprep.subr.bf16.mxu0 %v9215_v33  ;;  %v9291_v35 = vld [vmem:[%s12625_s1 + $0x19e0] ss:$8 sps:$4 sm:$0xff]   ;;  %v9296_v22 = vld [vmem:[%s12625_s1 + $0xbf4] ss:$8 sps:$4 sm:$0xff]  }
 0x2c6   :  { %6305 = vmatprep.mubr.bf16.mxu1 %v1089_v0  ;;  %6879 = vmatprep.mubr.bf16.mxu0 %v1284_v2  ;;  %v12100_v33 = vld.sshfl [vmem:[%s12624_s0 + $0x18] sm:$0xff pattern:$0x75316420]  ;;  %v12103_v0 = vrot.slane %v1237_v59, %v9692_v49 }
 0x2c7   :  { %v9294_v2 = vld [vmem:[%s12625_s1 + $0xbf0] ss:$8 sps:$4 sm:$0xff]  }
 0x2c8   :  { %6276 = vmatpush1.bf16.msra.mxu1 %v9210_v3  ;;  %6850 = vmatpush1.bf16.msra.mxu0 %v9213_v58  ;;  %v9297_v3 = vld [vmem:[%s12625_s1 + $0x19f0] ss:$8 sps:$4 sm:$0xff]   ;;  %v9302_v58 = vld [vmem:[%s12625_s1 + $0xc04] ss:$8 sps:$4 sm:$0xff]  }
 0x2c9   :  { %6277 = vmatprep.subr.bf16.mxu1 %v9218_v38  ;;  %6851 = vmatprep.subr.bf16.mxu0 %v9221_v55  ;;  %v9305_v38 = vld [vmem:[%s12625_s1 + $0x1a04] ss:$8 sps:$4 sm:$0xff]   ;;  %v1105_v55 = vcombine.high %v12100_v33, %v12100_v33  ;;  %v9369_v59 = vld [vmem:[%s12625_s1 + $0x1ab0] ss:$8 sps:$4 sm:$0xff]  }
 0x2cc   :  { %6278 = vmatpush1.bf16.msra.mxu1 %v9216_v40  ;;  %6852 = vmatpush1.bf16.msra.mxu0 %v9219_v4  ;;  %v1253_v40 = vcombine.high %v12103_v0, %v12103_v0  ;;  %v1087_v4 = vcombine.high %v11903_v62, %v11903_v62  ;;  %v9311_v62 = vld [vmem:[%s12625_s1 + $0x1a14] ss:$8 sps:$4 sm:$0xff]  }
 0x2cd   :  { %6279 = vmatprep.subr.bf16.mxu1 %v9224_v5  ;;  %6853 = vmatprep.subr.bf16.mxu0 %v9227_v6  ;;  %v1282_v5 = vcombine.high %v11907_v63, %v11907_v63  ;;  %v9300_v6 = vld [vmem:[%s12625_s1 + $0xc00] ss:$8 sps:$4 sm:$0xff]   ;;  %v12138_v63 = vrot.slane %v1105_v55, %v9692_v49  ;;  %v9386_v55 = vld [vmem:[%s12625_s1 + $0xce4] ss:$8 sps:$4 sm:$0xff]  }
 0x2d0   :  { %6280 = vmatpush1.bf16.msra.mxu1 %v9222_v7  ;;  %6854 = vmatpush1.bf16.msra.mxu0 %v9225_v8  ;;  %v9303_v7 = vld [vmem:[%s12625_s1 + $0x1a00] ss:$8 sps:$4 sm:$0xff]   ;;  %v9308_v8 = vld [vmem:[%s12625_s1 + $0xc14] ss:$8 sps:$4 sm:$0xff]  }
 0x2d1   :  { %6281 = vmatprep.subr.bf16.mxu1 %v9230_v9  ;;  %6855 = vmatprep.subr.bf16.mxu0 %v9233_v10  ;;  %v12141_v9 = vrot.slane %v1253_v40, %v9692_v49  ;;  %v9306_v10 = vld [vmem:[%s12625_s1 + $0xc10] ss:$8 sps:$4 sm:$0xff]   ;;  %v9389_v40 = vld [vmem:[%s12625_s1 + $0x1ae4] ss:$8 sps:$4 sm:$0xff]  }
 0x2d4   :  { %6282 = vmatpush1.bf16.msra.mxu1 %v9228_v60  ;;  %6856 = vmatpush1.bf16.msra.mxu0 %v9231_v13  ;;  %v9309_v60 = vld [vmem:[%s12625_s1 + $0x1a10] ss:$8 sps:$4 sm:$0xff]   ;;  %v9314_v13 = vld [vmem:[%s12625_s1 + $0xc24] ss:$8 sps:$4 sm:$0xff]  }
 0x2d5   :  { %6283 = vmatprep.subr.bf16.mxu1 %v9236_v16  ;;  %6857 = vmatprep.subr.bf16.mxu0 %v9239_v19  ;;  %v9317_v16 = vld [vmem:[%s12625_s1 + $0x1a24] ss:$8 sps:$4 sm:$0xff]   ;;  %v9312_v19 = vld [vmem:[%s12625_s1 + $0xc20] ss:$8 sps:$4 sm:$0xff]  }
 0x2d8   :  { %6284 = vmatpush1.bf16.msra.mxu1 %v9234_v1  ;;  %6858 = vmatpush1.bf16.msra.mxu0 %v9237_v43  ;;  %v9315_v1 = vld [vmem:[%s12625_s1 + $0x1a20] ss:$8 sps:$4 sm:$0xff]   ;;  %v9320_v43 = vld [vmem:[%s12625_s1 + $0xc34] ss:$8 sps:$4 sm:$0xff]  }
 0x2d9   :  { %6285 = vmatprep.subr.bf16.mxu1 %v9242_v20  ;;  %6859 = vmatprep.subr.bf16.mxu0 %v9245_v23  ;;  %v9323_v20 = vld [vmem:[%s12625_s1 + $0x1a34] ss:$8 sps:$4 sm:$0xff]   ;;  %v9318_v23 = vld [vmem:[%s12625_s1 + $0xc30] ss:$8 sps:$4 sm:$0xff]  }
 0x2dc   :  { %6286 = vmatpush1.bf16.msra.mxu1 %v9240_v61  ;;  %6860 = vmatpush1.bf16.msra.mxu0 %v9243_v11  ;;  %v9321_v61 = vld [vmem:[%s12625_s1 + $0x1a30] ss:$8 sps:$4 sm:$0xff]   ;;  %v9326_v11 = vld [vmem:[%s12625_s1 + $0xc44] ss:$8 sps:$4 sm:$0xff]  }
 0x2dd   :  { %6287 = vmatprep.subr.bf16.mxu1 %v9248_v24  ;;  %6861 = vmatprep.subr.bf16.mxu0 %v9251_v25  ;;  %v9329_v24 = vld [vmem:[%s12625_s1 + $0x1a44] ss:$8 sps:$4 sm:$0xff]   ;;  %v9324_v25 = vld [vmem:[%s12625_s1 + $0xc40] ss:$8 sps:$4 sm:$0xff]  }
 0x2e0   :  { %6288 = vmatpush1.bf16.msra.mxu1 %v9246_v26  ;;  %6862 = vmatpush1.bf16.msra.mxu0 %v9249_v27  ;;  %v9327_v26 = vld [vmem:[%s12625_s1 + $0x1a40] ss:$8 sps:$4 sm:$0xff]   ;;  %v9332_v27 = vld [vmem:[%s12625_s1 + $0xc54] ss:$8 sps:$4 sm:$0xff]  }
 0x2e1   :  { %6289 = vmatprep.subr.bf16.mxu1 %v9254_v28  ;;  %6863 = vmatprep.subr.bf16.mxu0 %v9257_v29  ;;  %v9335_v28 = vld [vmem:[%s12625_s1 + $0x1a54] ss:$8 sps:$4 sm:$0xff]   ;;  %v9330_v29 = vld [vmem:[%s12625_s1 + $0xc50] ss:$8 sps:$4 sm:$0xff]  }
 0x2e4   :  { %6290 = vmatpush1.bf16.msra.mxu1 %v9252_v30  ;;  %6864 = vmatpush1.bf16.msra.mxu0 %v9255_v31  ;;  %v9333_v30 = vld [vmem:[%s12625_s1 + $0x1a50] ss:$8 sps:$4 sm:$0xff]   ;;  %v9338_v31 = vld [vmem:[%s12625_s1 + $0xc64] ss:$8 sps:$4 sm:$0xff]  }
 0x2e5   :  { %6291 = vmatprep.subr.bf16.mxu1 %v9260_v14  ;;  %6865 = vmatprep.subr.bf16.mxu0 %v9263_v17  ;;  %v9341_v14 = vld [vmem:[%s12625_s1 + $0x1a64] ss:$8 sps:$4 sm:$0xff]   ;;  %v9336_v17 = vld [vmem:[%s12625_s1 + $0xc60] ss:$8 sps:$4 sm:$0xff]  }
 0x2e8   :  { %6292 = vmatpush1.bf16.msra.mxu1 %v9258_v34  ;;  %6866 = vmatpush1.bf16.msra.mxu0 %v9261_v36  ;;  %v9339_v34 = vld [vmem:[%s12625_s1 + $0x1a60] ss:$8 sps:$4 sm:$0xff]   ;;  %v9344_v36 = vld [vmem:[%s12625_s1 + $0xc74] ss:$8 sps:$4 sm:$0xff]  }
 0x2e9   :  { %6293 = vmatprep.subr.bf16.mxu1 %v9266_v44  ;;  %6867 = vmatprep.subr.bf16.mxu0 %v9269_v21  ;;  %v9347_v44 = vld [vmem:[%s12625_s1 + $0x1a74] ss:$8 sps:$4 sm:$0xff]   ;;  %v9342_v21 = vld [vmem:[%s12625_s1 + $0xc70] ss:$8 sps:$4 sm:$0xff]  }
 0x2ec   :  { %6294 = vmatpush1.bf16.msra.mxu1 %v9264_v12  ;;  %6868 = vmatpush1.bf16.msra.mxu0 %v9267_v52  ;;  %v9345_v12 = vld [vmem:[%s12625_s1 + $0x1a70] ss:$8 sps:$4 sm:$0xff]   ;;  %v9350_v52 = vld [vmem:[%s12625_s1 + $0xc84] ss:$8 sps:$4 sm:$0xff]  }
 0x2ed   :  { %6295 = vmatprep.subr.bf16.mxu1 %v9272_v46  ;;  %6869 = vmatprep.subr.bf16.mxu0 %v9275_v47  ;;  %v9353_v46 = vld [vmem:[%s12625_s1 + $0x1a84] ss:$8 sps:$4 sm:$0xff]   ;;  %v9348_v47 = vld [vmem:[%s12625_s1 + $0xc80] ss:$8 sps:$4 sm:$0xff]  }
 0x2f0   :  { %6296 = vmatpush1.bf16.msra.mxu1 %v9270_v15  ;;  %6870 = vmatpush1.bf16.msra.mxu0 %v9273_v32  ;;  %v9351_v15 = vld [vmem:[%s12625_s1 + $0x1a80] ss:$8 sps:$4 sm:$0xff]   ;;  %v9356_v32 = vld [vmem:[%s12625_s1 + $0xc94] ss:$8 sps:$4 sm:$0xff]  }
 0x2f1   :  { %6297 = vmatprep.subr.bf16.mxu1 %v9278_v48  ;;  %6871 = vmatprep.subr.bf16.mxu0 %v9281_v18  ;;  %v9359_v48 = vld [vmem:[%s12625_s1 + $0x1a94] ss:$8 sps:$4 sm:$0xff]   ;;  %v9354_v18 = vld [vmem:[%s12625_s1 + $0xc90] ss:$8 sps:$4 sm:$0xff]  }
 0x2f4   :  { %6298 = vmatpush1.bf16.msra.mxu1 %v9276_v41  ;;  %6872 = vmatpush1.bf16.msra.mxu0 %v9279_v50  ;;  %v9357_v41 = vld [vmem:[%s12625_s1 + $0x1a90] ss:$8 sps:$4 sm:$0xff]   ;;  %v9362_v50 = vld [vmem:[%s12625_s1 + $0xca4] ss:$8 sps:$4 sm:$0xff]  }
 0x2f5   :  { %6299 = vmatprep.subr.bf16.mxu1 %v9284_v51  ;;  %6873 = vmatprep.subr.bf16.mxu0 %v9287_v53  ;;  %v9365_v51 = vld [vmem:[%s12625_s1 + $0x1aa4] ss:$8 sps:$4 sm:$0xff]   ;;  %v9360_v53 = vld [vmem:[%s12625_s1 + $0xca0] ss:$8 sps:$4 sm:$0xff]  }
 0x2f8   :  { %6300 = vmatpush1.bf16.msra.mxu1 %v9282_v54  ;;  %6874 = vmatpush1.bf16.msra.mxu0 %v9285_v37  ;;  %v9363_v54 = vld [vmem:[%s12625_s1 + $0x1aa0] ss:$8 sps:$4 sm:$0xff]   ;;  %v9368_v37 = vld [vmem:[%s12625_s1 + $0xcb4] ss:$8 sps:$4 sm:$0xff]  }
 0x2f9   :  { %6301 = vmatprep.subr.bf16.mxu1 %v9290_v56  ;;  %6875 = vmatprep.subr.bf16.mxu0 %v9293_v57  ;;  %v9371_v56 = vld [vmem:[%s12625_s1 + $0x1ab4] ss:$8 sps:$4 sm:$0xff]   ;;  %v9366_v57 = vld [vmem:[%s12625_s1 + $0xcb0] ss:$8 sps:$4 sm:$0xff]  }
 0x2fc   :  { %6302 = vmatpush1.bf16.msra.mxu1 %v9288_v45  ;;  %6876 = vmatpush1.bf16.msra.mxu0 %v9291_v35  ;;  %v9374_v45 = vld [vmem:[%s12625_s1 + $0xcc4] ss:$8 sps:$4 sm:$0xff]  }
 0x2fd   :  { %6303 = vmatprep.subr.bf16.mxu1 %v9296_v22  ;;  %6877 = vmatprep.subr.bf16.mxu0 %v9299_v39  ;;  %v9377_v35 = vld [vmem:[%s12625_s1 + $0x1ac4] ss:$8 sps:$4 sm:$0xff]   ;;  %v9372_v22 = vld [vmem:[%s12625_s1 + $0xcc0] ss:$8 sps:$4 sm:$0xff]  }
 0x2fe   :  { %v9375_v39 = vld [vmem:[%s12625_s1 + $0x1ac0] ss:$8 sps:$4 sm:$0xff]  }
 0x300   :  { %6304 = vmatpush1.bf16.msra.mxu1 %v9294_v2  ;;  %6878 = vmatpush1.bf16.msra.mxu0 %v9297_v3  ;;  %v9380_v2 = vld [vmem:[%s12625_s1 + $0xcd4] ss:$8 sps:$4 sm:$0xff]  }
 0x301   :  { %6314 = vmatprep.subr.bf16.mxu1 %v9302_v58  ;;  %6888 = vmatprep.subr.bf16.mxu0 %v9305_v38  ;;  %v9383_v3 = vld [vmem:[%s12625_s1 + $0x1ad4] ss:$8 sps:$4 sm:$0xff]   ;;  %v9378_v58 = vld [vmem:[%s12625_s1 + $0xcd0] ss:$8 sps:$4 sm:$0xff]  }
 0x302   :  { %v9381_v38 = vld [vmem:[%s12625_s1 + $0x1ad0] ss:$8 sps:$4 sm:$0xff]  }
 0x303   :  { %6306 = vmatmul.mubr.bf16.vlgmr.msra.gmra.mrb[0].mxu1 %v1087_v4  ;;  %6880 = vmatmul.mubr.bf16.vlgmr.msra.gmra.mrb[0].mxu0 %v1282_v5  ;;  %v9384_v4 = vld [vmem:[%s12625_s1 + $0xce0] ss:$8 sps:$4 sm:$0xff]  }
 0x304   :  { %6315 = vmatpush1.bf16.msra.mxu1 %v9300_v6  ;;  %6889 = vmatpush1.bf16.msra.mxu0 %v9303_v7  ;;  %v9387_v5 = vld [vmem:[%s12625_s1 + $0x1ae0] ss:$8 sps:$4 sm:$0xff]   ;;  %v9392_v6 = vld [vmem:[%s12625_s1 + $0xcf4] ss:$8 sps:$4 sm:$0xff]  }
 0x305   :  { %6316 = vmatprep.subr.bf16.mxu1 %v9308_v8  ;;  %6890 = vmatprep.subr.bf16.mxu0 %v9311_v62  ;;  %v9395_v7 = vld [vmem:[%s12625_s1 + $0x1af4] ss:$8 sps:$4 sm:$0xff]   ;;  %v9390_v8 = vld [vmem:[%s12625_s1 + $0xcf0] ss:$8 sps:$4 sm:$0xff]  }
 0x306   :  { %6346 = vmatprep.mubr.bf16.mxu1 %v12138_v63  ;;  %6920 = vmatprep.mubr.bf16.mxu0 %v12141_v9  ;;  %v9393_v62 = vld [vmem:[%s12625_s1 + $0x1af0] ss:$8 sps:$4 sm:$0xff]  }
 0x308   :  { %6317 = vmatpush1.bf16.msra.mxu1 %v9306_v10  ;;  %6891 = vmatpush1.bf16.msra.mxu0 %v9309_v60  ;;  %v9398_v10 = vld [vmem:[%s12625_s1 + $0xd04] ss:$8 sps:$4 sm:$0xff]  }
 0x309   :  { %6318 = vmatprep.subr.bf16.mxu1 %v9314_v13  ;;  %6892 = vmatprep.subr.bf16.mxu0 %v9317_v16  ;;  %v9402_v60 = vld [vmem:[%s12625_s1 + $0x1b04] ss:$8 sps:$4 sm:$0xff]   ;;  %v12327_v13 = vrot.slane %v12100_v33, %v9692_v49  ;;  %v12331_v16 = vrot.slane %v12103_v0, %v9692_v49  ;;  %v9405_v33 = vld [vmem:[%s12625_s1 + $0xd14] ss:$8 sps:$4 sm:$0xff]   ;;  %v1137_v0 = vcombine.high %v12138_v63, %v12138_v63 }
 0x30a   :  { %v9408_v49 = vld [vmem:[%s12625_s1 + $0x1b14] ss:$8 sps:$4 sm:$0xff]   ;;  %v9411_v63 = vld [vmem:[%s12625_s1 + $0xd24] ss:$8 sps:$4 sm:$0xff]  }
 0x30c   :  { %6319 = vmatpush1.bf16.msra.mxu1 %v9312_v19  ;;  %6893 = vmatpush1.bf16.msra.mxu0 %v9315_v1  ;;  %v9396_v19 = vld [vmem:[%s12625_s1 + $0xd00] ss:$8 sps:$4 sm:$0xff]  }
 0x30d   :  { %6320 = vmatprep.subr.bf16.mxu1 %v9320_v43  ;;  %6894 = vmatprep.subr.bf16.mxu0 %v9323_v20  ;;  %v9400_v1 = vld [vmem:[%s12625_s1 + $0x1b00] ss:$8 sps:$4 sm:$0xff]   ;;  %v1285_v43 = vcombine.high %v12141_v9, %v12141_v9  ;;  %v9403_v20 = vld [vmem:[%s12625_s1 + $0xd10] ss:$8 sps:$4 sm:$0xff]   ;;  %v9414_v9 = vld [vmem:[%s12625_s1 + $0x1b24] ss:$8 sps:$4 sm:$0xff]  }
 0x310   :  { %6321 = vmatpush1.bf16.msra.mxu1 %v9318_v23  ;;  %6895 = vmatpush1.bf16.msra.mxu0 %v9321_v61  ;;  %v9406_v23 = vld [vmem:[%s12625_s1 + $0x1b10] ss:$8 sps:$4 sm:$0xff]   ;;  %v9409_v61 = vld [vmem:[%s12625_s1 + $0xd20] ss:$8 sps:$4 sm:$0xff]  }
 0x311   :  { %6322 = vmatprep.subr.bf16.mxu1 %v9326_v11  ;;  %6896 = vmatprep.subr.bf16.mxu0 %v9329_v24  ;;  %v9412_v11 = vld [vmem:[%s12625_s1 + $0x1b20] ss:$8 sps:$4 sm:$0xff]   ;;  %v9417_v24 = vld [vmem:[%s12625_s1 + $0xd34] ss:$8 sps:$4 sm:$0xff]  }
 0x314   :  { %6323 = vmatpush1.bf16.msra.mxu1 %v9324_v25  ;;  %6897 = vmatpush1.bf16.msra.mxu0 %v9327_v26  ;;  %v9420_v25 = vld [vmem:[%s12625_s1 + $0x1b34] ss:$8 sps:$4 sm:$0xff]   ;;  %v9415_v26 = vld [vmem:[%s12625_s1 + $0xd30] ss:$8 sps:$4 sm:$0xff]  }
 0x315   :  { %6324 = vmatprep.subr.bf16.mxu1 %v9332_v27  ;;  %6898 = vmatprep.subr.bf16.mxu0 %v9335_v28  ;;  %v9418_v27 = vld [vmem:[%s12625_s1 + $0x1b30] ss:$8 sps:$4 sm:$0xff]   ;;  %v9423_v28 = vld [vmem:[%s12625_s1 + $0xd44] ss:$8 sps:$4 sm:$0xff]  }
 0x318   :  { %6325 = vmatpush1.bf16.msra.mxu1 %v9330_v29  ;;  %6899 = vmatpush1.bf16.msra.mxu0 %v9333_v30  ;;  %v9426_v29 = vld [vmem:[%s12625_s1 + $0x1b44] ss:$8 sps:$4 sm:$0xff]   ;;  %v9421_v30 = vld [vmem:[%s12625_s1 + $0xd40] ss:$8 sps:$4 sm:$0xff]  }
 0x319   :  { %6326 = vmatprep.subr.bf16.mxu1 %v9338_v31  ;;  %6900 = vmatprep.subr.bf16.mxu0 %v9341_v14  ;;  %v9424_v31 = vld [vmem:[%s12625_s1 + $0x1b40] ss:$8 sps:$4 sm:$0xff]   ;;  %v9429_v14 = vld [vmem:[%s12625_s1 + $0xd54] ss:$8 sps:$4 sm:$0xff]  }
 0x31c   :  { %6327 = vmatpush1.bf16.msra.mxu1 %v9336_v17  ;;  %6901 = vmatpush1.bf16.msra.mxu0 %v9339_v34  ;;  %v9432_v17 = vld [vmem:[%s12625_s1 + $0x1b54] ss:$8 sps:$4 sm:$0xff]   ;;  %v9427_v34 = vld [vmem:[%s12625_s1 + $0xd50] ss:$8 sps:$4 sm:$0xff]  }
 0x31d   :  { %6328 = vmatprep.subr.bf16.mxu1 %v9344_v36  ;;  %6902 = vmatprep.subr.bf16.mxu0 %v9347_v44  ;;  %v9430_v36 = vld [vmem:[%s12625_s1 + $0x1b50] ss:$8 sps:$4 sm:$0xff]   ;;  %v9435_v44 = vld [vmem:[%s12625_s1 + $0xd64] ss:$8 sps:$4 sm:$0xff]  }
 0x320   :  { %6329 = vmatpush1.bf16.msra.mxu1 %v9342_v21  ;;  %6903 = vmatpush1.bf16.msra.mxu0 %v9345_v12  ;;  %v9438_v21 = vld [vmem:[%s12625_s1 + $0x1b64] ss:$8 sps:$4 sm:$0xff]   ;;  %v9433_v12 = vld [vmem:[%s12625_s1 + $0xd60] ss:$8 sps:$4 sm:$0xff]  }
 0x321   :  { %6330 = vmatprep.subr.bf16.mxu1 %v9350_v52  ;;  %6904 = vmatprep.subr.bf16.mxu0 %v9353_v46  ;;  %v9436_v52 = vld [vmem:[%s12625_s1 + $0x1b60] ss:$8 sps:$4 sm:$0xff]   ;;  %v9441_v46 = vld [vmem:[%s12625_s1 + $0xd74] ss:$8 sps:$4 sm:$0xff]  }
 0x324   :  { %6331 = vmatpush1.bf16.msra.mxu1 %v9348_v47  ;;  %6905 = vmatpush1.bf16.msra.mxu0 %v9351_v15  ;;  %v9444_v47 = vld [vmem:[%s12625_s1 + $0x1b74] ss:$8 sps:$4 sm:$0xff]   ;;  %v9439_v15 = vld [vmem:[%s12625_s1 + $0xd70] ss:$8 sps:$4 sm:$0xff]  }
 0x325   :  { %6332 = vmatprep.subr.bf16.mxu1 %v9356_v32  ;;  %6906 = vmatprep.subr.bf16.mxu0 %v9359_v48  ;;  %v9442_v32 = vld [vmem:[%s12625_s1 + $0x1b70] ss:$8 sps:$4 sm:$0xff]   ;;  %v9447_v48 = vld [vmem:[%s12625_s1 + $0xd84] ss:$8 sps:$4 sm:$0xff]  }
 0x328   :  { %6333 = vmatpush1.bf16.msra.mxu1 %v9354_v18  ;;  %6907 = vmatpush1.bf16.msra.mxu0 %v9357_v41  ;;  %v9450_v18 = vld [vmem:[%s12625_s1 + $0x1b84] ss:$8 sps:$4 sm:$0xff]   ;;  %v9445_v41 = vld [vmem:[%s12625_s1 + $0xd80] ss:$8 sps:$4 sm:$0xff]  }
 0x329   :  { %6334 = vmatprep.subr.bf16.mxu1 %v9362_v50  ;;  %6908 = vmatprep.subr.bf16.mxu0 %v9365_v51  ;;  %v9448_v50 = vld [vmem:[%s12625_s1 + $0x1b80] ss:$8 sps:$4 sm:$0xff]   ;;  %v9453_v51 = vld [vmem:[%s12625_s1 + $0xd94] ss:$8 sps:$4 sm:$0xff]  }
 0x32c   :  { %6335 = vmatpush1.bf16.msra.mxu1 %v9360_v53  ;;  %6909 = vmatpush1.bf16.msra.mxu0 %v9363_v54  ;;  %v9456_v53 = vld [vmem:[%s12625_s1 + $0x1b94] ss:$8 sps:$4 sm:$0xff]   ;;  %v9451_v54 = vld [vmem:[%s12625_s1 + $0xd90] ss:$8 sps:$4 sm:$0xff]  }
 0x32d   :  { %6336 = vmatprep.subr.bf16.mxu1 %v9368_v37  ;;  %6910 = vmatprep.subr.bf16.mxu0 %v9371_v56  ;;  %v9454_v37 = vld [vmem:[%s12625_s1 + $0x1b90] ss:$8 sps:$4 sm:$0xff]   ;;  %v9459_v56 = vld [vmem:[%s12625_s1 + $0xda4] ss:$8 sps:$4 sm:$0xff]  }
 0x330   :  { %6337 = vmatpush1.bf16.msra.mxu1 %v9366_v57  ;;  %6911 = vmatpush1.bf16.msra.mxu0 %v9369_v59  ;;  %v9462_v57 = vld [vmem:[%s12625_s1 + $0x1ba4] ss:$8 sps:$4 sm:$0xff]   ;;  %v9457_v59 = vld [vmem:[%s12625_s1 + $0xda0] ss:$8 sps:$4 sm:$0xff]  }
 0x331   :  { %6338 = vmatprep.subr.bf16.mxu1 %v9374_v45  ;;  %6912 = vmatprep.subr.bf16.mxu0 %v9377_v35  ;;  %v9460_v45 = vld [vmem:[%s12625_s1 + $0x1ba0] ss:$8 sps:$4 sm:$0xff]   ;;  %v9465_v35 = vld [vmem:[%s12625_s1 + $0xdb4] ss:$8 sps:$4 sm:$0xff]  }
 0x334   :  { %6339 = vmatpush1.bf16.msra.mxu1 %v9372_v22  ;;  %6913 = vmatpush1.bf16.msra.mxu0 %v9375_v39  ;;  %v9468_v22 = vld [vmem:[%s12625_s1 + $0x1bb4] ss:$8 sps:$4 sm:$0xff]   ;;  %v9463_v39 = vld [vmem:[%s12625_s1 + $0xdb0] ss:$8 sps:$4 sm:$0xff]  }
 0x335   :  { %6340 = vmatprep.subr.bf16.mxu1 %v9380_v2  ;;  %6914 = vmatprep.subr.bf16.mxu0 %v9383_v3  ;;  %v9466_v2 = vld [vmem:[%s12625_s1 + $0x1bb0] ss:$8 sps:$4 sm:$0xff]   ;;  %v9471_v3 = vld [vmem:[%s12625_s1 + $0xdc4] ss:$8 sps:$4 sm:$0xff]  }
 0x338   :  { %6341 = vmatpush1.bf16.msra.mxu1 %v9378_v58  ;;  %6915 = vmatpush1.bf16.msra.mxu0 %v9381_v38  ;;  %v9474_v58 = vld [vmem:[%s12625_s1 + $0x1bc4] ss:$8 sps:$4 sm:$0xff]   ;;  %v9469_v38 = vld [vmem:[%s12625_s1 + $0xdc0] ss:$8 sps:$4 sm:$0xff]  }
 0x339   :  { %6342 = vmatprep.subr.bf16.mxu1 %v9386_v55  ;;  %6916 = vmatprep.subr.bf16.mxu0 %v9389_v40  ;;  %v9472_v55 = vld [vmem:[%s12625_s1 + $0x1bc0] ss:$8 sps:$4 sm:$0xff]   ;;  %v9477_v40 = vld [vmem:[%s12625_s1 + $0xdd4] ss:$8 sps:$4 sm:$0xff]  }
 0x33c   :  { %6343 = vmatpush1.bf16.msra.mxu1 %v9384_v4  ;;  %6917 = vmatpush1.bf16.msra.mxu0 %v9387_v5  ;;  %v9480_v4 = vld [vmem:[%s12625_s1 + $0x1bd4] ss:$8 sps:$4 sm:$0xff]   ;;  %v9475_v5 = vld [vmem:[%s12625_s1 + $0xdd0] ss:$8 sps:$4 sm:$0xff]  }
 0x33d   :  { %6344 = vmatprep.subr.bf16.mxu1 %v9392_v6  ;;  %6918 = vmatprep.subr.bf16.mxu0 %v9395_v7  ;;  %v9478_v6 = vld [vmem:[%s12625_s1 + $0x1bd0] ss:$8 sps:$4 sm:$0xff]   ;;  %v9483_v7 = vld [vmem:[%s12625_s1 + $0xde4] ss:$8 sps:$4 sm:$0xff]  }
 0x340   :  { %6345 = vmatpush1.bf16.msra.mxu1 %v9390_v8  ;;  %6919 = vmatpush1.bf16.msra.mxu0 %v9393_v62  ;;  %v9486_v8 = vld [vmem:[%s12625_s1 + $0x1be4] ss:$8 sps:$4 sm:$0xff]   ;;  %v9481_v62 = vld [vmem:[%s12625_s1 + $0xde0] ss:$8 sps:$4 sm:$0xff]  }
 0x341   :  { %6355 = vmatprep.subr.bf16.mxu1 %v9398_v10  ;;  %6929 = vmatprep.subr.bf16.mxu0 %v9402_v60  ;;  %v9484_v10 = vld [vmem:[%s12625_s1 + $0x1be0] ss:$8 sps:$4 sm:$0xff]   ;;  %v9489_v60 = vld [vmem:[%s12625_s1 + $0xdf4] ss:$8 sps:$4 sm:$0xff]  }
 0x343   :  { %6347 = vmatmul.mubr.bf16.vlgmr.msra.gmra.mrb[0].mxu1 %v12327_v13  ;;  %6921 = vmatmul.mubr.bf16.vlgmr.msra.gmra.mrb[0].mxu0 %v12331_v16 }
 0x344   :  { %6356 = vmatpush1.bf16.msra.mxu1 %v9396_v19  ;;  %6930 = vmatpush1.bf16.msra.mxu0 %v9400_v1  ;;  %v9492_v19 = vld [vmem:[%s12625_s1 + $0x1bf4] ss:$8 sps:$4 sm:$0xff]   ;;  %v9487_v1 = vld [vmem:[%s12625_s1 + $0xdf0] ss:$8 sps:$4 sm:$0xff]  }
 0x345   :  { %6357 = vmatprep.subr.bf16.mxu1 %v9405_v33  ;;  %6931 = vmatprep.subr.bf16.mxu0 %v9408_v49  ;;  %v9490_v33 = vld [vmem:[%s12625_s1 + $0x1bf0] ss:$8 sps:$4 sm:$0xff]   ;;  %v6974_v49 = vld [vmem:[%s12627_s3] sm:$0xff] }
 0x346   :  { %6387 = vmatprep.mubr.bf16.mxu1 %v1137_v0  ;;  %6961 = vmatprep.mubr.bf16.mxu0 %v1285_v43  ;;  %v6975_v0 = vld [vmem:[%s12627_s3 + $0x8] sm:$0xff]  ;;  %v1135_v43 = vcombine.high %v12327_v13, %v12327_v13 }
 0x348   :  { %6358 = vmatpush1.bf16.msra.mxu1 %v9403_v20  ;;  %6932 = vmatpush1.bf16.msra.mxu0 %v9406_v23  ;;  %v1283_v20 = vcombine.high %v12331_v16, %v12331_v16  ;;  %v7995_v23 = vpack.c.bf16 %v6975_v0, %v6974_v49  ;;  %v6978_v16 = vld [vmem:[%s12627_s3 + $0x20] sm:$0xff] }
 0x349   :  { %6359 = vmatprep.subr.bf16.mxu1 %v9411_v63  ;;  %6933 = vmatprep.subr.bf16.mxu0 %v9414_v9  ;;  %v9524_v63 = vmov 0.0|0.0   ;;  %v6976_v9 = vld [vmem:[%s12627_s3 + $0x10] sm:$0xff] }
 0x34c   :  { %6360 = vmatpush1.bf16.msra.mxu1 %v9409_v61  ;;  %6934 = vmatpush1.bf16.msra.mxu0 %v9412_v11  ;;  %v6977_v61 = vld [vmem:[%s12627_s3 + $0x18] sm:$0xff]  ;;  %v6979_v11 = vld [vmem:[%s12627_s3 + $0x28] sm:$0xff] }
 0x34d   :  { %6361 = vmatprep.subr.bf16.mxu1 %v9417_v24  ;;  %6935 = vmatprep.subr.bf16.mxu0 %v9420_v25  ;;  %v7998_v13 = vpack.c.bf16 %v6977_v61, %v6976_v9  ;;  %v8001_v24 = vpack.c.bf16 %v6979_v11, %v6978_v16  ;;  %v6980_v25 = vld [vmem:[%s12627_s3 + $0x30] sm:$0xff] }
 0x350   :  { %6362 = vmatpush1.bf16.msra.mxu1 %v9415_v26  ;;  %6936 = vmatpush1.bf16.msra.mxu0 %v9418_v27  ;;  %v6981_v26 = vld [vmem:[%s12627_s3 + $0x38] sm:$0xff] }
 0x351   :  { %6363 = vmatprep.subr.bf16.mxu1 %v9423_v28  ;;  %6937 = vmatprep.subr.bf16.mxu0 %v9426_v29  ;;  %v8004_v27 = vpack.c.bf16 %v6981_v26, %v6980_v25  ;;  %v6982_v28 = vld [vmem:[%s12627_s3 + $0x40] sm:$0xff]  ;;  %v6983_v29 = vld [vmem:[%s12627_s3 + $0x48] sm:$0xff] }
 0x354   :  { %6364 = vmatpush1.bf16.msra.mxu1 %v9421_v30  ;;  %6938 = vmatpush1.bf16.msra.mxu0 %v9424_v31  ;;  %v8007_v30 = vpack.c.bf16 %v6983_v29, %v6982_v28  ;;  %v6984_v31 = vld [vmem:[%s12627_s3 + $0x50] sm:$0xff] }
 0x355   :  { %6365 = vmatprep.subr.bf16.mxu1 %v9429_v14  ;;  %6939 = vmatprep.subr.bf16.mxu0 %v9432_v17  ;;  %v6985_v14 = vld [vmem:[%s12627_s3 + $0x58] sm:$0xff] }
 0x356   :  { %v8010_v17 = vpack.c.bf16 %v6985_v14, %v6984_v31 }
 0x358   :  { %6366 = vmatpush1.bf16.msra.mxu1 %v9427_v34  ;;  %6940 = vmatpush1.bf16.msra.mxu0 %v9430_v36  ;;  %v6986_v34 = vld [vmem:[%s12627_s3 + $0x60] sm:$0xff]  ;;  %v6987_v36 = vld [vmem:[%s12627_s3 + $0x68] sm:$0xff] }
 0x359   :  { %6367 = vmatprep.subr.bf16.mxu1 %v9435_v44  ;;  %6941 = vmatprep.subr.bf16.mxu0 %v9438_v21  ;;  %v8013_v44 = vpack.c.bf16 %v6987_v36, %v6986_v34  ;;  %v6988_v21 = vld [vmem:[%s12627_s3 + $0x70] sm:$0xff] }
 0x35c   :  { %6368 = vmatpush1.bf16.msra.mxu1 %v9433_v12  ;;  %6942 = vmatpush1.bf16.msra.mxu0 %v9436_v52  ;;  %v6989_v12 = vld [vmem:[%s12627_s3 + $0x78] sm:$0xff] }
 0x35d   :  { %6369 = vmatprep.subr.bf16.mxu1 %v9441_v46  ;;  %6943 = vmatprep.subr.bf16.mxu0 %v9444_v47  ;;  %v8016_v52 = vpack.c.bf16 %v6989_v12, %v6988_v21  ;;  %v6990_v46 = vld [vmem:[%s12627_s3 + $0x80] sm:$0xff]  ;;  %v6991_v47 = vld [vmem:[%s12627_s3 + $0x88] sm:$0xff] }
 0x360   :  { %6370 = vmatpush1.bf16.msra.mxu1 %v9439_v15  ;;  %6944 = vmatpush1.bf16.msra.mxu0 %v9442_v32  ;;  %v8019_v15 = vpack.c.bf16 %v6991_v47, %v6990_v46  ;;  %v6992_v32 = vld [vmem:[%s12627_s3 + $0x90] sm:$0xff] }
 0x361   :  { %6371 = vmatprep.subr.bf16.mxu1 %v9447_v48  ;;  %6945 = vmatprep.subr.bf16.mxu0 %v9450_v18  ;;  %v6993_v48 = vld [vmem:[%s12627_s3 + $0x98] sm:$0xff] }
 0x362   :  { %v8022_v18 = vpack.c.bf16 %v6993_v48, %v6992_v32 }
 0x364   :  { %6372 = vmatpush1.bf16.msra.mxu1 %v9445_v41  ;;  %6946 = vmatpush1.bf16.msra.mxu0 %v9448_v50  ;;  %v6994_v41 = vld [vmem:[%s12627_s3 + $0xa0] sm:$0xff]  ;;  %v6995_v50 = vld [vmem:[%s12627_s3 + $0xa8] sm:$0xff] }
 0x365   :  { %6373 = vmatprep.subr.bf16.mxu1 %v9453_v51  ;;  %6947 = vmatprep.subr.bf16.mxu0 %v9456_v53  ;;  %v8025_v51 = vpack.c.bf16 %v6995_v50, %v6994_v41  ;;  %v6996_v53 = vld [vmem:[%s12627_s3 + $0xb0] sm:$0xff] }
 0x368   :  { %6374 = vmatpush1.bf16.msra.mxu1 %v9451_v54  ;;  %6948 = vmatpush1.bf16.msra.mxu0 %v9454_v37  ;;  %v6997_v54 = vld [vmem:[%s12627_s3 + $0xb8] sm:$0xff] }
 0x369   :  { %6375 = vmatprep.subr.bf16.mxu1 %v9459_v56  ;;  %6949 = vmatprep.subr.bf16.mxu0 %v9462_v57  ;;  %v8028_v37 = vpack.c.bf16 %v6997_v54, %v6996_v53  ;;  %v6998_v56 = vld [vmem:[%s12627_s3 + $0xc0] sm:$0xff]  ;;  %v9525_v57 = vmov 0.0  }
 0x36c   :  { %6376 = vmatpush1.bf16.msra.mxu1 %v9457_v59  ;;  %6950 = vmatpush1.bf16.msra.mxu0 %v9460_v45  ;;  %v928_v59 = vsub.s32 0, %v9674_v42  ;;  %v924_v45 = vld [vmem:[%s12626_s2] sm:$0x3] }
 0x36d   :  { %6377 = vmatprep.subr.bf16.mxu1 %v9465_v35  ;;  %6951 = vmatprep.subr.bf16.mxu0 %v9468_v22  ;;  %v932_v35 = vsub.s32 1, %v9674_v42  ;;  %v7992_v42 = vld [vmem:[%s12628_s4] ss:$0 sm:$0xff] }
 0x36e   :  { %v929_v22 = vrot.slane %v924_v45, %v928_v59 }
 0x370   :  { %6378 = vmatpush1.bf16.msra.mxu1 %v9463_v39  ;;  %6952 = vmatpush1.bf16.msra.mxu0 %v9466_v2  ;;  %v933_v39 = vrot.slane %v924_v45, %v932_v35 }
 0x371   :  { %6379 = vmatprep.subr.bf16.mxu1 %v9471_v3  ;;  %6953 = vmatprep.subr.bf16.mxu0 %v9474_v58 }
 0x374   :  { %6380 = vmatpush1.bf16.msra.mxu1 %v9469_v38  ;;  %6954 = vmatpush1.bf16.msra.mxu0 %v9472_v55 }
 0x375   :  { %6381 = vmatprep.subr.bf16.mxu1 %v9477_v40  ;;  %6955 = vmatprep.subr.bf16.mxu0 %v9480_v4 }
 0x378   :  { %6382 = vmatpush1.bf16.msra.mxu1 %v9475_v5  ;;  %6956 = vmatpush1.bf16.msra.mxu0 %v9478_v6 }
 0x379   :  { %6383 = vmatprep.subr.bf16.mxu1 %v9483_v7  ;;  %6957 = vmatprep.subr.bf16.mxu0 %v9486_v8 }
 0x37c   :  { %6384 = vmatpush1.bf16.msra.mxu1 %v9481_v62  ;;  %6958 = vmatpush1.bf16.msra.mxu0 %v9484_v10 }
 0x37d   :  { %6385 = vmatprep.subr.bf16.mxu1 %v9489_v60  ;;  %6959 = vmatprep.subr.bf16.mxu0 %v9492_v19 }
 0x380   :  { %6386 = vmatpush1.bf16.msra.mxu1 %v9487_v1  ;;  %6960 = vmatpush1.bf16.msra.mxu0 %v9490_v33 }
 0x381   :  { %7994 = vmatprep.subr.bf16.mxu1 %v9524_v63 }
 0x383   :  { %6388 = vmatmul.mubr.bf16.vlgmr.msra.gmra.mrb[0].mxu1 %v1135_v43  ;;  %6962 = vmatmul.mubr.bf16.vlgmr.msra.gmra.mrb[0].mxu0 %v1283_v20 }
 0x384   :  { %7996 = vmatpush1.bf16.msra.mxu1 %v7995_v23 }
 0x385   :  { %7997 = vmatprep.subr.bf16.mxu1 %v9524_v63 }
 0x388   :  { %7999 = vmatpush1.bf16.msra.mxu1 %v7998_v13 }
 0x389   :  { %8000 = vmatprep.subr.bf16.mxu1 %v9524_v63 }
 0x38c   :  { %8002 = vmatpush1.bf16.msra.mxu1 %v8001_v24 }
 0x38d   :  { %8003 = vmatprep.subr.bf16.mxu1 %v9524_v63 }
 0x390   :  { %8005 = vmatpush1.bf16.msra.mxu1 %v8004_v27 }
 0x391   :  { %8006 = vmatprep.subr.bf16.mxu1 %v9524_v63 }
 0x394   :  { %8008 = vmatpush1.bf16.msra.mxu1 %v8007_v30 }
 0x395   :  { %8009 = vmatprep.subr.bf16.mxu1 %v9524_v63 }
 0x398   :  { %8011 = vmatpush1.bf16.msra.mxu1 %v8010_v17 }
 0x399   :  { %8012 = vmatprep.subr.bf16.mxu1 %v9524_v63 }
 0x39c   :  { %8014 = vmatpush1.bf16.msra.mxu1 %v8013_v44 }
 0x39d   :  { %8015 = vmatprep.subr.bf16.mxu1 %v9524_v63 }
 0x3a0   :  { %8017 = vmatpush1.bf16.msra.mxu1 %v8016_v52 }
 0x3a1   :  { %8018 = vmatprep.subr.bf16.mxu1 %v9524_v63 }
 0x3a4   :  { %8020 = vmatpush1.bf16.msra.mxu1 %v8019_v15 }
 0x3a5   :  { %8021 = vmatprep.subr.bf16.mxu1 %v9524_v63 }
 0x3a8   :  { %8023 = vmatpush1.bf16.msra.mxu1 %v8022_v18 }
 0x3a9   :  { %8024 = vmatprep.subr.bf16.mxu1 %v9524_v63 }
 0x3ac   :  { %8026 = vmatpush1.bf16.msra.mxu1 %v8025_v51 }
 0x3ad   :  { %8027 = vmatprep.subr.bf16.mxu1 %v9524_v63 }
 0x3b0   :  { %8029 = vmatpush1.bf16.msra.mxu1 %v8028_v37 }
 0x3b1   :  { %7058 = vmatprep.subr.mxu1 %v9525_v57 }
 0x3b4   :  { %7059 = vmatpush1.msra.mxu1 %v6998_v56 }
 0x456   :  { %v6389_v2 = vpop.f32.mrb[0].mxu1  ;;  %v6963_v3 = vpop.f32.mrb[0].mxu0 }
 0x457   :  { %v8030_v58 = vadd.f32 %v6389_v2, %v929_v22  ;;  %v6391_v38 = vpop.f32.mrb[1].mxu1  ;;  %v6965_v55 = vpop.f32.mrb[1].mxu0 }
 0x458   :  { %v8032_v40 = vadd.f32 %v6391_v38, %v933_v39  ;;  %v6393_v4 = vpop.f32.mrb[2].mxu1  ;;  %v6967_v5 = vpop.f32.mrb[2].mxu0 }
 0x459   :  { %v8031_v6 = vadd.f32 %v8030_v58, %v6963_v3  ;;  %v6394_v7 = vpop.f32.mrb[3].mxu1  ;;  %v6968_v8 = vpop.f32.mrb[3].mxu0 }
 0x45a   :  { %v8033_v62 = vadd.f32 %v8032_v40, %v6965_v55 }
 0x45b   :  { %v6970_v10 = vmax.f32 %v8031_v6, 0.0 }
 0x45c   :  { %v6971_v60 = vmax.f32 %v8033_v62, 0.0 }
 0x45d   :  { %v6972_v1 = vmin.f32 %v6970_v10, 6.0 }
 0x45e   :  { %v6973_v19 = vmin.f32 %v6971_v60, 6.0 }
 0x460   :  { %7993 = vmatprep.mubr.msk.f32.mxu1 %vm7006_vm0, %v6973_v19 }
 0x461   :  { %7075 = vmatmul.mubr.f32.vlgmr.msra.gmra.mrb[4].mxu1 %v6972_v1 }
 0x534   :  { %v7076_v33 = vpop.f32.mrb[4].mxu1 }
 0x535   :  { %v7077_v49 = vadd.f32 %v7992_v42, %v7076_v33  ;;  %v7078_v0 = vpop.f32.mrb[5].mxu1 }
 0x537   :  { %7081 = vst.msk [vmem:[#allocation2] sm:$0x3] %vm7080_vm1, %v7077_v49 }
 0x538   :  { %9510 = shalt.err (!%p9507_p4)
}
 0x539   :  { %s9511_s23 = scalar_lea.hbm %s12629_s5, 32 }
 0x53a   :  { %p9512_p5 = scmp.ne.s32.totalorder %s12629_s5, %s9511_s23  ;;  %p9515_p6 = scmp.lt.u32.totalorder %s9511_s23, %s12629_s5 }
 0x53c   :  { %p9517_p7 = pnand %p9515_p6, %p9512_p5 }
 0x53e   :  { %9520 = shalt.err (!%p9517_p7)
}
 0x53f   :  { %7091 = dma.vmem_to_hbm [thread:$0]  %s7089_s19, 32, %s12629_s5, [#allocation3]  }
 0x540   :  { %9521 = dma.done.wait [#allocation3], 32  }
 0x541   :  { %9522 = vsyncadd [#allocation3], 4294967264 }
 0x542   :  { %7095 = vsyncpa [#allocation3], 1 }

</bundles_post_ra>
